<compile_context>
chip_gen: v7x
topology: tpu7x:2x2x1
jax: 0.10.0
libtpu: 0.0.40
codegen_flags: <defaults>
</compile_context>

<pallas_src>
import functools
import math

import jax
import jax.numpy as jnp
from jax import lax
from jax.experimental import pallas as pl
from jax.experimental.pallas import tpu as pltpu


def _round_up(x: int, m: int) -> int:
    return ((x + m - 1) // m) * m


def _gelu(h, exact=False):
    """GELU in f32. tanh-approx keeps the transcendental on the EUP slot."""
    if exact:
        return h * (0.5 + 0.5 * lax.erf(h * jnp.float32(1.0 / math.sqrt(2.0))))
    c = jnp.float32(math.sqrt(2.0 / math.pi))
    return 0.5 * h * (1.0 + jnp.tanh(c * (h + jnp.float32(0.044715) * h * h * h)))


def ffn_resident_kernel(x_ref, w1_ref, b1_ref, w2_ref, b2_ref, o_ref, *,
                        tk, exact_gelu):
    """One row tile; W1/W2 fully resident in VMEM; DFF chunked in-kernel.

    x_ref:  (tm, D)    f32   (pipelined over the row grid axis)
    w1_ref: (D, DFF)   bf16  resident (single buffer)
    b1_ref: (1, DFF)   f32   resident
    w2_ref: (DFF, D)   bf16  resident (single buffer)
    b2_ref: (1, D)     f32   resident
    o_ref:  (tm, D)    x.dtype
    """
    x = x_ref[...].astype(w1_ref.dtype)     # f32 -> bf16 in-kernel (free vs MXU)
    dff = w1_ref.shape[1]
    d_out = w2_ref.shape[1]
    acc = jnp.zeros((x.shape[0], d_out), jnp.float32)
    for c in range(dff // tk):               # static, unrolled chunk loop
        lo = c * tk
        h = jnp.dot(x, w1_ref[:, lo:lo + tk],
                    preferred_element_type=jnp.float32)
        h = _gelu(h + b1_ref[:, lo:lo + tk], exact=exact_gelu)
        acc = acc + jnp.dot(h.astype(w2_ref.dtype), w2_ref[lo:lo + tk, :],
                            preferred_element_type=jnp.float32)
    # TODO(synk): dropout (p=0.1) is identity at inference; training-mode
    # dropout would mask with pltpu.prng_seed + pltpu.prng_random_bits here.
    o_ref[...] = (acc + b2_ref[...]).astype(o_ref.dtype)


def ffn_streaming_kernel(x_ref, w1_ref, b1_ref, w2_ref, b2_ref, o_ref, acc_ref,
                         *, exact_gelu):
    """Fallback when weights do not fit resident in VMEM (e.g. wide FFN on v7x).

    grid = (row tiles, DFF chunks). W1/W2/b1 stream one DFF chunk per step;
    acc_ref holds the f32 partial of the second matmul across the DFF axis.
    """
    k = pl.program_id(1)

    @pl.when(k == 0)
    def _init():
        acc_ref[...] = jnp.zeros_like(acc_ref)

    x = x_ref[...].astype(w1_ref.dtype)
    h = jnp.dot(x, w1_ref[...], preferred_element_type=jnp.float32) + b1_ref[...]
    h = _gelu(h, exact=exact_gelu)
    acc_ref[...] += jnp.dot(h.astype(w2_ref.dtype), w2_ref[...],
                            preferred_element_type=jnp.float32)

    @pl.when(k == pl.num_programs(1) - 1)
    def _finalize():
        o_ref[...] = (acc_ref[...] + b2_ref[...]).astype(o_ref.dtype)


def feed_forward(x, w1, b1, w2, b2, *, tm=512, exact_gelu=False,
                 max_resident_weight_bytes=40 << 20):
    """x: (batch, seq, d_model) f32. Returns same shape/dtype.

    w1: (d_model, dff) bf16, b1: (1, dff) f32, w2: (dff, d_model) bf16,
    b2: (1, d_model) f32 -- already in kernel layout (see init_params), so no
    per-call casts / transposes / pads are performed in this wrapper.
    """
    B, S, D = x.shape
    DFF = w1.shape[1]
    rows = B * S

    # Defensive no-ops in the expected usage (bf16 weights, (1,N) f32 biases).
    w_dtype = jnp.bfloat16
    if w1.dtype != w_dtype:
        w1 = w1.astype(w_dtype)
    if w2.dtype != w_dtype:
        w2 = w2.astype(w_dtype)
    b1 = jnp.asarray(b1, jnp.float32).reshape(1, DFF)
    b2 = jnp.asarray(b2, jnp.float32).reshape(1, D)

    x2d = x.reshape(rows, D)                 # metadata-only view

    # Row tiling: big MXU-aligned tiles, but always >= 2 row tiles when rows
    # allow so the "parallel" axis feeds both v7x TensorCores.
    sub = 8                                  # f32 sublane quantum
    tm = max(sub, _round_up(tm, sub))
    tm_eff = min(tm, _round_up(rows, sub))
    grid_m = pl.cdiv(rows, tm_eff)
    if grid_m < 2 and rows > sub:
        tm_eff = _round_up(pl.cdiv(rows, 2), sub)
        grid_m = pl.cdiv(rows, tm_eff)
    # Non-divisible rows handled by Pallas's ragged last block: OOB input rows
    # are garbage but their outputs are dropped / never observed.

    # DFF chunk width (in-kernel loop / streaming fallback); must divide DFF.
    if DFF % 512 == 0:
        tk = 512
    elif DFF % 256 == 0:
        tk = 256
    elif DFF % 128 == 0:
        tk = 128
    else:
        tk = DFF

    w_item = jnp.dtype(w_dtype).itemsize
    out_item = jnp.dtype(x.dtype).itemsize
    weight_bytes = 2 * D * DFF * w_item + (DFF + D) * 4

    cost = pl.CostEstimate(
        flops=4 * rows * D * DFF,            # two matmuls, 2*M*K*N each
        transcendentals=rows * DFF,          # one tanh/erf per hidden element
        bytes_accessed=int(rows * D * (4 + out_item) + weight_bytes),
    )

    if weight_bytes <= max_resident_weight_bytes:
        # ---- primary path: weights fully resident in VMEM -----------------
        need = (weight_bytes
                + 2 * tm_eff * D * 4         # x tile (f32, double-buffered)
                + 2 * tm_eff * D * out_item  # out tile (double-buffered)
                + tm_eff * D * (2 + 4)       # bf16 x copy + f32 accumulator
                + tm_eff * tk * (4 + 2))     # f32 h chunk + bf16 copy
        vmem_limit = int(min(max(int(need * 1.25), 32 << 20), 48 << 20))

        kernel = functools.partial(ffn_resident_kernel, tk=tk,
                                   exact_gelu=exact_gelu)
        out2d = pl.pallas_call(
            kernel,
            out_shape=jax.ShapeDtypeStruct((rows, D), x.dtype),
            grid_spec=pltpu.PrefetchScalarGridSpec(
                num_scalar_prefetch=0,
                grid=(grid_m,),
                in_specs=[
                    # Token tile: pipelined over the row axis.
                    pl.BlockSpec((tm_eff, D), lambda i: (i, 0)),
                    # Weights/biases: whole array resident in VMEM (single
                    # buffer, copied in once, never re-streamed).
                    pl.BlockSpec(memory_space=pltpu.MemorySpace.VMEM),  # W1
                    pl.BlockSpec(memory_space=pltpu.MemorySpace.VMEM),  # b1
                    pl.BlockSpec(memory_space=pltpu.MemorySpace.VMEM),  # W2
                    pl.BlockSpec(memory_space=pltpu.MemorySpace.VMEM),  # b2
                ],
                out_specs=pl.BlockSpec((tm_eff, D), lambda i: (i, 0)),
            ),
            compiler_params=pltpu.CompilerParams(
                dimension_semantics=("parallel",),
                vmem_limit_bytes=vmem_limit,
            ),
            cost_estimate=cost,
        )(x2d, w1, b1, w2, b2)
    else:
        # ---- fallback: stream W1/W2 chunks over a DFF grid axis -----------
        grid_k = DFF // tk
        need = (2 * (D * tk + tk * D) * w_item   # W1/W2 chunks (2 buffers each)
                + 2 * (tk + D) * 4               # b1 chunk / b2 (2 buffers)
                + 2 * tm_eff * D * 4             # x tile
                + 2 * tm_eff * D * out_item      # out tile
                + tm_eff * D * (2 + 4)           # bf16 x copy + acc scratch
                + tm_eff * tk * (4 + 2))         # f32 h + bf16 copy
        vmem_limit = int(min(max(int(need * 1.25), 32 << 20), 48 << 20))

        kernel = functools.partial(ffn_streaming_kernel, exact_gelu=exact_gelu)
        out2d = pl.pallas_call(
            kernel,
            out_shape=jax.ShapeDtypeStruct((rows, D), x.dtype),
            grid_spec=pltpu.PrefetchScalarGridSpec(
                num_scalar_prefetch=0,
                grid=(grid_m, grid_k),
                in_specs=[
                    pl.BlockSpec((tm_eff, D), lambda i, k: (i, 0)),  # x (no re-DMA over k)
                    pl.BlockSpec((D, tk), lambda i, k: (0, k)),      # W1 chunk
                    pl.BlockSpec((1, tk), lambda i, k: (0, k)),      # b1 chunk
                    pl.BlockSpec((tk, D), lambda i, k: (k, 0)),      # W2 chunk
                    pl.BlockSpec((1, D), lambda i, k: (0, 0)),       # b2
                ],
                out_specs=pl.BlockSpec((tm_eff, D), lambda i, k: (i, 0)),
                scratch_shapes=[pltpu.VMEM((tm_eff, D), jnp.float32)],
            ),
            compiler_params=pltpu.CompilerParams(
                dimension_semantics=("parallel", "arbitrary"),
                vmem_limit_bytes=vmem_limit,
            ),
            cost_estimate=cost,
        )(x2d, w1, b1, w2, b2)

    return out2d.reshape(B, S, D)


def init_params(key, d_model_, dim_feedforward_, *, weight_dtype=jnp.bfloat16):
    """nn.Linear-style init: U(-1/sqrt(fan_in), +1/sqrt(fan_in)).

    Weights are returned transposed to [in, out] and cast to bf16 ONCE here
    (stored at rest in the kernel's compute dtype); biases are f32 rows of
    shape (1, out), so feed_forward performs zero per-call casts/reshapes.
    """
    k1, k2, k3, k4 = jax.random.split(key, 4)
    bound1 = 1.0 / math.sqrt(d_model_)
    bound2 = 1.0 / math.sqrt(dim_feedforward_)
    w1 = jax.random.uniform(k1, (d_model_, dim_feedforward_), jnp.float32,
                            minval=-bound1, maxval=bound1).astype(weight_dtype)
    b1 = jax.random.uniform(k2, (1, dim_feedforward_), jnp.float32,
                            minval=-bound1, maxval=bound1)
    w2 = jax.random.uniform(k3, (dim_feedforward_, d_model_), jnp.float32,
                            minval=-bound2, maxval=bound2).astype(weight_dtype)
    b2 = jax.random.uniform(k4, (1, d_model_), jnp.float32,
                            minval=-bound2, maxval=bound2)
    return w1, b1, w2, b2


if __name__ == "__main__":
    # Small token count, real module feature dims (d_model=512, dff=2048).
    batch, seq = 2, 8
    d_model_, dff_ = 512, 2048

    key = jax.random.PRNGKey(0)
    kx, kp = jax.random.split(key)
    x = jax.random.normal(kx, (batch, seq, d_model_), jnp.float32)
    w1, b1, w2, b2 = init_params(kp, d_model_, dff_)

    def reference(x3d):
        """Plain-JAX reference mirroring the kernel's bf16 rounding of matmul
        inputs (f32 accumulation), but using nn.GELU()'s exact erf form."""
        bsz, slen, dm = x3d.shape
        xb = x3d.reshape(-1, dm).astype(jnp.bfloat16).astype(jnp.float32)
        w1f = w1.astype(jnp.float32)
        w2f = w2.astype(jnp.float32)
        h = xb @ w1f + b1
        h = 0.5 * h * (1.0 + lax.erf(h / jnp.float32(math.sqrt(2.0))))
        h = h.astype(jnp.bfloat16).astype(jnp.float32)
        y = h @ w2f + b2
        return y.reshape(bsz, slen, dm)

    def check(got, want, tag):
        assert got.shape == want.shape, (tag, got.shape, want.shape)
        assert got.dtype == want.dtype, (tag, got.dtype, want.dtype)
        err = float(jnp.max(jnp.abs(got - want)))
        # Tolerance deliberately covers bf16 rounding + tanh-approx GELU
        # (per-element deviation from exact erf GELU is ~1e-3).
        assert jnp.allclose(got, want, atol=1e-2, rtol=1e-2), \
            f"{tag}: max abs err {err}"

    # 1) Primary path: resident bf16 weights; rows=16 -> 2 row tiles (both TCs).
    out = jax.block_until_ready(feed_forward(x, w1, b1, w2, b2))
    check(out, reference(x), "resident")

    # 2) Ragged rows (batch*seq not a multiple of the row tile): no pad pass.
    x_r = x[:, :5]
    out_r = jax.block_until_ready(feed_forward(x_r, w1, b1, w2, b2))
    check(out_r, reference(x_r), "ragged")

    # 3) Streaming-weights fallback (forced): the path used when 2*D*DFF bf16
    #    weights would not fit resident in VMEM (e.g. wide FFNs on v7x).
    out_s = jax.block_until_ready(
        feed_forward(x, w1, b1, w2, b2, max_resident_weight_bytes=0))
    check(out_s, reference(x), "streaming")

    print("KERNEL_OK")
</pallas_src>

<mosaic_0001>
module attributes {stable_mosaic.version = 11 : i64} {
  func.func @ffn_resident_kernel(%arg0: i32, %arg1: memref<8x512xf32, #tpu.memory_space<vmem>>, %arg2: memref<512x2048xbf16, #tpu.memory_space<vmem>>, %arg3: memref<1x2048xf32, #tpu.memory_space<vmem>>, %arg4: memref<2048x512xbf16, #tpu.memory_space<vmem>>, %arg5: memref<1x512xf32, #tpu.memory_space<vmem>>, %arg6: memref<8x512xf32, #tpu.memory_space<vmem>>) attributes {dimension_semantics = [#tpu.dimension_semantics<parallel>], iteration_bounds = array<i64: 2>, scalar_prefetch = 0 : i64, scratch_operands = 0 : i64, tpu.core_type = #tpu.core_type<tc>, window_params = [{transform_indices = @transform_0, window_bounds = array<i64: 8, 512>}, {pipeline_mode = #tpu.pipeline_mode<synchronous>, transform_indices = @transform_1, window_bounds = array<i64: 512, 2048>}, {pipeline_mode = #tpu.pipeline_mode<synchronous>, transform_indices = @transform_2, window_bounds = array<i64: 1, 2048>}, {pipeline_mode = #tpu.pipeline_mode<synchronous>, transform_indices = @transform_3, window_bounds = array<i64: 2048, 512>}, {pipeline_mode = #tpu.pipeline_mode<synchronous>, transform_indices = @transform_4, window_bounds = array<i64: 1, 512>}, {transform_indices = @transform_5, window_bounds = array<i64: 8, 512>}]} {
    %c0 = arith.constant 0 : index
    %c0_0 = arith.constant 0 : index
    %0 = vector.load %arg1[%c0, %c0_0] : memref<8x512xf32, #tpu.memory_space<vmem>>, vector<8x512xf32>
    %1 = arith.truncf %0 : vector<8x512xf32> to vector<8x512xbf16>
    %cst = arith.constant 0.000000e+00 : f32
    %2 = vector.broadcast %cst : f32 to vector<8x512xf32>
    %c0_1 = arith.constant 0 : index
    %c0_2 = arith.constant 0 : index
    %3 = vector.load %arg2[%c0_1, %c0_2] : memref<512x2048xbf16, #tpu.memory_space<vmem>>, vector<512x512xbf16>
    %cst_3 = arith.constant dense<0.000000e+00> : vector<8x512xf32>
    %4 = tpu.matmul %1, %3, %cst_3 {dimension_numbers = #tpu.dot_dimension_numbers<[1], [0], [0], [1], [0, 0, 1, 1], [], []>} : vector<8x512xbf16>, vector<512x512xbf16>, vector<8x512xf32> -> vector<8x512xf32>
    %c0_4 = arith.constant 0 : index
    %c0_5 = arith.constant 0 : index
    %5 = vector.load %arg3[%c0_4, %c0_5] : memref<1x2048xf32, #tpu.memory_space<vmem>>, vector<1x512xf32>
    %6 = vector.broadcast %5 : vector<1x512xf32> to vector<8x512xf32>
    %7 = arith.addf %4, %6 : vector<8x512xf32>
    %cst_6 = arith.constant 5.000000e-01 : f32
    %8 = vector.broadcast %cst_6 : f32 to vector<8x512xf32>
    %9 = arith.mulf %8, %7 : vector<8x512xf32>
    %cst_7 = arith.constant 4.471500e-02 : f32
    %10 = vector.broadcast %cst_7 : f32 to vector<8x512xf32>
    %11 = arith.mulf %10, %7 : vector<8x512xf32>
    %12 = arith.mulf %11, %7 : vector<8x512xf32>
    %13 = arith.mulf %12, %7 : vector<8x512xf32>
    %14 = arith.addf %7, %13 : vector<8x512xf32>
    %cst_8 = arith.constant 0.797884583 : f32
    %15 = vector.broadcast %cst_8 : f32 to vector<8x512xf32>
    %16 = arith.mulf %15, %14 : vector<8x512xf32>
    %17 = math.tanh %16 : vector<8x512xf32>
    %cst_9 = arith.constant 1.000000e+00 : f32
    %18 = vector.broadcast %cst_9 : f32 to vector<8x512xf32>
    %19 = arith.addf %18, %17 : vector<8x512xf32>
    %20 = arith.mulf %9, %19 : vector<8x512xf32>
    %21 = arith.truncf %20 : vector<8x512xf32> to vector<8x512xbf16>
    %c0_10 = arith.constant 0 : index
    %c0_11 = arith.constant 0 : index
    %22 = vector.load %arg4[%c0_10, %c0_11] : memref<2048x512xbf16, #tpu.memory_space<vmem>>, vector<512x512xbf16>
    %cst_12 = arith.constant dense<0.000000e+00> : vector<8x512xf32>
    %23 = tpu.matmul %21, %22, %cst_12 {dimension_numbers = #tpu.dot_dimension_numbers<[1], [0], [0], [1], [0, 0, 1, 1], [], []>} : vector<8x512xbf16>, vector<512x512xbf16>, vector<8x512xf32> -> vector<8x512xf32>
    %24 = arith.addf %2, %23 : vector<8x512xf32>
    %c0_13 = arith.constant 0 : index
    %c512 = arith.constant 512 : index
    %25 = vector.load %arg2[%c0_13, %c512] : memref<512x2048xbf16, #tpu.memory_space<vmem>>, vector<512x512xbf16>
    %cst_14 = arith.constant dense<0.000000e+00> : vector<8x512xf32>
    %26 = tpu.matmul %1, %25, %cst_14 {dimension_numbers = #tpu.dot_dimension_numbers<[1], [0], [0], [1], [0, 0, 1, 1], [], []>} : vector<8x512xbf16>, vector<512x512xbf16>, vector<8x512xf32> -> vector<8x512xf32>
    %c0_15 = arith.constant 0 : index
    %c512_16 = arith.constant 512 : index
    %27 = vector.load %arg3[%c0_15, %c512_16] : memref<1x2048xf32, #tpu.memory_space<vmem>>, vector<1x512xf32>
    %28 = vector.broadcast %27 : vector<1x512xf32> to vector<8x512xf32>
    %29 = arith.addf %26, %28 : vector<8x512xf32>
    %cst_17 = arith.constant 5.000000e-01 : f32
    %30 = vector.broadcast %cst_17 : f32 to vector<8x512xf32>
    %31 = arith.mulf %30, %29 : vector<8x512xf32>
    %cst_18 = arith.constant 4.471500e-02 : f32
    %32 = vector.broadcast %cst_18 : f32 to vector<8x512xf32>
    %33 = arith.mulf %32, %29 : vector<8x512xf32>
    %34 = arith.mulf %33, %29 : vector<8x512xf32>
    %35 = arith.mulf %34, %29 : vector<8x512xf32>
    %36 = arith.addf %29, %35 : vector<8x512xf32>
    %cst_19 = arith.constant 0.797884583 : f32
    %37 = vector.broadcast %cst_19 : f32 to vector<8x512xf32>
    %38 = arith.mulf %37, %36 : vector<8x512xf32>
    %39 = math.tanh %38 : vector<8x512xf32>
    %cst_20 = arith.constant 1.000000e+00 : f32
    %40 = vector.broadcast %cst_20 : f32 to vector<8x512xf32>
    %41 = arith.addf %40, %39 : vector<8x512xf32>
    %42 = arith.mulf %31, %41 : vector<8x512xf32>
    %43 = arith.truncf %42 : vector<8x512xf32> to vector<8x512xbf16>
    %c512_21 = arith.constant 512 : index
    %c0_22 = arith.constant 0 : index
    %44 = vector.load %arg4[%c512_21, %c0_22] : memref<2048x512xbf16, #tpu.memory_space<vmem>>, vector<512x512xbf16>
    %cst_23 = arith.constant dense<0.000000e+00> : vector<8x512xf32>
    %45 = tpu.matmul %43, %44, %cst_23 {dimension_numbers = #tpu.dot_dimension_numbers<[1], [0], [0], [1], [0, 0, 1, 1], [], []>} : vector<8x512xbf16>, vector<512x512xbf16>, vector<8x512xf32> -> vector<8x512xf32>
    %46 = arith.addf %24, %45 : vector<8x512xf32>
    %c0_24 = arith.constant 0 : index
    %c1024 = arith.constant 1024 : index
    %47 = vector.load %arg2[%c0_24, %c1024] : memref<512x2048xbf16, #tpu.memory_space<vmem>>, vector<512x512xbf16>
    %cst_25 = arith.constant dense<0.000000e+00> : vector<8x512xf32>
    %48 = tpu.matmul %1, %47, %cst_25 {dimension_numbers = #tpu.dot_dimension_numbers<[1], [0], [0], [1], [0, 0, 1, 1], [], []>} : vector<8x512xbf16>, vector<512x512xbf16>, vector<8x512xf32> -> vector<8x512xf32>
    %c0_26 = arith.constant 0 : index
    %c1024_27 = arith.constant 1024 : index
    %49 = vector.load %arg3[%c0_26, %c1024_27] : memref<1x2048xf32, #tpu.memory_space<vmem>>, vector<1x512xf32>
    %50 = vector.broadcast %49 : vector<1x512xf32> to vector<8x512xf32>
    %51 = arith.addf %48, %50 : vector<8x512xf32>
    %cst_28 = arith.constant 5.000000e-01 : f32
    %52 = vector.broadcast %cst_28 : f32 to vector<8x512xf32>
    %53 = arith.mulf %52, %51 : vector<8x512xf32>
    %cst_29 = arith.constant 4.471500e-02 : f32
    %54 = vector.broadcast %cst_29 : f32 to vector<8x512xf32>
    %55 = arith.mulf %54, %51 : vector<8x512xf32>
    %56 = arith.mulf %55, %51 : vector<8x512xf32>
    %57 = arith.mulf %56, %51 : vector<8x512xf32>
    %58 = arith.addf %51, %57 : vector<8x512xf32>
    %cst_30 = arith.constant 0.797884583 : f32
    %59 = vector.broadcast %cst_30 : f32 to vector<8x512xf32>
    %60 = arith.mulf %59, %58 : vector<8x512xf32>
    %61 = math.tanh %60 : vector<8x512xf32>
    %cst_31 = arith.constant 1.000000e+00 : f32
    %62 = vector.broadcast %cst_31 : f32 to vector<8x512xf32>
    %63 = arith.addf %62, %61 : vector<8x512xf32>
    %64 = arith.mulf %53, %63 : vector<8x512xf32>
    %65 = arith.truncf %64 : vector<8x512xf32> to vector<8x512xbf16>
    %c1024_32 = arith.constant 1024 : index
    %c0_33 = arith.constant 0 : index
    %66 = vector.load %arg4[%c1024_32, %c0_33] : memref<2048x512xbf16, #tpu.memory_space<vmem>>, vector<512x512xbf16>
    %cst_34 = arith.constant dense<0.000000e+00> : vector<8x512xf32>
    %67 = tpu.matmul %65, %66, %cst_34 {dimension_numbers = #tpu.dot_dimension_numbers<[1], [0], [0], [1], [0, 0, 1, 1], [], []>} : vector<8x512xbf16>, vector<512x512xbf16>, vector<8x512xf32> -> vector<8x512xf32>
    %68 = arith.addf %46, %67 : vector<8x512xf32>
    %c0_35 = arith.constant 0 : index
    %c1536 = arith.constant 1536 : index
    %69 = vector.load %arg2[%c0_35, %c1536] : memref<512x2048xbf16, #tpu.memory_space<vmem>>, vector<512x512xbf16>
    %cst_36 = arith.constant dense<0.000000e+00> : vector<8x512xf32>
    %70 = tpu.matmul %1, %69, %cst_36 {dimension_numbers = #tpu.dot_dimension_numbers<[1], [0], [0], [1], [0, 0, 1, 1], [], []>} : vector<8x512xbf16>, vector<512x512xbf16>, vector<8x512xf32> -> vector<8x512xf32>
    %c0_37 = arith.constant 0 : index
    %c1536_38 = arith.constant 1536 : index
    %71 = vector.load %arg3[%c0_37, %c1536_38] : memref<1x2048xf32, #tpu.memory_space<vmem>>, vector<1x512xf32>
    %72 = vector.broadcast %71 : vector<1x512xf32> to vector<8x512xf32>
    %73 = arith.addf %70, %72 : vector<8x512xf32>
    %cst_39 = arith.constant 5.000000e-01 : f32
    %74 = vector.broadcast %cst_39 : f32 to vector<8x512xf32>
    %75 = arith.mulf %74, %73 : vector<8x512xf32>
    %cst_40 = arith.constant 4.471500e-02 : f32
    %76 = vector.broadcast %cst_40 : f32 to vector<8x512xf32>
    %77 = arith.mulf %76, %73 : vector<8x512xf32>
    %78 = arith.mulf %77, %73 : vector<8x512xf32>
    %79 = arith.mulf %78, %73 : vector<8x512xf32>
    %80 = arith.addf %73, %79 : vector<8x512xf32>
    %cst_41 = arith.constant 0.797884583 : f32
    %81 = vector.broadcast %cst_41 : f32 to vector<8x512xf32>
    %82 = arith.mulf %81, %80 : vector<8x512xf32>
    %83 = math.tanh %82 : vector<8x512xf32>
    %cst_42 = arith.constant 1.000000e+00 : f32
    %84 = vector.broadcast %cst_42 : f32 to vector<8x512xf32>
    %85 = arith.addf %84, %83 : vector<8x512xf32>
    %86 = arith.mulf %75, %85 : vector<8x512xf32>
    %87 = arith.truncf %86 : vector<8x512xf32> to vector<8x512xbf16>
    %c1536_43 = arith.constant 1536 : index
    %c0_44 = arith.constant 0 : index
    %88 = vector.load %arg4[%c1536_43, %c0_44] : memref<2048x512xbf16, #tpu.memory_space<vmem>>, vector<512x512xbf16>
    %cst_45 = arith.constant dense<0.000000e+00> : vector<8x512xf32>
    %89 = tpu.matmul %87, %88, %cst_45 {dimension_numbers = #tpu.dot_dimension_numbers<[1], [0], [0], [1], [0, 0, 1, 1], [], []>} : vector<8x512xbf16>, vector<512x512xbf16>, vector<8x512xf32> -> vector<8x512xf32>
    %90 = arith.addf %68, %89 : vector<8x512xf32>
    %c0_46 = arith.constant 0 : index
    %c0_47 = arith.constant 0 : index
    %91 = vector.load %arg5[%c0_46, %c0_47] : memref<1x512xf32, #tpu.memory_space<vmem>>, vector<1x512xf32>
    %92 = vector.broadcast %91 : vector<1x512xf32> to vector<8x512xf32>
    %93 = arith.addf %90, %92 : vector<8x512xf32>
    %c0_48 = arith.constant 0 : index
    %c0_49 = arith.constant 0 : index
    %94 = vector.load %arg6[%c0_48, %c0_49] : memref<8x512xf32, #tpu.memory_space<vmem>>, vector<8x512xf32>
    tpu.vector_store %arg6[%c0_48, %c0_49], %93 {strides = array<i32>} : memref<8x512xf32, #tpu.memory_space<vmem>>, vector<8x512xf32>,
    return
  }
  func.func @transform_0(%arg0: i32) -> (i32, i32) {
    %c0_i32 = arith.constant 0 : i32
    %c0_i32_0 = arith.constant 0 : i32
    return %arg0, %c0_i32 : i32, i32
  }
  func.func @transform_1(%arg0: i32) -> (i32, i32) {
    %c0_i32 = arith.constant 0 : i32
    %c0_i32_0 = arith.constant 0 : i32
    %c0_i32_1 = arith.constant 0 : i32
    return %c0_i32, %c0_i32_0 : i32, i32
  }
  func.func @transform_2(%arg0: i32) -> (i32, i32) {
    %c0_i32 = arith.constant 0 : i32
    %c0_i32_0 = arith.constant 0 : i32
    %c0_i32_1 = arith.constant 0 : i32
    return %c0_i32, %c0_i32_0 : i32, i32
  }
  func.func @transform_3(%arg0: i32) -> (i32, i32) {
    %c0_i32 = arith.constant 0 : i32
    %c0_i32_0 = arith.constant 0 : i32
    %c0_i32_1 = arith.constant 0 : i32
    return %c0_i32, %c0_i32_0 : i32, i32
  }
  func.func @transform_4(%arg0: i32) -> (i32, i32) {
    %c0_i32 = arith.constant 0 : i32
    %c0_i32_0 = arith.constant 0 : i32
    %c0_i32_1 = arith.constant 0 : i32
    return %c0_i32, %c0_i32_0 : i32, i32
  }
  func.func @transform_5(%arg0: i32) -> (i32, i32) {
    %c0_i32 = arith.constant 0 : i32
    %c0_i32_0 = arith.constant 0 : i32
    return %arg0, %c0_i32 : i32, i32
  }
}

</mosaic_0001>

<bundles_post_ra>
// kernel: tpu_custom_call.1
= control target key start
LH: loop header
LB: loop body
LE: loop exit
PB: predicated region body
PF: predicated region fallthrough
CT: control target
= control target key end

     0   :  { %10 = vsyncpa [#allocation3], 0  ;;  %s10889_s0 = inlined_call_operand.hbm [shape: f32[16,512], index: 0, kind: input, shape index: {}]   ;;  %s10890_s1 = inlined_call_operand.hbm [shape: bf16[512,2048], index: 1, kind: input, shape index: {}]   ;;  %s10891_s2 = inlined_call_operand.hbm [shape: f32[1,2048], index: 2, kind: input, shape index: {}]   ;;  %s10892_s3 = inlined_call_operand.hbm [shape: bf16[2048,512], index: 3, kind: input, shape index: {}]   ;;  %s10893_s4 = inlined_call_operand.hbm [shape: f32[1,512], index: 4, kind: input, shape index: {}]   ;;  %s10894_s5 = inlined_call_operand.hbm [shape: f32[16,512], index: 5, kind: output, shape index: {}]  }
   0x1   :  { %12 = vsyncpa [#allocation3 + $0x1], 0 }
   0x2   :  { %13 = vsyncpa [#allocation6], 0 }
   0x3   :  { %14 = vsyncpa [#allocation9], 0 }
   0x4   :  { %15 = vsyncpa [#allocation4], 0 }
   0x5   :  { %17 = vsyncpa [#allocation4 + $0x1], 0  ;;  %s10413_s18 = smov 0   ;;  %s10415_s19 = smov 0  }
   0x6   :  { %s10417_s20 = smov 0   ;;  %s10419_s21 = smov 0  }
   0x7 LB: > { %s10373_s22 = smov [#allocation5]   ;;  %s10434_s24 = sadd.s32 4294967295, %s10371_s21   ;;  %s10371_s21 = sphi %s10419_s21, %s10918_s21   ;;  %s10367_s20 = sphi %s10417_s20, %s10917_s20   ;;  %s10363_s19 = sphi %s10415_s19, %s10916_s19   ;;  %s10359_s18 = sphi %s10413_s18, %s10915_s18  }
   0x8   : > { %s176_s23 = sshll.u32 %s10373_s22, 4  ;;  %p8169_p0 = scmp.ge.s32.totalorder %s10371_s21, 1  ;;  %s10439_s23 = int_to_ptr.vmem [resolvable:$true] %s176_s23 }
   0x9   : > { %p10895_p1 = scmp.eq.s32.totalorder %s10434_s24, 0  ;;  %p164_p2 = scmp.lt.s32.totalorder %s10371_s21, 3 }
   0xa   : > { %s10374_s26 = smov [#allocation8]   ;;  %s10375_s29 = smov [#allocation7]  }
   0xb   : > { %p10441_p3 = pnand %p8169_p0, %p164_p2  ;;  %s200_s27 = sshll.u32 %s10374_s26, 4  ;;  %s10454_s27 = int_to_ptr.vmem [resolvable:$true] %s200_s27 }
   0xc   : > { %s10456_s30 = sshll.u32 %s10375_s29, 4  ;;  %s10155_s8 = scalar_lea.hbm %s10890_s1, 65536  ;;  %s191_s30 = int_to_ptr.vmem [resolvable:$true] %s10456_s30 }
   0xd   : > { %s10898_s25 = scalar_select %p10441_p3, 1, 0 }
   0xe   : > { %p9284_p5 = pneg %p10441_p3  ;;  %p10156_p7 = scmp.ne.s32.totalorder %s10890_s1, %s10155_s8 }
   0xf   : > { %p10162_p11 = scmp.lt.u32.totalorder %s10155_s8, %s10890_s1 }
  0x10   : > { %p10450_p6 = pnand %p9284_p5, %p10895_p1 }
  0x12   : > { %p10466_p8 = pneg %p10450_p6 }
  0x14   : > { %p10158_p9 = pnand %p10466_p8, %p10156_p7 }
  0x16   : > { %p10159_p10 = pneg %p10158_p9 }
  0x18   : > { %p10164_p12 = pnand %p10162_p11, %p10159_p10 }
  0x1a   : > { %10167 = shalt.err (!%p10164_p12)
}
  0x1b   : > { %s10168_s14 = scalar_lea.vmem %s10439_s23, 65536  ;;  %p10176_p5 = scmp.lt.s32.totalorder %s10439_s23, %s10439_s23 }
  0x1c   : > { %p10169_p13 = scmp.ne.s32.totalorder %s10439_s23, %s10168_s14  ;;  %p10177_p4 = scmp.lt.s32.totalorder %s10168_s14, %s10168_s14 }
  0x1e   : > { %p10171_p0 = pnand %p10169_p13, %p10466_p8  ;;  %p10178_p7 = por %p10177_p4, %p10176_p5 }
  0x20   : > { %p10172_p2 = pneg %p10171_p0 }
  0x22   : > { %p10179_p9 = pnand %p10178_p7, %p10172_p2 }
  0x24   : > { %10182 = shalt.err (!%p10179_p9)
}
  0x25   : > { %s10376_s15 = smov 1024   ;;  %s10377_s16 = smov 64  }
  0x26   : > { %9287 = dma.hbm_to_vmem [thread:$0]  (!%p10450_p6), %s10890_s1, 65536, %s10439_s23, [#allocation6], %s10376_s15, %s10376_s15, %s10377_s16  }
  0x27   : > { %s10183_s6 = scalar_lea.hbm %s10892_s3, 65536 }
  0x28   : > { %p10184_p4 = scmp.ne.s32.totalorder %s10892_s3, %s10183_s6  ;;  %p10190_p12 = scmp.lt.u32.totalorder %s10183_s6, %s10892_s3 }
  0x2a   : > { %p10186_p10 = pnand %p10184_p4, %p10466_p8 }
  0x2c   : > { %p10187_p11 = pneg %p10186_p10 }
  0x2e   : > { %p10192_p13 = pnand %p10190_p12, %p10187_p11 }
  0x30   : > { %10195 = shalt.err (!%p10192_p13)
}
  0x31   : > { %s10196_s23 = scalar_lea.vmem %s10454_s27, 65536  ;;  %p10204_p7 = scmp.lt.s32.totalorder %s10454_s27, %s10454_s27 }
  0x32   : > { %p10197_p0 = scmp.ne.s32.totalorder %s10454_s27, %s10196_s23  ;;  %p10205_p9 = scmp.lt.s32.totalorder %s10196_s23, %s10196_s23 }
  0x34   : > { %p10199_p2 = pnand %p10197_p0, %p10466_p8  ;;  %p10206_p4 = por %p10205_p9, %p10204_p7 }
  0x36   : > { %p10200_p5 = pneg %p10199_p2 }
  0x38   : > { %p10207_p10 = pnand %p10206_p4, %p10200_p5 }
  0x3a   : > { %10210 = shalt.err (!%p10207_p10)
}
  0x3b   : > { %s10378_s12 = smov 256   ;;  %s10379_s13 = smov 16  }
  0x3c   : > { %9293 = dma.hbm_to_vmem [thread:$0]  (!%p10450_p6), %s10892_s3, 65536, %s10454_s27, [#allocation9], %s10378_s12, %s10378_s12, %s10379_s13  }
  0x3d   : > { %s10211_s22 = scalar_lea.hbm %s10891_s2, 256 }
  0x3e   : > { %p10212_p11 = scmp.ne.s32.totalorder %s10891_s2, %s10211_s22  ;;  %p10218_p0 = scmp.lt.u32.totalorder %s10211_s22, %s10891_s2 }
  0x40   : > { %p10214_p12 = pnand %p10212_p11, %p10466_p8 }
  0x42   : > { %p10215_p13 = pneg %p10214_p12 }
  0x44   : > { %p10220_p2 = pnand %p10218_p0, %p10215_p13 }
  0x46   : > { %10223 = shalt.err (!%p10220_p2)
}
  0x47   : > { %s10224_s8 = scalar_lea.vmem %s191_s30, 256  ;;  %p10232_p4 = scmp.lt.s32.totalorder %s191_s30, %s191_s30 }
  0x48   : > { %p10225_p5 = scmp.ne.s32.totalorder %s191_s30, %s10224_s8  ;;  %p10233_p10 = scmp.lt.s32.totalorder %s10224_s8, %s10224_s8 }
  0x4a   : > { %p10227_p7 = pnand %p10225_p5, %p10466_p8  ;;  %p10234_p1 = por %p10233_p10, %p10232_p4 }
  0x4c   : > { %p10228_p9 = pneg %p10227_p7 }
  0x4e   : > { %p10235_p3 = pnand %p10234_p1, %p10228_p9 }
  0x50   : > { %10238 = shalt.err (!%p10235_p3)
}
  0x51   : > { %9290 = dma.hbm_to_vmem [thread:$0]  (!%p10450_p6), %s10891_s2, 256, %s191_s30, [#allocation6]  }
  0x52   : > { %s10380_s10 = smov [#allocation10]   ;;  %s10239_s14 = scalar_lea.hbm %s10893_s4, 64 }
  0x53   : > { %s214_s23 = sshll.u32 %s10380_s10, 4  ;;  %p10240_p11 = scmp.ne.s32.totalorder %s10893_s4, %s10239_s14  ;;  %s215_s23 = int_to_ptr.vmem [resolvable:$true] %s214_s23 }
  0x54   : > { %p10246_p12 = scmp.lt.u32.totalorder %s10239_s14, %s10893_s4 }
  0x55   : > { %p10242_p1 = pnand %p10240_p11, %p10466_p8 }
  0x57   : > { %p10243_p3 = pneg %p10242_p1 }
  0x59   : > { %p10248_p13 = pnand %p10246_p12, %p10243_p3 }
  0x5b   : > { %10251 = shalt.err (!%p10248_p13)
}
  0x5c   : > { %s10252_s30 = scalar_lea.vmem %s215_s23, 64  ;;  %p10260_p7 = scmp.lt.s32.totalorder %s215_s23, %s215_s23 }
  0x5d   : > { %p10253_p0 = scmp.ne.s32.totalorder %s215_s23, %s10252_s30  ;;  %p10261_p9 = scmp.lt.s32.totalorder %s10252_s30, %s10252_s30 }
  0x5f   : > { %p10255_p2 = pnand %p10253_p0, %p10466_p8  ;;  %p10262_p4 = por %p10261_p9, %p10260_p7 }
  0x61   : > { %p10256_p5 = pneg %p10255_p2 }
  0x63   : > { %p10263_p10 = pnand %p10262_p4, %p10256_p5 }
  0x65   : > { %10266 = shalt.err (!%p10263_p10)
}
  0x66   : > { %9296 = dma.hbm_to_vmem [thread:$0]  (!%p10450_p6), %s10893_s4, 64, %s215_s23, [#allocation9]  }
  0x67   : > { %s8168_s11 = sadd.s32 4294967294, %s10371_s21   ;;  %s10549_s28 = sadd.s32 1, %s10371_s21  }
  0x68   : > { %s27_s6 = ssub.s32 %s10371_s21, %s10549_s28  ;;  %s30_s7 = sadd.s32 1, %s10367_s20 }
  0x69   : > { %p28_p8 = scmp.eq.s32.totalorder %s27_s6, 0  ;;  %p37_p11 = scmp.ne.s32.totalorder %s10367_s20, %s10363_s19 }
  0x6a   : > { %p38_p1 = scmp.eq.s32.totalorder %s10371_s21, 0  ;;  %p43_p3 = scmp.ne.s32.totalorder %s10363_s19, %s10359_s18 }
  0x6b   : > { %s10560_s8 = scalar_select %p28_p8, %s10367_s20, %s30_s7  }
  0x6c   : > { %p10562_p12 = por %p38_p1, %p37_p11  ;;  %p10902_p13 = scmp.eq.s32.totalorder %s10434_s24, 0 }
  0x6d   : > { %p151_p0 = scmp.eq.s32.totalorder %s10434_s24, 1  ;;  %p157_p2 = scmp.eq.s32.totalorder %s8168_s11, 1 }
  0x6e   : > { %p10568_p6 = por %p10902_p13, %p43_p3  ;;  %p9309_p5 = scmp.lt.s32.totalorder %s10371_s21, 2 }
  0x6f   : > { %s225_s10 = sand.u32 1, %s10367_s20   ;;  %p10575_p7 = por %p151_p0, %p37_p11 }
  0x70   : > { %p10579_p9 = por %p157_p2, %p43_p3  ;;  %s8175_s13 = sshll.u32 %s225_s10, 5 }
  0x71   : > { %s10904_s23 = scalar_select %p10575_p7, 1, 0 }
  0x72   : > { %s10905_s12 = scalar_select %p10579_p9, 1, 0 }
  0x73   : > { %s9214_s14 = sshll.u32 %s10371_s21, 9  ;;  %s229_s22 = scalar_lea.vmem [#allocation2], %s8175_s13 }
  0x74   : > { %s10587_s17 = scalar_lea.hbm %s10889_s0, %s9214_s14  ;;  %s237_s30 = sshll.u32 %s229_s22, 4  ;;  %s10589_s30 = int_to_ptr.vmem [resolvable:$true] %s237_s30 }
  0x75   : > { %p10593_p4 = pnand %p9309_p5, %p10562_p12  ;;  %s226_s29 = scalar_lea.sflag [#allocation3], %s225_s10 }
  0x76   : > { %s10267_s11 = scalar_lea.hbm %s10587_s17, 512  ;;  %s10272_s13 = scalar_lea.hbm %s10889_s0, 1024 }
  0x77   : > { %p10268_p10 = scmp.ne.s32.totalorder %s10587_s17, %s10267_s11  ;;  %p10269_p8 = pneg %p10593_p4 }
  0x78   : > { %p10273_p3 = scmp.lt.u32.totalorder %s10587_s17, %s10889_s0  ;;  %p10274_p12 = scmp.lt.u32.totalorder %s10272_s13, %s10267_s11 }
  0x79   : > { %p10270_p11 = pnand %p10269_p8, %p10268_p10  ;;  %p10276_p0 = scmp.lt.u32.totalorder %s10267_s11, %s10587_s17 }
  0x7a   : > { %p10275_p13 = por %p10274_p12, %p10273_p3 }
  0x7b   : > { %p10271_p1 = pneg %p10270_p11 }
  0x7c   : > { %p10277_p2 = por %p10276_p0, %p10275_p13 }
  0x7e   : > { %p10278_p5 = pnand %p10277_p2, %p10271_p1 }
  0x80   : > { %10281 = shalt.err (!%p10278_p5)
}
  0x81   : > { %s10282_s10 = scalar_lea.vmem %s10589_s30, 512  ;;  %s10381_s15 = smov [#allocation2]  }
  0x82   : > { %p10283_p10 = scmp.ne.s32.totalorder %s10589_s30, %s10282_s10  ;;  %s10287_s16 = sshll.u32 %s10381_s15, 4  ;;  %s10288_s16 = int_to_ptr.vmem [resolvable:$false] %s10287_s16 }
  0x83   : > { %s10289_s22 = scalar_lea.vmem %s10288_s16, 1024  ;;  %p10290_p7 = scmp.lt.s32.totalorder %s10589_s30, %s10288_s16 }
  0x84   : > { %p10285_p11 = pnand %p10283_p10, %p10269_p8  ;;  %p10291_p3 = scmp.lt.s32.totalorder %s10289_s22, %s10282_s10 }
  0x86   : > { %p10286_p9 = pneg %p10285_p11  ;;  %p10292_p12 = por %p10291_p3, %p10290_p7 }
  0x88   : > { %p10293_p13 = pnand %p10292_p12, %p10286_p9 }
  0x8a   : > { %10296 = shalt.err (!%p10293_p13)
}
  0x8b   : > { %9300 = dma.hbm_to_vmem [thread:$0]  (!%p10593_p4), %s10587_s17, 512, %s10589_s30, %s226_s29  }
  0x8c   : > { %p10907_p1 = scmp.ne.s32.totalorder %s10898_s25, 0 }
  0x8d   : > { %s10625_s11 = sand.u32 (!%p10907_p1), 1, %s10363_s19  }
  0x8e   : > { %246 = sbr.rel (%p10907_p1) target bundleno = 1955 (0x7a3), region = 40  ;;  %s8179_s6 = sshll.u32 (!%p10907_p1), %s10625_s11, 5 }
  0x8f   : > { %s249_s7 = scalar_lea.sflag (!%p10907_p1), [#allocation3], %s10625_s11  ;;  %s10631_s13 = scalar_lea.vmem (!%p10907_p1), [#allocation2], %s8179_s6 }
  0x95   : > { %10342 = dma.done.wait (%p10568_p6), %s249_s7, 512  }
  0x96   : > { %10344 = vsyncadd (%p10568_p6), %s249_s7, 4294966784  ;;  %p10908_p7 = scmp.eq.s32.totalorder %s10434_s24, 0 }
  0x98   : > { %10346 = dma.done.wait (%p10908_p7), [#allocation6], 65792   ;;  %p10909_p9 = pmov %p10908_p7 }
  0x99   : > { %p10910_p4 = pmov %p10908_p7 }
  0x9a   : > { %10348 = vsyncadd (%p10909_p9), [#allocation6], 4294901504 }
  0x9b   : > { %10350 = dma.done.wait (%p10910_p4), [#allocation9], 65600   ;;  %p10911_p8 = pmov %p10910_p4 }
  0x9c   : > { %v303_v0 = vld [vmem:[#allocation5] sm:$0xff]  ;;  %v304_v2 = vld [vmem:[#allocation5 + $0x8] sm:$0xff]  ;;  %s294_s25 = scalar_lea.vmem [#allocation11], %s8179_s6  ;;  %s9215_s9 = sshll.u32 %s10434_s24, 9 }
  0x9d   : > { %10352 = vsyncadd (%p10911_p8), [#allocation9], 4294901696  ;;  %v305_v1 = vld [vmem:[#allocation5 + $0x40] sm:$0xff]  ;;  %v306_v4 = vld [vmem:[#allocation5 + $0x48] sm:$0xff]  ;;  %s8060_s17 = sshll.u32 %s294_s25, 4  ;;  %s10845_s29 = scalar_lea.hbm %s10894_s5, %s9215_s9  ;;  %s10847_s17 = int_to_ptr.vmem [resolvable:$true] %s8060_s17 }
  0x9e   : > { %v8186_v3 = vcombine.high %v303_v0, %v305_v1  ;;  %v8185_v5 = vcombine.low %v303_v0, %v305_v1  ;;  %v307_v6 = vld [vmem:[#allocation5 + $0x80] sm:$0xff]  ;;  %v8188_v8 = vcombine.high %v304_v2, %v306_v4  ;;  %v8187_v9 = vcombine.low %v304_v2, %v306_v4  ;;  %v308_v11 = vld [vmem:[#allocation5 + $0x88] sm:$0xff]  ;;  %s8046_s27 = scalar_lea.sflag [#allocation4], %s10625_s11  ;;  %s10297_s14 = scalar_lea.vmem %s10847_s17, 512 }
  0x9f   : > { %v309_v7 = vld [vmem:[#allocation5 + $0xc0] sm:$0xff]  ;;  %v310_v12 = vld [vmem:[#allocation5 + $0xc8] sm:$0xff]  ;;  %p10298_p6 = scmp.ne.s32.totalorder %s10847_s17, %s10297_s14  ;;  %p10912_p0 = scmp.ne.s32.totalorder %s10904_s23, 0 }
  0xa0   : > { %v8190_v10 = vcombine.high %v307_v6, %v309_v7  ;;  %v311_v13 = vld [vmem:[#allocation5 + $0x100] sm:$0xff]  ;;  %1093 = vmatprep.subr.bf16.mxu0 %v8186_v3  ;;  %v8192_v14 = vcombine.high %v308_v11, %v310_v12  ;;  %v312_v16 = vld [vmem:[#allocation5 + $0x108] sm:$0xff]  ;;  %1175 = vmatprep.subr.bf16.mxu1 %v8188_v8  ;;  %v8189_v18 = vcombine.low %v307_v6, %v309_v7  ;;  %s10382_s24 = smov [#allocation11]  }
  0xa1   : > { %v313_v15 = vld [vmem:[#allocation5 + $0x140] sm:$0xff]  ;;  %v314_v17 = vld [vmem:[#allocation5 + $0x148] sm:$0xff]  ;;  %1094 = vmatpush1.bf16.msra.mxu0 %v8185_v5  ;;  %1176 = vmatpush1.bf16.msra.mxu1 %v8187_v9  ;;  %v8191_v19 = vcombine.low %v308_v11, %v310_v12  ;;  %p10299_p2 = pnand %p10298_p6, %p10912_p0  ;;  %s10301_s10 = sshll.u32 %s10382_s24, 4  ;;  %s10302_s10 = int_to_ptr.vmem [resolvable:$false] %s10301_s10 }
  0xa2   : > { %1095 = vmatprep.subr.bf16.mxu0 %v8190_v10  ;;  %v8194_v20 = vcombine.high %v311_v13, %v313_v15  ;;  %1177 = vmatprep.subr.bf16.mxu1 %v8192_v14  ;;  %v8196_v21 = vcombine.high %v312_v16, %v314_v17  ;;  %v315_v22 = vld [vmem:[#allocation5 + $0x180] sm:$0xff]  ;;  %v316_v24 = vld [vmem:[#allocation5 + $0x188] sm:$0xff]  ;;  %v8193_v26 = vcombine.low %v311_v13, %v313_v15  ;;  %s10303_s15 = scalar_lea.vmem %s10302_s10, 1024  ;;  %p10304_p10 = scmp.lt.s32.totalorder %s10847_s17, %s10302_s10 }
  0xa3   : > { %v317_v23 = vld [vmem:[#allocation5 + $0x1c0] sm:$0xff]  ;;  %v318_v25 = vld [vmem:[#allocation5 + $0x1c8] sm:$0xff]  ;;  %v8195_v27 = vcombine.low %v312_v16, %v314_v17  ;;  %p10300_p5 = pneg %p10299_p2  ;;  %p10305_p11 = scmp.lt.s32.totalorder %s10303_s15, %s10297_s14 }
  0xa4   : > { %v8198_v28 = vcombine.high %v315_v22, %v317_v23  ;;  %v8200_v29 = vcombine.high %v316_v24, %v318_v25  ;;  %v319_v30 = vld [vmem:[#allocation5 + $0x200] sm:$0xff]  ;;  %v320_v32 = vld [vmem:[#allocation5 + $0x208] sm:$0xff]  ;;  %v8197_v34 = vcombine.low %v315_v22, %v317_v23  ;;  %v8199_v35 = vcombine.low %v316_v24, %v318_v25 }
  0xa5   : > { %1096 = vmatpush1.bf16.msra.mxu0 %v8189_v18  ;;  %1178 = vmatpush1.bf16.msra.mxu1 %v8191_v19  ;;  %v321_v31 = vld [vmem:[#allocation5 + $0x240] sm:$0xff]  ;;  %v322_v33 = vld [vmem:[#allocation5 + $0x248] sm:$0xff]  ;;  %p10306_p3 = por %p10305_p11, %p10304_p10 }
  0xa6   : > { %1097 = vmatprep.subr.bf16.mxu0 %v8194_v20  ;;  %1179 = vmatprep.subr.bf16.mxu1 %v8196_v21  ;;  %v8202_v36 = vcombine.high %v319_v30, %v321_v31  ;;  %v8204_v37 = vcombine.high %v320_v32, %v322_v33  ;;  %v323_v38 = vld [vmem:[#allocation5 + $0x280] sm:$0xff]  ;;  %v324_v40 = vld [vmem:[#allocation5 + $0x288] sm:$0xff]  ;;  %v8201_v42 = vcombine.low %v319_v30, %v321_v31 }
  0xa7   : > { %v325_v39 = vld [vmem:[#allocation5 + $0x2c0] sm:$0xff]  ;;  %v326_v41 = vld [vmem:[#allocation5 + $0x2c8] sm:$0xff]  ;;  %v8203_v43 = vcombine.low %v320_v32, %v322_v33  ;;  %p10307_p12 = pnand %p10306_p3, %p10300_p5 }
  0xa8   : > { %v8206_v44 = vcombine.high %v323_v38, %v325_v39  ;;  %v8208_v45 = vcombine.high %v324_v40, %v326_v41  ;;  %v327_v46 = vld [vmem:[#allocation5 + $0x300] sm:$0xff]  ;;  %v328_v48 = vld [vmem:[#allocation5 + $0x308] sm:$0xff]  ;;  %v8205_v50 = vcombine.low %v323_v38, %v325_v39  ;;  %v8207_v51 = vcombine.low %v324_v40, %v326_v41 }
  0xa9   : > { %1098 = vmatpush1.bf16.msra.mxu0 %v8193_v26  ;;  %1180 = vmatpush1.bf16.msra.mxu1 %v8195_v27  ;;  %v329_v47 = vld [vmem:[#allocation5 + $0x340] sm:$0xff]  ;;  %v330_v49 = vld [vmem:[#allocation5 + $0x348] sm:$0xff] }
  0xaa   : > { %1099 = vmatprep.subr.bf16.mxu0 %v8198_v28  ;;  %1181 = vmatprep.subr.bf16.mxu1 %v8200_v29  ;;  %v8210_v52 = vcombine.high %v327_v46, %v329_v47  ;;  %v296_v53 = vld [vmem:[%s10631_s13 + $0x8] sm:$0xff]  ;;  %v8212_v54 = vcombine.high %v328_v48, %v330_v49  ;;  %v331_v55 = vld [vmem:[#allocation5 + $0x380] sm:$0xff]  ;;  %v8209_v60 = vcombine.low %v327_v46, %v329_v47 }
  0xab   : > { %v333_v56 = vld [vmem:[#allocation5 + $0x3c0] sm:$0xff]  ;;  %v10646_v57 = vpack.c.bf16 %v296_v53, %v296_v53  ;;  %v332_v58 = vld [vmem:[#allocation5 + $0x388] sm:$0xff]  ;;  %v8211_v61 = vcombine.low %v328_v48, %v330_v49 }
  0xac   : > { %v334_v59 = vld [vmem:[#allocation5 + $0x3c8] sm:$0xff]  ;;  %v8214_v62 = vcombine.high %v331_v55, %v333_v56  ;;  %v335_v0 = vld [vmem:[#allocation5 + $0x400] sm:$0xff]  ;;  %v8213_v4 = vcombine.low %v331_v55, %v333_v56 }
  0xad   : > { %1100 = vmatpush1.bf16.msra.mxu0 %v8197_v34  ;;  %1182 = vmatpush1.bf16.msra.mxu1 %v8199_v35  ;;  %v8216_v63 = vcombine.high %v332_v58, %v334_v59  ;;  %v337_v1 = vld [vmem:[#allocation5 + $0x440] sm:$0xff]  ;;  %v336_v2 = vld [vmem:[#allocation5 + $0x408] sm:$0xff]  ;;  %v8215_v5 = vcombine.low %v332_v58, %v334_v59 }
  0xae   : > { %1101 = vmatprep.subr.bf16.mxu0 %v8202_v36  ;;  %1183 = vmatprep.subr.bf16.mxu1 %v8204_v37  ;;  %v338_v3 = vld [vmem:[#allocation5 + $0x448] sm:$0xff]  ;;  %v8218_v6 = vcombine.high %v335_v0, %v337_v1  ;;  %v339_v8 = vld [vmem:[#allocation5 + $0x480] sm:$0xff]  ;;  %v8217_v12 = vcombine.low %v335_v0, %v337_v1 }
  0xaf   : > { %1125 = vmatprep.mubr.bf16.mxu0 %v10646_v57  ;;  %1207 = vmatprep.mubr.bf16.mxu1 %v10646_v57  ;;  %v8220_v7 = vcombine.high %v336_v2, %v338_v3  ;;  %v341_v9 = vld [vmem:[#allocation5 + $0x4c0] sm:$0xff]  ;;  %v340_v10 = vld [vmem:[#allocation5 + $0x488] sm:$0xff]  ;;  %v8219_v13 = vcombine.low %v336_v2, %v338_v3 }
  0xb0   : > { %v342_v11 = vld [vmem:[#allocation5 + $0x4c8] sm:$0xff]  ;;  %v8222_v14 = vcombine.high %v339_v8, %v341_v9  ;;  %v343_v16 = vld [vmem:[#allocation5 + $0x500] sm:$0xff]  ;;  %v8221_v20 = vcombine.low %v339_v8, %v341_v9 }
  0xb1   : > { %1102 = vmatpush1.bf16.msra.mxu0 %v8201_v42  ;;  %1184 = vmatpush1.bf16.msra.mxu1 %v8203_v43  ;;  %v8224_v15 = vcombine.high %v340_v10, %v342_v11  ;;  %v345_v17 = vld [vmem:[#allocation5 + $0x540] sm:$0xff]  ;;  %v344_v18 = vld [vmem:[#allocation5 + $0x508] sm:$0xff]  ;;  %v8223_v21 = vcombine.low %v340_v10, %v342_v11 }
  0xb2   : > { %1103 = vmatprep.subr.bf16.mxu0 %v8206_v44  ;;  %1185 = vmatprep.subr.bf16.mxu1 %v8208_v45  ;;  %v346_v19 = vld [vmem:[#allocation5 + $0x548] sm:$0xff]  ;;  %v8226_v22 = vcombine.high %v343_v16, %v345_v17  ;;  %v347_v24 = vld [vmem:[#allocation5 + $0x580] sm:$0xff]  ;;  %v8225_v28 = vcombine.low %v343_v16, %v345_v17 }
  0xb3   : > { %v8228_v23 = vcombine.high %v344_v18, %v346_v19  ;;  %v349_v25 = vld [vmem:[#allocation5 + $0x5c0] sm:$0xff]  ;;  %v348_v26 = vld [vmem:[#allocation5 + $0x588] sm:$0xff]  ;;  %v8227_v29 = vcombine.low %v344_v18, %v346_v19 }
  0xb4   : > { %v350_v27 = vld [vmem:[#allocation5 + $0x5c8] sm:$0xff]  ;;  %v8230_v30 = vcombine.high %v347_v24, %v349_v25  ;;  %v351_v32 = vld [vmem:[#allocation5 + $0x600] sm:$0xff]  ;;  %v8229_v36 = vcombine.low %v347_v24, %v349_v25 }
  0xb5   : > { %1104 = vmatpush1.bf16.msra.mxu0 %v8205_v50  ;;  %1186 = vmatpush1.bf16.msra.mxu1 %v8207_v51  ;;  %v8232_v31 = vcombine.high %v348_v26, %v350_v27  ;;  %v353_v33 = vld [vmem:[#allocation5 + $0x640] sm:$0xff]  ;;  %v352_v34 = vld [vmem:[#allocation5 + $0x608] sm:$0xff]  ;;  %v8231_v37 = vcombine.low %v348_v26, %v350_v27 }
  0xb6   : > { %1105 = vmatprep.subr.bf16.mxu0 %v8210_v52  ;;  %1187 = vmatprep.subr.bf16.mxu1 %v8212_v54  ;;  %v354_v35 = vld [vmem:[#allocation5 + $0x648] sm:$0xff]  ;;  %v8234_v38 = vcombine.high %v351_v32, %v353_v33  ;;  %v355_v40 = vld [vmem:[#allocation5 + $0x680] sm:$0xff]  ;;  %v8233_v44 = vcombine.low %v351_v32, %v353_v33 }
  0xb7   : > { %v8236_v39 = vcombine.high %v352_v34, %v354_v35  ;;  %v357_v41 = vld [vmem:[#allocation5 + $0x6c0] sm:$0xff]  ;;  %v356_v42 = vld [vmem:[#allocation5 + $0x688] sm:$0xff]  ;;  %v8235_v45 = vcombine.low %v352_v34, %v354_v35 }
  0xb8   : > { %v358_v43 = vld [vmem:[#allocation5 + $0x6c8] sm:$0xff]  ;;  %v8238_v46 = vcombine.high %v355_v40, %v357_v41  ;;  %v359_v48 = vld [vmem:[#allocation5 + $0x700] sm:$0xff]  ;;  %v8237_v52 = vcombine.low %v355_v40, %v357_v41 }
  0xb9   : > { %1106 = vmatpush1.bf16.msra.mxu0 %v8209_v60  ;;  %1188 = vmatpush1.bf16.msra.mxu1 %v8211_v61  ;;  %v8240_v47 = vcombine.high %v356_v42, %v358_v43  ;;  %v361_v49 = vld [vmem:[#allocation5 + $0x740] sm:$0xff]  ;;  %v360_v50 = vld [vmem:[#allocation5 + $0x708] sm:$0xff]  ;;  %v8239_v53 = vcombine.low %v356_v42, %v358_v43 }
  0xba   : > { %1107 = vmatprep.subr.bf16.mxu0 %v8214_v62  ;;  %1189 = vmatprep.subr.bf16.mxu1 %v8216_v63  ;;  %v362_v51 = vld [vmem:[#allocation5 + $0x748] sm:$0xff]  ;;  %v8242_v54 = vcombine.high %v359_v48, %v361_v49  ;;  %v363_v56 = vld [vmem:[#allocation5 + $0x780] sm:$0xff]  ;;  %v8241_v61 = vcombine.low %v359_v48, %v361_v49 }
  0xbb   : > { %v8244_v55 = vcombine.high %v360_v50, %v362_v51  ;;  %v365_v58 = vld [vmem:[#allocation5 + $0x7c0] sm:$0xff]  ;;  %v364_v59 = vld [vmem:[#allocation5 + $0x788] sm:$0xff]  ;;  %v8243_v62 = vcombine.low %v360_v50, %v362_v51 }
  0xbc   : > { %v366_v60 = vld [vmem:[#allocation5 + $0x7c8] sm:$0xff]  ;;  %v8246_v63 = vcombine.high %v363_v56, %v365_v58  ;;  %v367_v1 = vld [vmem:[#allocation5 + $0x800] sm:$0xff] }
  0xbd   : > { %1108 = vmatpush1.bf16.msra.mxu0 %v8213_v4  ;;  %1190 = vmatpush1.bf16.msra.mxu1 %v8215_v5  ;;  %v8248_v0 = vcombine.high %v364_v59, %v366_v60  ;;  %v369_v2 = vld [vmem:[#allocation5 + $0x840] sm:$0xff]  ;;  %v368_v3 = vld [vmem:[#allocation5 + $0x808] sm:$0xff]  ;;  %v8245_v5 = vcombine.low %v363_v56, %v365_v58 }
  0xbe   : > { %1109 = vmatprep.subr.bf16.mxu0 %v8218_v6  ;;  %1191 = vmatprep.subr.bf16.mxu1 %v8220_v7  ;;  %v370_v4 = vld [vmem:[#allocation5 + $0x848] sm:$0xff]  ;;  %v295_v6 = vld [vmem:[%s10631_s13] sm:$0xff]  ;;  %v8247_v7 = vcombine.low %v364_v59, %v366_v60  ;;  %v8250_v8 = vcombine.high %v367_v1, %v369_v2  ;;  %v8249_v16 = vcombine.low %v367_v1, %v369_v2 }
  0xbf   : > { %v8252_v9 = vcombine.high %v368_v3, %v370_v4  ;;  %v371_v10 = vld [vmem:[#allocation5 + $0x880] sm:$0xff]  ;;  %v8251_v17 = vcombine.low %v368_v3, %v370_v4  ;;  %v382_v32 = vld [vmem:[#allocation5 + $0x9c8] sm:$0xff] }
  0xc0   : > { %v373_v11 = vld [vmem:[#allocation5 + $0x8c0] sm:$0xff]  ;;  %v386_v40 = vld [vmem:[#allocation5 + $0xa48] sm:$0xff] }
  0xc1   : > { %1110 = vmatpush1.bf16.msra.mxu0 %v8217_v12  ;;  %1192 = vmatpush1.bf16.msra.mxu1 %v8219_v13  ;;  %v10651_v12 = vpack.c.bf16 %v295_v6, %v295_v6  ;;  %v372_v13 = vld [vmem:[#allocation5 + $0x888] sm:$0xff]  ;;  %v8254_v18 = vcombine.high %v371_v10, %v373_v11  ;;  %v375_v19 = vld [vmem:[#allocation5 + $0x900] sm:$0xff]  ;;  %v8253_v25 = vcombine.low %v371_v10, %v373_v11 }
  0xc2   : > { %1111 = vmatprep.subr.bf16.mxu0 %v8222_v14  ;;  %1193 = vmatprep.subr.bf16.mxu1 %v8224_v15  ;;  %v374_v14 = vld [vmem:[#allocation5 + $0x8c8] sm:$0xff]  ;;  %v298_v15 = vld [vmem:[%s10631_s13 + $0x18] sm:$0xff]  ;;  %v401_v6 = vld [vmem:[#allocation5 + $0xc40] sm:$0xff] }
  0xc3   : > { %v10654_v24 = vpack.c.bf16 %v298_v15, %v298_v15  ;;  %v8255_v26 = vcombine.low %v372_v13, %v374_v14  ;;  %v390_v48 = vld [vmem:[#allocation5 + $0xac8] sm:$0xff]  ;;  %v405_v15 = vld [vmem:[#allocation5 + $0xcc0] sm:$0xff] }
  0xc4   : > { %v394_v56 = vld [vmem:[#allocation5 + $0xb48] sm:$0xff] }
  0xc5   : > { %1112 = vmatpush1.bf16.msra.mxu0 %v8221_v20  ;;  %1194 = vmatpush1.bf16.msra.mxu1 %v8223_v21  ;;  %v377_v20 = vld [vmem:[#allocation5 + $0x940] sm:$0xff]  ;;  %v8256_v21 = vcombine.high %v372_v13, %v374_v14  ;;  %v398_v1 = vld [vmem:[#allocation5 + $0xbc8] sm:$0xff] }
  0xc6   : > { %1113 = vmatprep.subr.bf16.mxu0 %v8226_v22  ;;  %1195 = vmatprep.subr.bf16.mxu1 %v8228_v23  ;;  %v376_v22 = vld [vmem:[#allocation5 + $0x908] sm:$0xff]  ;;  %v8258_v27 = vcombine.high %v375_v19, %v377_v20  ;;  %v8257_v33 = vcombine.low %v375_v19, %v377_v20  ;;  %v403_v14 = vld [vmem:[#allocation5 + $0xc80] sm:$0xff] }
  0xc7   : > { %v378_v23 = vld [vmem:[#allocation5 + $0x948] sm:$0xff] }
  0xc8   : > { %v8259_v34 = vcombine.low %v376_v22, %v378_v23 }
  0xc9   : > { %1114 = vmatpush1.bf16.msra.mxu0 %v8225_v28  ;;  %1196 = vmatpush1.bf16.msra.mxu1 %v8227_v29  ;;  %v379_v28 = vld [vmem:[#allocation5 + $0x980] sm:$0xff] }
  0xca   : > { %1115 = vmatprep.subr.bf16.mxu0 %v8230_v30  ;;  %1197 = vmatprep.subr.bf16.mxu1 %v8232_v31  ;;  %v381_v29 = vld [vmem:[#allocation5 + $0x9c0] sm:$0xff]  ;;  %v380_v30 = vld [vmem:[#allocation5 + $0x988] sm:$0xff]  ;;  %v8260_v31 = vcombine.high %v376_v22, %v378_v23 }
  0xcb   : > { %v8262_v35 = vcombine.high %v379_v28, %v381_v29  ;;  %v8261_v41 = vcombine.low %v379_v28, %v381_v29  ;;  %v8263_v42 = vcombine.low %v380_v30, %v382_v32  ;;  %v407_v22 = vld [vmem:[#allocation5 + $0xd00] sm:$0xff]  ;;  %v8285_v28 = vcombine.low %v403_v14, %v405_v15 }
  0xcc   : > { %v409_v23 = vld [vmem:[#allocation5 + $0xd40] sm:$0xff] }
  0xcd   : > { %1116 = vmatpush1.bf16.msra.mxu0 %v8229_v36  ;;  %1198 = vmatpush1.bf16.msra.mxu1 %v8231_v37  ;;  %v383_v36 = vld [vmem:[#allocation5 + $0xa00] sm:$0xff] }
  0xce   : > { %1117 = vmatprep.subr.bf16.mxu0 %v8234_v38  ;;  %1199 = vmatprep.subr.bf16.mxu1 %v8236_v39  ;;  %v385_v37 = vld [vmem:[#allocation5 + $0xa40] sm:$0xff]  ;;  %v384_v38 = vld [vmem:[#allocation5 + $0xa08] sm:$0xff]  ;;  %v8264_v39 = vcombine.high %v380_v30, %v382_v32  ;;  %v8290_v30 = vcombine.high %v407_v22, %v409_v23 }
  0xcf   : > { %v8266_v43 = vcombine.high %v383_v36, %v385_v37  ;;  %v8265_v49 = vcombine.low %v383_v36, %v385_v37  ;;  %v8267_v50 = vcombine.low %v384_v38, %v386_v40  ;;  %v413_v32 = vld [vmem:[#allocation5 + $0xdc0] sm:$0xff]  ;;  %v8289_v36 = vcombine.low %v407_v22, %v409_v23  ;;  %v1432_v22 = vld [vmem:[#allocation5 + $0xd8] sm:$0xff] }
  0xd1   : > { %1118 = vmatpush1.bf16.msra.mxu0 %v8233_v44  ;;  %1200 = vmatpush1.bf16.msra.mxu1 %v8235_v45  ;;  %v387_v44 = vld [vmem:[#allocation5 + $0xa80] sm:$0xff] }
  0xd2   : > { %1119 = vmatprep.subr.bf16.mxu0 %v8238_v46  ;;  %1201 = vmatprep.subr.bf16.mxu1 %v8240_v47  ;;  %v389_v45 = vld [vmem:[#allocation5 + $0xac0] sm:$0xff]  ;;  %v388_v46 = vld [vmem:[#allocation5 + $0xa88] sm:$0xff]  ;;  %v8268_v47 = vcombine.high %v384_v38, %v386_v40 }
  0xd3   : > { %v8270_v51 = vcombine.high %v387_v44, %v389_v45  ;;  %v8269_v58 = vcombine.low %v387_v44, %v389_v45  ;;  %v8271_v59 = vcombine.low %v388_v46, %v390_v48  ;;  %v417_v40 = vld [vmem:[#allocation5 + $0xe40] sm:$0xff] }
  0xd5   : > { %1120 = vmatpush1.bf16.msra.mxu0 %v8237_v52  ;;  %1202 = vmatpush1.bf16.msra.mxu1 %v8239_v53  ;;  %v391_v52 = vld [vmem:[#allocation5 + $0xb00] sm:$0xff] }
  0xd6   : > { %1121 = vmatprep.subr.bf16.mxu0 %v8242_v54  ;;  %1203 = vmatprep.subr.bf16.mxu1 %v8244_v55  ;;  %v393_v53 = vld [vmem:[#allocation5 + $0xb40] sm:$0xff]  ;;  %v392_v54 = vld [vmem:[#allocation5 + $0xb08] sm:$0xff]  ;;  %v8272_v55 = vcombine.high %v388_v46, %v390_v48 }
  0xd7   : > { %v8274_v60 = vcombine.high %v391_v52, %v393_v53  ;;  %v8273_v2 = vcombine.low %v391_v52, %v393_v53  ;;  %v8275_v3 = vcombine.low %v392_v54, %v394_v56  ;;  %v421_v48 = vld [vmem:[#allocation5 + $0xec0] sm:$0xff] }
  0xd9   : > { %1122 = vmatpush1.bf16.msra.mxu0 %v8241_v61  ;;  %1204 = vmatpush1.bf16.msra.mxu1 %v8243_v62  ;;  %v395_v61 = vld [vmem:[#allocation5 + $0xb80] sm:$0xff] }
  0xda   : > { %1123 = vmatprep.subr.bf16.mxu0 %v8246_v63  ;;  %1205 = vmatprep.subr.bf16.mxu1 %v8248_v0  ;;  %v397_v62 = vld [vmem:[#allocation5 + $0xbc0] sm:$0xff]  ;;  %v396_v63 = vld [vmem:[#allocation5 + $0xb88] sm:$0xff]  ;;  %v8276_v0 = vcombine.high %v392_v54, %v394_v56 }
  0xdb   : > { %v8278_v4 = vcombine.high %v395_v61, %v397_v62  ;;  %v8277_v10 = vcombine.low %v395_v61, %v397_v62  ;;  %v8279_v11 = vcombine.low %v396_v63, %v398_v1  ;;  %v425_v56 = vld [vmem:[#allocation5 + $0xf40] sm:$0xff] }
  0xdd   : > { %1124 = vmatpush1.bf16.msra.mxu0 %v8245_v5  ;;  %1206 = vmatpush1.bf16.msra.mxu1 %v8247_v7  ;;  %v399_v5 = vld [vmem:[#allocation5 + $0xc00] sm:$0xff]  ;;  %v400_v7 = vld [vmem:[#allocation5 + $0xc08] sm:$0xff] }
  0xde   : > { %1134 = vmatprep.subr.bf16.mxu0 %v8250_v8  ;;  %1216 = vmatprep.subr.bf16.mxu1 %v8252_v9  ;;  %v8280_v8 = vcombine.high %v396_v63, %v398_v1  ;;  %v402_v9 = vld [vmem:[#allocation5 + $0xc48] sm:$0xff]  ;;  %v8282_v13 = vcombine.high %v399_v5, %v401_v6  ;;  %v8281_v19 = vcombine.low %v399_v5, %v401_v6  ;;  %v429_v1 = vld [vmem:[#allocation5 + $0xfc0] sm:$0xff] }
  0xdf   : > { %v8283_v20 = vcombine.low %v400_v7, %v402_v9 }
  0xe0   : > { %1126 = vmatmul.mubr.bf16.vlgmr.msra.gmra.mrb[0].mxu0 %v10651_v12  ;;  %1208 = vmatmul.mubr.bf16.vlgmr.msra.gmra.mrb[0].mxu1 %v10651_v12 }
  0xe1   : > { %1135 = vmatpush1.bf16.msra.mxu0 %v8249_v16  ;;  %1217 = vmatpush1.bf16.msra.mxu1 %v8251_v17  ;;  %v404_v16 = vld [vmem:[#allocation5 + $0xc88] sm:$0xff]  ;;  %v8284_v17 = vcombine.high %v400_v7, %v402_v9  ;;  %v1427_v9 = vld [vmem:[#allocation5 + $0x50] sm:$0xff] }
  0xe2   : > { %1136 = vmatprep.subr.bf16.mxu0 %v8254_v18  ;;  %1218 = vmatprep.subr.bf16.mxu1 %v8256_v21  ;;  %v406_v18 = vld [vmem:[#allocation5 + $0xcc8] sm:$0xff]  ;;  %v8286_v21 = vcombine.high %v403_v14, %v405_v15  ;;  %v1428_v14 = vld [vmem:[#allocation5 + $0x58] sm:$0xff] }
  0xe3   : > { %1166 = vmatprep.mubr.bf16.mxu0 %v10654_v24  ;;  %1248 = vmatprep.mubr.bf16.mxu1 %v10654_v24  ;;  %v8287_v29 = vcombine.low %v404_v16, %v406_v18 }
  0xe5   : > { %1137 = vmatpush1.bf16.msra.mxu0 %v8253_v25  ;;  %1219 = vmatpush1.bf16.msra.mxu1 %v8255_v26  ;;  %v408_v25 = vld [vmem:[#allocation5 + $0xd08] sm:$0xff]  ;;  %v8288_v26 = vcombine.high %v404_v16, %v406_v18  ;;  %v1429_v18 = vld [vmem:[#allocation5 + $0x90] sm:$0xff] }
  0xe6   : > { %1138 = vmatprep.subr.bf16.mxu0 %v8258_v27  ;;  %1220 = vmatprep.subr.bf16.mxu1 %v8260_v31  ;;  %v410_v27 = vld [vmem:[#allocation5 + $0xd48] sm:$0xff]  ;;  %v411_v31 = vld [vmem:[#allocation5 + $0xd80] sm:$0xff] }
  0xe7   : > { %v8291_v37 = vcombine.low %v408_v25, %v410_v27  ;;  %v8294_v38 = vcombine.high %v411_v31, %v413_v32  ;;  %v8293_v44 = vcombine.low %v411_v31, %v413_v32  ;;  %v1436_v31 = vld [vmem:[#allocation5 + $0x158] sm:$0xff] }
  0xe9   : > { %1139 = vmatpush1.bf16.msra.mxu0 %v8257_v33  ;;  %1221 = vmatpush1.bf16.msra.mxu1 %v8259_v34  ;;  %v412_v33 = vld [vmem:[#allocation5 + $0xd88] sm:$0xff]  ;;  %v8292_v34 = vcombine.high %v408_v25, %v410_v27  ;;  %v1435_v27 = vld [vmem:[#allocation5 + $0x150] sm:$0xff] }
  0xea   : > { %1140 = vmatprep.subr.bf16.mxu0 %v8262_v35  ;;  %1222 = vmatprep.subr.bf16.mxu1 %v8264_v39  ;;  %v414_v35 = vld [vmem:[#allocation5 + $0xdc8] sm:$0xff]  ;;  %v415_v39 = vld [vmem:[#allocation5 + $0xe00] sm:$0xff] }
  0xeb   : > { %v8295_v45 = vcombine.low %v412_v33, %v414_v35  ;;  %v8298_v46 = vcombine.high %v415_v39, %v417_v40  ;;  %v8297_v52 = vcombine.low %v415_v39, %v417_v40  ;;  %v1440_v39 = vld [vmem:[#allocation5 + $0x1d8] sm:$0xff] }
  0xed   : > { %1141 = vmatpush1.bf16.msra.mxu0 %v8261_v41  ;;  %1223 = vmatpush1.bf16.msra.mxu1 %v8263_v42  ;;  %v416_v41 = vld [vmem:[#allocation5 + $0xe08] sm:$0xff]  ;;  %v8296_v42 = vcombine.high %v412_v33, %v414_v35  ;;  %v1439_v35 = vld [vmem:[#allocation5 + $0x1d0] sm:$0xff] }
  0xee   : > { %1142 = vmatprep.subr.bf16.mxu0 %v8266_v43  ;;  %1224 = vmatprep.subr.bf16.mxu1 %v8268_v47  ;;  %v418_v43 = vld [vmem:[#allocation5 + $0xe48] sm:$0xff]  ;;  %v419_v47 = vld [vmem:[#allocation5 + $0xe80] sm:$0xff] }
  0xef   : > { %v8299_v53 = vcombine.low %v416_v41, %v418_v43  ;;  %v8302_v54 = vcombine.high %v419_v47, %v421_v48  ;;  %v8301_v61 = vcombine.low %v419_v47, %v421_v48  ;;  %v1444_v47 = vld [vmem:[#allocation5 + $0x258] sm:$0xff] }
  0xf1   : > { %1143 = vmatpush1.bf16.msra.mxu0 %v8265_v49  ;;  %1225 = vmatpush1.bf16.msra.mxu1 %v8267_v50  ;;  %v420_v49 = vld [vmem:[#allocation5 + $0xe88] sm:$0xff]  ;;  %v8300_v50 = vcombine.high %v416_v41, %v418_v43  ;;  %v1443_v43 = vld [vmem:[#allocation5 + $0x250] sm:$0xff] }
  0xf2   : > { %1144 = vmatprep.subr.bf16.mxu0 %v8270_v51  ;;  %1226 = vmatprep.subr.bf16.mxu1 %v8272_v55  ;;  %v422_v51 = vld [vmem:[#allocation5 + $0xec8] sm:$0xff]  ;;  %v423_v55 = vld [vmem:[#allocation5 + $0xf00] sm:$0xff] }
  0xf3   : > { %v8303_v62 = vcombine.low %v420_v49, %v422_v51  ;;  %v8306_v63 = vcombine.high %v423_v55, %v425_v56  ;;  %v8305_v5 = vcombine.low %v423_v55, %v425_v56  ;;  %v1448_v55 = vld [vmem:[#allocation5 + $0x2d8] sm:$0xff] }
  0xf5   : > { %1145 = vmatpush1.bf16.msra.mxu0 %v8269_v58  ;;  %1227 = vmatpush1.bf16.msra.mxu1 %v8271_v59  ;;  %v424_v58 = vld [vmem:[#allocation5 + $0xf08] sm:$0xff]  ;;  %v8304_v59 = vcombine.high %v420_v49, %v422_v51  ;;  %v1447_v51 = vld [vmem:[#allocation5 + $0x2d0] sm:$0xff] }
  0xf6   : > { %1146 = vmatprep.subr.bf16.mxu0 %v8274_v60  ;;  %1228 = vmatprep.subr.bf16.mxu1 %v8276_v0  ;;  %v426_v60 = vld [vmem:[#allocation5 + $0xf48] sm:$0xff]  ;;  %v427_v0 = vld [vmem:[#allocation5 + $0xf80] sm:$0xff] }
  0xf7   : > { %v8307_v6 = vcombine.low %v424_v58, %v426_v60  ;;  %v8310_v7 = vcombine.high %v427_v0, %v429_v1  ;;  %v8309_v15 = vcombine.low %v427_v0, %v429_v1  ;;  %v1452_v0 = vld [vmem:[#allocation5 + $0x358] sm:$0xff] }
  0xf9   : > { %1147 = vmatpush1.bf16.msra.mxu0 %v8273_v2  ;;  %1229 = vmatpush1.bf16.msra.mxu1 %v8275_v3  ;;  %v428_v2 = vld [vmem:[#allocation5 + $0xf88] sm:$0xff]  ;;  %v8308_v3 = vcombine.high %v424_v58, %v426_v60  ;;  %v1451_v60 = vld [vmem:[#allocation5 + $0x350] sm:$0xff] }
  0xfa   : > { %1148 = vmatprep.subr.bf16.mxu0 %v8278_v4  ;;  %1230 = vmatprep.subr.bf16.mxu1 %v8280_v8  ;;  %v430_v4 = vld [vmem:[#allocation5 + $0xfc8] sm:$0xff]  ;;  %v1425_v8 = vld [vmem:[#allocation5 + $0x10] sm:$0xff] }
  0xfb   : > { %v8311_v16 = vcombine.low %v428_v2, %v430_v4  ;;  %v8313_v25 = vcombine.low %v1425_v8, %v1427_v9 }
  0xfd   : > { %1149 = vmatpush1.bf16.msra.mxu0 %v8277_v10  ;;  %1231 = vmatpush1.bf16.msra.mxu1 %v8279_v11  ;;  %v1426_v10 = vld [vmem:[#allocation5 + $0x18] sm:$0xff]  ;;  %v8312_v11 = vcombine.high %v428_v2, %v430_v4  ;;  %v1455_v4 = vld [vmem:[#allocation5 + $0x3d0] sm:$0xff] }
  0xfe   : > { %1150 = vmatprep.subr.bf16.mxu0 %v8282_v13  ;;  %1232 = vmatprep.subr.bf16.mxu1 %v8284_v17  ;;  %v297_v13 = vld [vmem:[%s10631_s13 + $0x10] sm:$0xff]  ;;  %v8314_v17 = vcombine.high %v1425_v8, %v1427_v9  ;;  %v1456_v8 = vld [vmem:[#allocation5 + $0x3d8] sm:$0xff] }
  0xff   : > { %v10661_v23 = vpack.c.bf16 %v297_v13, %v297_v13  ;;  %v1459_v13 = vld [vmem:[#allocation5 + $0x450] sm:$0xff] }
 0x101   : > { %1151 = vmatpush1.bf16.msra.mxu0 %v8281_v19  ;;  %1233 = vmatpush1.bf16.msra.mxu1 %v8283_v20  ;;  %v1431_v19 = vld [vmem:[#allocation5 + $0xd0] sm:$0xff]  ;;  %v1430_v20 = vld [vmem:[#allocation5 + $0x98] sm:$0xff] }
 0x102   : > { %1152 = vmatprep.subr.bf16.mxu0 %v8286_v21  ;;  %1234 = vmatprep.subr.bf16.mxu1 %v8288_v26  ;;  %v8316_v21 = vcombine.high %v1426_v10, %v1428_v14  ;;  %v1433_v26 = vld [vmem:[#allocation5 + $0x110] sm:$0xff]  ;;  %v8320_v32 = vcombine.high %v1430_v20, %v1432_v22  ;;  %v8317_v33 = vcombine.low %v1429_v18, %v1431_v19 }
 0x103   : > { %v8321_v41 = vcombine.low %v1433_v26, %v1435_v27 }
 0x105   : > { %1153 = vmatpush1.bf16.msra.mxu0 %v8285_v28  ;;  %1235 = vmatpush1.bf16.msra.mxu1 %v8287_v29  ;;  %v8315_v28 = vcombine.low %v1426_v10, %v1428_v14  ;;  %v8318_v29 = vcombine.high %v1429_v18, %v1431_v19 }
 0x106   : > { %1154 = vmatprep.subr.bf16.mxu0 %v8290_v30  ;;  %1236 = vmatprep.subr.bf16.mxu1 %v8292_v34  ;;  %v1434_v30 = vld [vmem:[#allocation5 + $0x118] sm:$0xff]  ;;  %v1437_v34 = vld [vmem:[#allocation5 + $0x190] sm:$0xff] }
 0x107   : > { %v8324_v40 = vcombine.high %v1434_v30, %v1436_v31  ;;  %v8325_v49 = vcombine.low %v1437_v34, %v1439_v35 }
 0x109   : > { %1155 = vmatpush1.bf16.msra.mxu0 %v8289_v36  ;;  %1237 = vmatpush1.bf16.msra.mxu1 %v8291_v37  ;;  %v8319_v36 = vcombine.low %v1430_v20, %v1432_v22  ;;  %v8322_v37 = vcombine.high %v1433_v26, %v1435_v27  ;;  %v1461_v20 = vld [vmem:[#allocation5 + $0x490] sm:$0xff]  ;;  %v1462_v26 = vld [vmem:[#allocation5 + $0x498] sm:$0xff] }
 0x10a   : > { %1156 = vmatprep.subr.bf16.mxu0 %v8294_v38  ;;  %1238 = vmatprep.subr.bf16.mxu1 %v8296_v42  ;;  %v1438_v38 = vld [vmem:[#allocation5 + $0x198] sm:$0xff]  ;;  %v1441_v42 = vld [vmem:[#allocation5 + $0x210] sm:$0xff] }
 0x10b   : > { %v8328_v48 = vcombine.high %v1438_v38, %v1440_v39  ;;  %v8329_v58 = vcombine.low %v1441_v42, %v1443_v43  ;;  %v1464_v27 = vld [vmem:[#allocation5 + $0x4d8] sm:$0xff] }
 0x10d   : > { %1157 = vmatpush1.bf16.msra.mxu0 %v8293_v44  ;;  %1239 = vmatpush1.bf16.msra.mxu1 %v8295_v45  ;;  %v8323_v44 = vcombine.low %v1434_v30, %v1436_v31  ;;  %v8326_v45 = vcombine.high %v1437_v34, %v1439_v35  ;;  %v1465_v30 = vld [vmem:[#allocation5 + $0x510] sm:$0xff]  ;;  %v1466_v34 = vld [vmem:[#allocation5 + $0x518] sm:$0xff] }
 0x10e   : > { %1158 = vmatprep.subr.bf16.mxu0 %v8298_v46  ;;  %1240 = vmatprep.subr.bf16.mxu1 %v8300_v50  ;;  %v1442_v46 = vld [vmem:[#allocation5 + $0x218] sm:$0xff]  ;;  %v1445_v50 = vld [vmem:[#allocation5 + $0x290] sm:$0xff] }
 0x10f   : > { %v8332_v56 = vcombine.high %v1442_v46, %v1444_v47  ;;  %v8333_v2 = vcombine.low %v1445_v50, %v1447_v51  ;;  %v1467_v31 = vld [vmem:[#allocation5 + $0x550] sm:$0xff]  ;;  %v1468_v35 = vld [vmem:[#allocation5 + $0x558] sm:$0xff] }
 0x111   : > { %1159 = vmatpush1.bf16.msra.mxu0 %v8297_v52  ;;  %1241 = vmatpush1.bf16.msra.mxu1 %v8299_v53  ;;  %v8327_v52 = vcombine.low %v1438_v38, %v1440_v39  ;;  %v8330_v53 = vcombine.high %v1441_v42, %v1443_v43  ;;  %v1469_v38 = vld [vmem:[#allocation5 + $0x590] sm:$0xff]  ;;  %v1470_v42 = vld [vmem:[#allocation5 + $0x598] sm:$0xff] }
 0x112   : > { %1160 = vmatprep.subr.bf16.mxu0 %v8302_v54  ;;  %1242 = vmatprep.subr.bf16.mxu1 %v8304_v59  ;;  %v1446_v54 = vld [vmem:[#allocation5 + $0x298] sm:$0xff]  ;;  %v1449_v59 = vld [vmem:[#allocation5 + $0x310] sm:$0xff] }
 0x113   : > { %v8336_v1 = vcombine.high %v1446_v54, %v1448_v55  ;;  %v8337_v10 = vcombine.low %v1449_v59, %v1451_v60  ;;  %v1471_v39 = vld [vmem:[#allocation5 + $0x5d0] sm:$0xff]  ;;  %v1472_v43 = vld [vmem:[#allocation5 + $0x5d8] sm:$0xff] }
 0x115   : > { %1161 = vmatpush1.bf16.msra.mxu0 %v8301_v61  ;;  %1243 = vmatpush1.bf16.msra.mxu1 %v8303_v62  ;;  %v8331_v61 = vcombine.low %v1442_v46, %v1444_v47  ;;  %v8334_v62 = vcombine.high %v1445_v50, %v1447_v51  ;;  %v1473_v46 = vld [vmem:[#allocation5 + $0x610] sm:$0xff]  ;;  %v1474_v50 = vld [vmem:[#allocation5 + $0x618] sm:$0xff] }
 0x116   : > { %1162 = vmatprep.subr.bf16.mxu0 %v8306_v63  ;;  %1244 = vmatprep.subr.bf16.mxu1 %v8308_v3  ;;  %v1450_v63 = vld [vmem:[#allocation5 + $0x318] sm:$0xff]  ;;  %v1453_v3 = vld [vmem:[#allocation5 + $0x390] sm:$0xff] }
 0x117   : > { %v8340_v9 = vcombine.high %v1450_v63, %v1452_v0  ;;  %v8339_v14 = vcombine.low %v1450_v63, %v1452_v0  ;;  %v8341_v19 = vcombine.low %v1453_v3, %v1455_v4  ;;  %v1475_v47 = vld [vmem:[#allocation5 + $0x650] sm:$0xff]  ;;  %v1476_v51 = vld [vmem:[#allocation5 + $0x658] sm:$0xff] }
 0x118   : > { %v1481_v63 = vld [vmem:[#allocation5 + $0x710] sm:$0xff] }
 0x119   : > { %1163 = vmatpush1.bf16.msra.mxu0 %v8305_v5  ;;  %1245 = vmatpush1.bf16.msra.mxu1 %v8307_v6  ;;  %v8335_v5 = vcombine.low %v1446_v54, %v1448_v55  ;;  %v8338_v6 = vcombine.high %v1449_v59, %v1451_v60  ;;  %v1477_v54 = vld [vmem:[#allocation5 + $0x690] sm:$0xff]  ;;  %v1478_v59 = vld [vmem:[#allocation5 + $0x698] sm:$0xff] }
 0x11a   : > { %1164 = vmatprep.subr.bf16.mxu0 %v8310_v7  ;;  %1246 = vmatprep.subr.bf16.mxu1 %v8312_v11  ;;  %v1454_v7 = vld [vmem:[#allocation5 + $0x398] sm:$0xff]  ;;  %v1457_v11 = vld [vmem:[#allocation5 + $0x410] sm:$0xff] }
 0x11b   : > { %v8344_v18 = vcombine.high %v1454_v7, %v1456_v8  ;;  %v8343_v22 = vcombine.low %v1454_v7, %v1456_v8  ;;  %v1479_v55 = vld [vmem:[#allocation5 + $0x6d0] sm:$0xff]  ;;  %v1480_v60 = vld [vmem:[#allocation5 + $0x6d8] sm:$0xff] }
 0x11c   : > { %v1483_v0 = vld [vmem:[#allocation5 + $0x750] sm:$0xff] }
 0x11d   : > { %1165 = vmatpush1.bf16.msra.mxu0 %v8309_v15  ;;  %1247 = vmatpush1.bf16.msra.mxu1 %v8311_v16  ;;  %v8342_v15 = vcombine.high %v1453_v3, %v1455_v4  ;;  %v1458_v16 = vld [vmem:[#allocation5 + $0x418] sm:$0xff]  ;;  %v1485_v7 = vld [vmem:[#allocation5 + $0x790] sm:$0xff] }
 0x11e   : > { %2215 = vmatprep.subr.bf16.mxu0 %v8314_v17  ;;  %2297 = vmatprep.subr.bf16.mxu1 %v8316_v21  ;;  %v1460_v17 = vld [vmem:[#allocation5 + $0x458] sm:$0xff]  ;;  %v1463_v21 = vld [vmem:[#allocation5 + $0x4d0] sm:$0xff] }
 0x11f   : > { %v1482_v3 = vld [vmem:[#allocation5 + $0x718] sm:$0xff]  ;;  %v1487_v8 = vld [vmem:[#allocation5 + $0x7d0] sm:$0xff] }
 0x120   : > { %1167 = vmatmul.mubr.bf16.vlgmr.msra.gmra.mrb[0].mxu0 %v10661_v23  ;;  %1249 = vmatmul.mubr.bf16.vlgmr.msra.gmra.mrb[0].mxu1 %v10661_v23  ;;  %v1484_v4 = vld [vmem:[#allocation5 + $0x758] sm:$0xff] }
 0x121   : > { %2216 = vmatpush1.bf16.msra.mxu0 %v8313_v25  ;;  %2298 = vmatpush1.bf16.msra.mxu1 %v8315_v28  ;;  %v8346_v25 = vcombine.high %v1457_v11, %v1459_v13  ;;  %v8348_v28 = vcombine.high %v1458_v16, %v1460_v17 }
 0x122   : > { %2217 = vmatprep.subr.bf16.mxu0 %v8318_v29  ;;  %2299 = vmatprep.subr.bf16.mxu1 %v8320_v32  ;;  %v8345_v29 = vcombine.low %v1457_v11, %v1459_v13  ;;  %v8347_v32 = vcombine.low %v1458_v16, %v1460_v17  ;;  %v1486_v11 = vld [vmem:[#allocation5 + $0x798] sm:$0xff]  ;;  %v1489_v16 = vld [vmem:[#allocation5 + $0x810] sm:$0xff] }
 0x123   : > { %2247 = vmatprep.mubr.bf16.mxu0 %v10646_v57  ;;  %2329 = vmatprep.mubr.bf16.mxu1 %v10646_v57  ;;  %v1488_v13 = vld [vmem:[#allocation5 + $0x7d8] sm:$0xff]  ;;  %v1491_v17 = vld [vmem:[#allocation5 + $0x850] sm:$0xff] }
 0x125   : > { %2218 = vmatpush1.bf16.msra.mxu0 %v8317_v33  ;;  %2300 = vmatpush1.bf16.msra.mxu1 %v8319_v36  ;;  %v8350_v33 = vcombine.high %v1461_v20, %v1463_v21  ;;  %v8352_v36 = vcombine.high %v1462_v26, %v1464_v27 }
 0x126   : > { %2219 = vmatprep.subr.bf16.mxu0 %v8322_v37  ;;  %2301 = vmatprep.subr.bf16.mxu1 %v8324_v40  ;;  %v8349_v37 = vcombine.low %v1461_v20, %v1463_v21  ;;  %v8351_v40 = vcombine.low %v1462_v26, %v1464_v27  ;;  %v1490_v20 = vld [vmem:[#allocation5 + $0x818] sm:$0xff]  ;;  %v1493_v26 = vld [vmem:[#allocation5 + $0x890] sm:$0xff] }
 0x127   : > { %v1492_v21 = vld [vmem:[#allocation5 + $0x858] sm:$0xff]  ;;  %v1495_v27 = vld [vmem:[#allocation5 + $0x8d0] sm:$0xff] }
 0x129   : > { %2220 = vmatpush1.bf16.msra.mxu0 %v8321_v41  ;;  %2302 = vmatpush1.bf16.msra.mxu1 %v8323_v44  ;;  %v8354_v41 = vcombine.high %v1465_v30, %v1467_v31  ;;  %v8356_v44 = vcombine.high %v1466_v34, %v1468_v35 }
 0x12a   : > { %2221 = vmatprep.subr.bf16.mxu0 %v8326_v45  ;;  %2303 = vmatprep.subr.bf16.mxu1 %v8328_v48  ;;  %v8353_v45 = vcombine.low %v1465_v30, %v1467_v31  ;;  %v8355_v48 = vcombine.low %v1466_v34, %v1468_v35  ;;  %v1494_v30 = vld [vmem:[#allocation5 + $0x898] sm:$0xff]  ;;  %v1497_v34 = vld [vmem:[#allocation5 + $0x910] sm:$0xff] }
 0x12b   : > { %v1496_v31 = vld [vmem:[#allocation5 + $0x8d8] sm:$0xff]  ;;  %v1499_v35 = vld [vmem:[#allocation5 + $0x950] sm:$0xff] }
 0x12d   : > { %2222 = vmatpush1.bf16.msra.mxu0 %v8325_v49  ;;  %2304 = vmatpush1.bf16.msra.mxu1 %v8327_v52  ;;  %v8358_v49 = vcombine.high %v1469_v38, %v1471_v39  ;;  %v8360_v52 = vcombine.high %v1470_v42, %v1472_v43 }
 0x12e   : > { %2223 = vmatprep.subr.bf16.mxu0 %v8330_v53  ;;  %2305 = vmatprep.subr.bf16.mxu1 %v8332_v56  ;;  %v8357_v53 = vcombine.low %v1469_v38, %v1471_v39  ;;  %v8359_v56 = vcombine.low %v1470_v42, %v1472_v43  ;;  %v1498_v38 = vld [vmem:[#allocation5 + $0x918] sm:$0xff]  ;;  %v1501_v42 = vld [vmem:[#allocation5 + $0x990] sm:$0xff] }
 0x12f   : > { %v1500_v39 = vld [vmem:[#allocation5 + $0x958] sm:$0xff]  ;;  %v1503_v43 = vld [vmem:[#allocation5 + $0x9d0] sm:$0xff] }
 0x131   : > { %2224 = vmatpush1.bf16.msra.mxu0 %v8329_v58  ;;  %2306 = vmatpush1.bf16.msra.mxu1 %v8331_v61  ;;  %v8362_v58 = vcombine.high %v1473_v46, %v1475_v47  ;;  %v8364_v61 = vcombine.high %v1474_v50, %v1476_v51 }
 0x132   : > { %2225 = vmatprep.subr.bf16.mxu0 %v8334_v62  ;;  %2307 = vmatprep.subr.bf16.mxu1 %v8336_v1  ;;  %v8361_v62 = vcombine.low %v1473_v46, %v1475_v47  ;;  %v8363_v1 = vcombine.low %v1474_v50, %v1476_v51  ;;  %v1502_v46 = vld [vmem:[#allocation5 + $0x998] sm:$0xff]  ;;  %v1505_v50 = vld [vmem:[#allocation5 + $0xa10] sm:$0xff] }
 0x133   : > { %v1504_v47 = vld [vmem:[#allocation5 + $0x9d8] sm:$0xff]  ;;  %v1507_v51 = vld [vmem:[#allocation5 + $0xa50] sm:$0xff] }
 0x135   : > { %2226 = vmatpush1.bf16.msra.mxu0 %v8333_v2  ;;  %2308 = vmatpush1.bf16.msra.mxu1 %v8335_v5  ;;  %v8366_v2 = vcombine.high %v1477_v54, %v1479_v55  ;;  %v8368_v5 = vcombine.high %v1478_v59, %v1480_v60 }
 0x136   : > { %2227 = vmatprep.subr.bf16.mxu0 %v8338_v6  ;;  %2309 = vmatprep.subr.bf16.mxu1 %v8340_v9  ;;  %v8365_v6 = vcombine.low %v1477_v54, %v1479_v55  ;;  %v8367_v9 = vcombine.low %v1478_v59, %v1480_v60  ;;  %v1506_v54 = vld [vmem:[#allocation5 + $0xa18] sm:$0xff]  ;;  %v1509_v59 = vld [vmem:[#allocation5 + $0xa90] sm:$0xff] }
 0x137   : > { %v1508_v55 = vld [vmem:[#allocation5 + $0xa58] sm:$0xff]  ;;  %v1511_v60 = vld [vmem:[#allocation5 + $0xad0] sm:$0xff] }
 0x139   : > { %2228 = vmatpush1.bf16.msra.mxu0 %v8337_v10  ;;  %2310 = vmatpush1.bf16.msra.mxu1 %v8339_v14  ;;  %v8370_v10 = vcombine.high %v1481_v63, %v1483_v0  ;;  %v8372_v14 = vcombine.high %v1482_v3, %v1484_v4 }
 0x13a   : > { %2229 = vmatprep.subr.bf16.mxu0 %v8342_v15  ;;  %2311 = vmatprep.subr.bf16.mxu1 %v8344_v18  ;;  %v8369_v15 = vcombine.low %v1481_v63, %v1483_v0  ;;  %v8371_v18 = vcombine.low %v1482_v3, %v1484_v4  ;;  %v1510_v63 = vld [vmem:[#allocation5 + $0xa98] sm:$0xff]  ;;  %v1513_v3 = vld [vmem:[#allocation5 + $0xb10] sm:$0xff] }
 0x13b   : > { %v1512_v0 = vld [vmem:[#allocation5 + $0xad8] sm:$0xff]  ;;  %v1515_v4 = vld [vmem:[#allocation5 + $0xb50] sm:$0xff] }
 0x13d   : > { %2230 = vmatpush1.bf16.msra.mxu0 %v8341_v19  ;;  %2312 = vmatpush1.bf16.msra.mxu1 %v8343_v22  ;;  %v8374_v19 = vcombine.high %v1485_v7, %v1487_v8  ;;  %v8376_v22 = vcombine.high %v1486_v11, %v1488_v13 }
 0x13e   : > { %2231 = vmatprep.subr.bf16.mxu0 %v8346_v25  ;;  %2313 = vmatprep.subr.bf16.mxu1 %v8348_v28  ;;  %v8373_v25 = vcombine.low %v1485_v7, %v1487_v8  ;;  %v8375_v28 = vcombine.low %v1486_v11, %v1488_v13  ;;  %v1514_v7 = vld [vmem:[#allocation5 + $0xb18] sm:$0xff]  ;;  %v1517_v11 = vld [vmem:[#allocation5 + $0xb90] sm:$0xff] }
 0x13f   : > { %v1516_v8 = vld [vmem:[#allocation5 + $0xb58] sm:$0xff]  ;;  %v1519_v13 = vld [vmem:[#allocation5 + $0xbd0] sm:$0xff] }
 0x141   : > { %2232 = vmatpush1.bf16.msra.mxu0 %v8345_v29  ;;  %2314 = vmatpush1.bf16.msra.mxu1 %v8347_v32  ;;  %v8378_v29 = vcombine.high %v1489_v16, %v1491_v17  ;;  %v8380_v32 = vcombine.high %v1490_v20, %v1492_v21 }
 0x142   : > { %2233 = vmatprep.subr.bf16.mxu0 %v8350_v33  ;;  %2315 = vmatprep.subr.bf16.mxu1 %v8352_v36  ;;  %v8377_v33 = vcombine.low %v1489_v16, %v1491_v17  ;;  %v8379_v36 = vcombine.low %v1490_v20, %v1492_v21  ;;  %v1518_v16 = vld [vmem:[#allocation5 + $0xb98] sm:$0xff]  ;;  %v1521_v20 = vld [vmem:[#allocation5 + $0xc10] sm:$0xff] }
 0x143   : > { %v1520_v17 = vld [vmem:[#allocation5 + $0xbd8] sm:$0xff]  ;;  %v1523_v21 = vld [vmem:[#allocation5 + $0xc50] sm:$0xff] }
 0x145   : > { %2234 = vmatpush1.bf16.msra.mxu0 %v8349_v37  ;;  %2316 = vmatpush1.bf16.msra.mxu1 %v8351_v40  ;;  %v8382_v37 = vcombine.high %v1493_v26, %v1495_v27  ;;  %v8384_v40 = vcombine.high %v1494_v30, %v1496_v31 }
 0x146   : > { %2235 = vmatprep.subr.bf16.mxu0 %v8354_v41  ;;  %2317 = vmatprep.subr.bf16.mxu1 %v8356_v44  ;;  %v8381_v41 = vcombine.low %v1493_v26, %v1495_v27  ;;  %v8383_v44 = vcombine.low %v1494_v30, %v1496_v31  ;;  %v1522_v26 = vld [vmem:[#allocation5 + $0xc18] sm:$0xff]  ;;  %v1525_v30 = vld [vmem:[#allocation5 + $0xc90] sm:$0xff] }
 0x147   : > { %v1524_v27 = vld [vmem:[#allocation5 + $0xc58] sm:$0xff]  ;;  %v1527_v31 = vld [vmem:[#allocation5 + $0xcd0] sm:$0xff] }
 0x149   : > { %2236 = vmatpush1.bf16.msra.mxu0 %v8353_v45  ;;  %2318 = vmatpush1.bf16.msra.mxu1 %v8355_v48  ;;  %v8386_v45 = vcombine.high %v1497_v34, %v1499_v35  ;;  %v8388_v48 = vcombine.high %v1498_v38, %v1500_v39 }
 0x14a   : > { %2237 = vmatprep.subr.bf16.mxu0 %v8358_v49  ;;  %2319 = vmatprep.subr.bf16.mxu1 %v8360_v52  ;;  %v8385_v49 = vcombine.low %v1497_v34, %v1499_v35  ;;  %v8387_v52 = vcombine.low %v1498_v38, %v1500_v39  ;;  %v1526_v34 = vld [vmem:[#allocation5 + $0xc98] sm:$0xff]  ;;  %v8411_v38 = vcombine.low %v1522_v26, %v1524_v27 }
 0x14b   : > { %v1528_v35 = vld [vmem:[#allocation5 + $0xcd8] sm:$0xff]  ;;  %v8414_v39 = vcombine.high %v1525_v30, %v1527_v31 }
 0x14d   : > { %2238 = vmatpush1.bf16.msra.mxu0 %v8357_v53  ;;  %2320 = vmatpush1.bf16.msra.mxu1 %v8359_v56  ;;  %v8390_v53 = vcombine.high %v1501_v42, %v1503_v43  ;;  %v8392_v56 = vcombine.high %v1502_v46, %v1504_v47 }
 0x14e   : > { %2239 = vmatprep.subr.bf16.mxu0 %v8362_v58  ;;  %2321 = vmatprep.subr.bf16.mxu1 %v8364_v61  ;;  %v8389_v58 = vcombine.low %v1501_v42, %v1503_v43  ;;  %v8391_v61 = vcombine.low %v1502_v46, %v1504_v47  ;;  %v1531_v42 = vld [vmem:[#allocation5 + $0xd50] sm:$0xff]  ;;  %v1530_v43 = vld [vmem:[#allocation5 + $0xd18] sm:$0xff]  ;;  %v8415_v46 = vcombine.low %v1526_v34, %v1528_v35 }
 0x151   : > { %2240 = vmatpush1.bf16.msra.mxu0 %v8361_v62  ;;  %2322 = vmatpush1.bf16.msra.mxu1 %v8363_v1  ;;  %v8394_v62 = vcombine.high %v1505_v50, %v1507_v51  ;;  %v8396_v1 = vcombine.high %v1506_v54, %v1508_v55 }
 0x152   : > { %2241 = vmatprep.subr.bf16.mxu0 %v8366_v2  ;;  %2323 = vmatprep.subr.bf16.mxu1 %v8368_v5  ;;  %v8393_v2 = vcombine.low %v1505_v50, %v1507_v51  ;;  %v8395_v5 = vcombine.low %v1506_v54, %v1508_v55  ;;  %v1535_v50 = vld [vmem:[#allocation5 + $0xdd0] sm:$0xff]  ;;  %v1534_v51 = vld [vmem:[#allocation5 + $0xd98] sm:$0xff] }
 0x155   : > { %2242 = vmatpush1.bf16.msra.mxu0 %v8365_v6  ;;  %2324 = vmatpush1.bf16.msra.mxu1 %v8367_v9  ;;  %v8398_v6 = vcombine.high %v1509_v59, %v1511_v60  ;;  %v8400_v9 = vcombine.high %v1510_v63, %v1512_v0 }
 0x156   : > { %2243 = vmatprep.subr.bf16.mxu0 %v8370_v10  ;;  %2325 = vmatprep.subr.bf16.mxu1 %v8372_v14  ;;  %v8397_v10 = vcombine.low %v1509_v59, %v1511_v60  ;;  %v8399_v14 = vcombine.low %v1510_v63, %v1512_v0  ;;  %v1539_v59 = vld [vmem:[#allocation5 + $0xe50] sm:$0xff]  ;;  %v1538_v60 = vld [vmem:[#allocation5 + $0xe18] sm:$0xff] }
 0x157   : > { %v1541_v63 = vld [vmem:[#allocation5 + $0xe90] sm:$0xff] }
 0x158   : > { %v1543_v0 = vld [vmem:[#allocation5 + $0xed0] sm:$0xff] }
 0x159   : > { %2244 = vmatpush1.bf16.msra.mxu0 %v8369_v15  ;;  %2326 = vmatpush1.bf16.msra.mxu1 %v8371_v18  ;;  %v8402_v15 = vcombine.high %v1513_v3, %v1515_v4  ;;  %v8404_v18 = vcombine.high %v1514_v7, %v1516_v8 }
 0x15a   : > { %2245 = vmatprep.subr.bf16.mxu0 %v8374_v19  ;;  %2327 = vmatprep.subr.bf16.mxu1 %v8376_v22  ;;  %v8401_v19 = vcombine.low %v1513_v3, %v1515_v4  ;;  %v8403_v22 = vcombine.low %v1514_v7, %v1516_v8  ;;  %v1542_v3 = vld [vmem:[#allocation5 + $0xe98] sm:$0xff]  ;;  %v1545_v7 = vld [vmem:[#allocation5 + $0xf10] sm:$0xff] }
 0x15b   : > { %v1544_v4 = vld [vmem:[#allocation5 + $0xed8] sm:$0xff]  ;;  %v1547_v8 = vld [vmem:[#allocation5 + $0xf50] sm:$0xff] }
 0x15d   : > { %2246 = vmatpush1.bf16.msra.mxu0 %v8373_v25  ;;  %2328 = vmatpush1.bf16.msra.mxu1 %v8375_v28  ;;  %v8406_v25 = vcombine.high %v1517_v11, %v1519_v13  ;;  %v8408_v28 = vcombine.high %v1518_v16, %v1520_v17 }
 0x15e   : > { %2256 = vmatprep.subr.bf16.mxu0 %v8378_v29  ;;  %2338 = vmatprep.subr.bf16.mxu1 %v8380_v32  ;;  %v8405_v29 = vcombine.low %v1517_v11, %v1519_v13  ;;  %v8407_v32 = vcombine.low %v1518_v16, %v1520_v17  ;;  %v1546_v11 = vld [vmem:[#allocation5 + $0xf18] sm:$0xff]  ;;  %v1549_v16 = vld [vmem:[#allocation5 + $0xf90] sm:$0xff] }
 0x15f   : > { %v1548_v13 = vld [vmem:[#allocation5 + $0xf58] sm:$0xff]  ;;  %v1551_v17 = vld [vmem:[#allocation5 + $0xfd0] sm:$0xff] }
 0x160   : > { %2248 = vmatmul.mubr.bf16.vlgmr.msra.gmra.mrb[4].mxu0 %v10651_v12  ;;  %2330 = vmatmul.mubr.bf16.vlgmr.msra.gmra.mrb[4].mxu1 %v10651_v12 }
 0x161   : > { %2257 = vmatpush1.bf16.msra.mxu0 %v8377_v33  ;;  %2339 = vmatpush1.bf16.msra.mxu1 %v8379_v36  ;;  %v8410_v33 = vcombine.high %v1521_v20, %v1523_v21  ;;  %v8412_v36 = vcombine.high %v1522_v26, %v1524_v27  ;;  %v8435_v26 = vcombine.low %v1546_v11, %v1548_v13 }
 0x162   : > { %2258 = vmatprep.subr.bf16.mxu0 %v8382_v37  ;;  %2340 = vmatprep.subr.bf16.mxu1 %v8384_v40  ;;  %v8409_v37 = vcombine.low %v1521_v20, %v1523_v21  ;;  %v8416_v40 = vcombine.high %v1526_v34, %v1528_v35  ;;  %v1550_v20 = vld [vmem:[#allocation5 + $0xf98] sm:$0xff]  ;;  %v8438_v27 = vcombine.high %v1549_v16, %v1551_v17  ;;  %v9358_v34 = vld [vmem:[#allocation8 + $0x600] ss:$16 sps:$4 sm:$0xff]   ;;  %v9363_v35 = vld [vmem:[#allocation8 + $0x424] ss:$16 sps:$4 sm:$0xff]  }
 0x163   : > { %2288 = vmatprep.mubr.bf16.mxu0 %v10654_v24  ;;  %2370 = vmatprep.mubr.bf16.mxu1 %v10654_v24  ;;  %v1552_v21 = vld [vmem:[#allocation5 + $0xfd8] sm:$0xff] }
 0x165   : > { %2259 = vmatpush1.bf16.msra.mxu0 %v8381_v41  ;;  %2341 = vmatpush1.bf16.msra.mxu1 %v8383_v44  ;;  %v1529_v41 = vld [vmem:[#allocation5 + $0xd10] sm:$0xff]  ;;  %v1532_v44 = vld [vmem:[#allocation5 + $0xd58] sm:$0xff] }
 0x166   : > { %2260 = vmatprep.subr.bf16.mxu0 %v8386_v45  ;;  %2342 = vmatprep.subr.bf16.mxu1 %v8388_v48  ;;  %v8413_v45 = vcombine.low %v1525_v30, %v1527_v31  ;;  %v8418_v47 = vcombine.high %v1529_v41, %v1531_v42  ;;  %v8420_v48 = vcombine.high %v1530_v43, %v1532_v44  ;;  %v9360_v31 = vld [vmem:[#allocation8 + $0x604] ss:$16 sps:$4 sm:$0xff]  }
 0x167   : > { %v8419_v54 = vcombine.low %v1530_v43, %v1532_v44  ;;  %v8437_v30 = vcombine.low %v1549_v16, %v1551_v17  ;;  %v9375_v43 = vld [vmem:[#allocation8 + $0x464] ss:$16 sps:$4 sm:$0xff]   ;;  %v9412_v16 = vld [vmem:[#allocation8 + $0x720] ss:$16 sps:$4 sm:$0xff]  }
 0x168   : > { %v9378_v44 = vld [vmem:[#allocation8 + $0x664] ss:$16 sps:$4 sm:$0xff]  }
 0x169   : > { %2261 = vmatpush1.bf16.msra.mxu0 %v8385_v49  ;;  %2343 = vmatpush1.bf16.msra.mxu1 %v8387_v52  ;;  %v1533_v49 = vld [vmem:[#allocation5 + $0xd90] sm:$0xff]  ;;  %v1536_v52 = vld [vmem:[#allocation5 + $0xdd8] sm:$0xff] }
 0x16a   : > { %2262 = vmatprep.subr.bf16.mxu0 %v8390_v53  ;;  %2344 = vmatprep.subr.bf16.mxu1 %v8392_v56  ;;  %v8417_v53 = vcombine.low %v1529_v41, %v1531_v42  ;;  %v8422_v55 = vcombine.high %v1533_v49, %v1535_v50  ;;  %v8424_v56 = vcombine.high %v1534_v51, %v1536_v52  ;;  %v9367_v41 = vld [vmem:[#allocation8 + $0x440] ss:$16 sps:$4 sm:$0xff]   ;;  %v9417_v17 = vld [vmem:[#allocation8 + $0x544] ss:$16 sps:$4 sm:$0xff]  }
 0x16b   : > { %v9370_v42 = vld [vmem:[#allocation8 + $0x640] ss:$16 sps:$4 sm:$0xff]  }
 0x16d   : > { %2263 = vmatpush1.bf16.msra.mxu0 %v8389_v58  ;;  %2345 = vmatpush1.bf16.msra.mxu1 %v8391_v61  ;;  %v1537_v58 = vld [vmem:[#allocation5 + $0xe10] sm:$0xff]  ;;  %v1540_v61 = vld [vmem:[#allocation5 + $0xe58] sm:$0xff] }
 0x16e   : > { %2264 = vmatprep.subr.bf16.mxu0 %v8394_v62  ;;  %2346 = vmatprep.subr.bf16.mxu1 %v8396_v1  ;;  %v8421_v62 = vcombine.low %v1533_v49, %v1535_v50  ;;  %v8423_v1 = vcombine.low %v1534_v51, %v1536_v52  ;;  %v9379_v49 = vld [vmem:[#allocation8 + $0x480] ss:$16 sps:$4 sm:$0xff]   ;;  %v9387_v51 = vld [vmem:[#allocation8 + $0x4a4] ss:$16 sps:$4 sm:$0xff]  }
 0x16f   : > { %v9382_v50 = vld [vmem:[#allocation8 + $0x680] ss:$16 sps:$4 sm:$0xff]   ;;  %v9390_v52 = vld [vmem:[#allocation8 + $0x6a4] ss:$16 sps:$4 sm:$0xff]  }
 0x171   : > { %2265 = vmatpush1.bf16.msra.mxu0 %v8393_v2  ;;  %2347 = vmatpush1.bf16.msra.mxu1 %v8395_v5  ;;  %v8426_v2 = vcombine.high %v1537_v58, %v1539_v59  ;;  %v8428_v5 = vcombine.high %v1538_v60, %v1540_v61 }
 0x172   : > { %2266 = vmatprep.subr.bf16.mxu0 %v8398_v6  ;;  %2348 = vmatprep.subr.bf16.mxu1 %v8400_v9  ;;  %v8425_v6 = vcombine.low %v1537_v58, %v1539_v59  ;;  %v8427_v9 = vcombine.low %v1538_v60, %v1540_v61  ;;  %v9391_v58 = vld [vmem:[#allocation8 + $0x4c0] ss:$16 sps:$4 sm:$0xff]   ;;  %v9399_v60 = vld [vmem:[#allocation8 + $0x4e4] ss:$16 sps:$4 sm:$0xff]  }
 0x173   : > { %v9394_v59 = vld [vmem:[#allocation8 + $0x6c0] ss:$16 sps:$4 sm:$0xff]   ;;  %v9402_v61 = vld [vmem:[#allocation8 + $0x6e4] ss:$16 sps:$4 sm:$0xff]  }
 0x175   : > { %2267 = vmatpush1.bf16.msra.mxu0 %v8397_v10  ;;  %2349 = vmatpush1.bf16.msra.mxu1 %v8399_v14  ;;  %v8430_v10 = vcombine.high %v1541_v63, %v1543_v0  ;;  %v8432_v14 = vcombine.high %v1542_v3, %v1544_v4 }
 0x176   : > { %2268 = vmatprep.subr.bf16.mxu0 %v8402_v15  ;;  %2350 = vmatprep.subr.bf16.mxu1 %v8404_v18  ;;  %v8429_v15 = vcombine.low %v1541_v63, %v1543_v0  ;;  %v8431_v18 = vcombine.low %v1542_v3, %v1544_v4  ;;  %v9400_v63 = vld [vmem:[#allocation8 + $0x6e0] ss:$16 sps:$4 sm:$0xff]   ;;  %v9405_v0 = vld [vmem:[#allocation8 + $0x504] ss:$16 sps:$4 sm:$0xff]  }
 0x177   : > { %v9406_v3 = vld [vmem:[#allocation8 + $0x700] ss:$16 sps:$4 sm:$0xff]  }
 0x179   : > { %2269 = vmatpush1.bf16.msra.mxu0 %v8401_v19  ;;  %2351 = vmatpush1.bf16.msra.mxu1 %v8403_v22  ;;  %v8434_v19 = vcombine.high %v1545_v7, %v1547_v8  ;;  %v8436_v22 = vcombine.high %v1546_v11, %v1548_v13 }
 0x17a   : > { %2270 = vmatprep.subr.bf16.mxu0 %v8406_v25  ;;  %2352 = vmatprep.subr.bf16.mxu1 %v8408_v28  ;;  %v8433_v25 = vcombine.low %v1545_v7, %v1547_v8  ;;  %v8440_v28 = vcombine.high %v1550_v20, %v1552_v21 }
 0x17d   : > { %2271 = vmatpush1.bf16.msra.mxu0 %v8405_v29  ;;  %2353 = vmatpush1.bf16.msra.mxu1 %v8407_v32  ;;  %v9357_v29 = vld [vmem:[#allocation8 + $0x404] ss:$16 sps:$4 sm:$0xff]   ;;  %v8439_v32 = vcombine.low %v1550_v20, %v1552_v21  ;;  %v9418_v20 = vld [vmem:[#allocation8 + $0x740] ss:$16 sps:$4 sm:$0xff]  }
 0x17e   : > { %2272 = vmatprep.subr.bf16.mxu0 %v8410_v33  ;;  %2354 = vmatprep.subr.bf16.mxu1 %v8412_v36  ;;  %v9355_v33 = vld [vmem:[#allocation8 + $0x400] ss:$16 sps:$4 sm:$0xff]   ;;  %v9366_v36 = vld [vmem:[#allocation8 + $0x624] ss:$16 sps:$4 sm:$0xff]  }
 0x17f   : > { %v9421_v21 = vld [vmem:[#allocation8 + $0x560] ss:$16 sps:$4 sm:$0xff]  }
 0x181   : > { %2273 = vmatpush1.bf16.msra.mxu0 %v8409_v37  ;;  %2355 = vmatpush1.bf16.msra.mxu1 %v8411_v38  ;;  %v9361_v37 = vld [vmem:[#allocation8 + $0x420] ss:$16 sps:$4 sm:$0xff]  }
 0x182   : > { %2274 = vmatprep.subr.bf16.mxu0 %v8414_v39  ;;  %2356 = vmatprep.subr.bf16.mxu1 %v8416_v40  ;;  %v9364_v38 = vld [vmem:[#allocation8 + $0x620] ss:$16 sps:$4 sm:$0xff]   ;;  %v9369_v39 = vld [vmem:[#allocation8 + $0x444] ss:$16 sps:$4 sm:$0xff]  }
 0x183   : > { %v9372_v40 = vld [vmem:[#allocation8 + $0x644] ss:$16 sps:$4 sm:$0xff]  }
 0x185   : > { %2275 = vmatpush1.bf16.msra.mxu0 %v8413_v45  ;;  %2357 = vmatpush1.bf16.msra.mxu1 %v8415_v46  ;;  %v9373_v45 = vld [vmem:[#allocation8 + $0x460] ss:$16 sps:$4 sm:$0xff]  }
 0x186   : > { %2276 = vmatprep.subr.bf16.mxu0 %v8418_v47  ;;  %2358 = vmatprep.subr.bf16.mxu1 %v8420_v48  ;;  %v9376_v46 = vld [vmem:[#allocation8 + $0x660] ss:$16 sps:$4 sm:$0xff]   ;;  %v9381_v47 = vld [vmem:[#allocation8 + $0x484] ss:$16 sps:$4 sm:$0xff]  }
 0x187   : > { %v9384_v48 = vld [vmem:[#allocation8 + $0x684] ss:$16 sps:$4 sm:$0xff]  }
 0x189   : > { %2277 = vmatpush1.bf16.msra.mxu0 %v8417_v53  ;;  %2359 = vmatpush1.bf16.msra.mxu1 %v8419_v54  ;;  %v9385_v53 = vld [vmem:[#allocation8 + $0x4a0] ss:$16 sps:$4 sm:$0xff]  }
 0x18a   : > { %2278 = vmatprep.subr.bf16.mxu0 %v8422_v55  ;;  %2360 = vmatprep.subr.bf16.mxu1 %v8424_v56  ;;  %v9388_v54 = vld [vmem:[#allocation8 + $0x6a0] ss:$16 sps:$4 sm:$0xff]   ;;  %v9393_v55 = vld [vmem:[#allocation8 + $0x4c4] ss:$16 sps:$4 sm:$0xff]  }
 0x18b   : > { %v9396_v56 = vld [vmem:[#allocation8 + $0x6c4] ss:$16 sps:$4 sm:$0xff]  }
 0x18d   : > { %2279 = vmatpush1.bf16.msra.mxu0 %v8421_v62  ;;  %2361 = vmatpush1.bf16.msra.mxu1 %v8423_v1  ;;  %v9397_v62 = vld [vmem:[#allocation8 + $0x4e0] ss:$16 sps:$4 sm:$0xff]   ;;  %v9408_v1 = vld [vmem:[#allocation8 + $0x704] ss:$16 sps:$4 sm:$0xff]  }
 0x18e   : > { %2280 = vmatprep.subr.bf16.mxu0 %v8426_v2  ;;  %2362 = vmatprep.subr.bf16.mxu1 %v8428_v5  ;;  %v9403_v2 = vld [vmem:[#allocation8 + $0x500] ss:$16 sps:$4 sm:$0xff]  }
 0x191   : > { %2281 = vmatpush1.bf16.msra.mxu0 %v8425_v6  ;;  %2363 = vmatpush1.bf16.msra.mxu1 %v8427_v9  ;;  %v9411_v9 = vld [vmem:[#allocation8 + $0x524] ss:$16 sps:$4 sm:$0xff]  }
 0x192   : > { %2282 = vmatprep.subr.bf16.mxu0 %v8430_v10  ;;  %2364 = vmatprep.subr.bf16.mxu1 %v8432_v14  ;;  %v9414_v10 = vld [vmem:[#allocation8 + $0x724] ss:$16 sps:$4 sm:$0xff]   ;;  %v9409_v14 = vld [vmem:[#allocation8 + $0x520] ss:$16 sps:$4 sm:$0xff]  }
 0x195   : > { %2283 = vmatpush1.bf16.msra.mxu0 %v8429_v15  ;;  %2365 = vmatpush1.bf16.msra.mxu1 %v8431_v18  ;;  %v9420_v18 = vld [vmem:[#allocation8 + $0x744] ss:$16 sps:$4 sm:$0xff]  }
 0x196   : > { %2284 = vmatprep.subr.bf16.mxu0 %v8434_v19  ;;  %2366 = vmatprep.subr.bf16.mxu1 %v8436_v22  ;;  %v9415_v19 = vld [vmem:[#allocation8 + $0x540] ss:$16 sps:$4 sm:$0xff]   ;;  %v9423_v22 = vld [vmem:[#allocation8 + $0x564] ss:$16 sps:$4 sm:$0xff]  }
 0x199   : > { %2285 = vmatpush1.bf16.msra.mxu0 %v8433_v25  ;;  %2367 = vmatpush1.bf16.msra.mxu1 %v8435_v26  ;;  %v9424_v25 = vld [vmem:[#allocation8 + $0x760] ss:$16 sps:$4 sm:$0xff]   ;;  %v9426_v26 = vld [vmem:[#allocation8 + $0x764] ss:$16 sps:$4 sm:$0xff]  }
 0x19a   : > { %2286 = vmatprep.subr.bf16.mxu0 %v8438_v27  ;;  %2368 = vmatprep.subr.bf16.mxu1 %v8440_v28  ;;  %v9429_v27 = vld [vmem:[#allocation8 + $0x584] ss:$16 sps:$4 sm:$0xff]  }
 0x19b   : > { %v9432_v28 = vld [vmem:[#allocation8 + $0x784] ss:$16 sps:$4 sm:$0xff]  }
 0x19d   : > { %2287 = vmatpush1.bf16.msra.mxu0 %v8437_v30  ;;  %2369 = vmatpush1.bf16.msra.mxu1 %v8439_v32  ;;  %v9435_v30 = vld [vmem:[#allocation8 + $0x5a4] ss:$16 sps:$4 sm:$0xff]  }
 0x19e   : > { %3187 = vmatprep.subr.bf16.mxu0 %v9357_v29  ;;  %3228 = vmatprep.subr.bf16.mxu1 %v9360_v31  ;;  %v9427_v29 = vld [vmem:[#allocation8 + $0x580] ss:$16 sps:$4 sm:$0xff]   ;;  %v9438_v32 = vld [vmem:[#allocation8 + $0x7a4] ss:$16 sps:$4 sm:$0xff]  }
 0x19f   : > { %v9430_v31 = vld [vmem:[#allocation8 + $0x780] ss:$16 sps:$4 sm:$0xff]  }
 0x1a0   : > { %2289 = vmatmul.mubr.bf16.vlgmr.msra.gmra.mrb[4].mxu0 %v10661_v23  ;;  %2371 = vmatmul.mubr.bf16.vlgmr.msra.gmra.mrb[4].mxu1 %v10661_v23 }
 0x1a1   : > { %3188 = vmatpush1.bf16.msra.mxu0 %v9355_v33  ;;  %3229 = vmatpush1.bf16.msra.mxu1 %v9358_v34  ;;  %v9433_v33 = vld [vmem:[#allocation8 + $0x5a0] ss:$16 sps:$4 sm:$0xff]   ;;  %v9441_v34 = vld [vmem:[#allocation8 + $0x5c4] ss:$16 sps:$4 sm:$0xff]  }
 0x1a2   : > { %3189 = vmatprep.subr.bf16.mxu0 %v9363_v35  ;;  %3230 = vmatprep.subr.bf16.mxu1 %v9366_v36  ;;  %v9436_v35 = vld [vmem:[#allocation8 + $0x7a0] ss:$16 sps:$4 sm:$0xff]   ;;  %v9444_v36 = vld [vmem:[#allocation8 + $0x7c4] ss:$16 sps:$4 sm:$0xff]  }
 0x1a5   : > { %3190 = vmatpush1.bf16.msra.mxu0 %v9361_v37  ;;  %3231 = vmatpush1.bf16.msra.mxu1 %v9364_v38  ;;  %v9439_v37 = vld [vmem:[#allocation8 + $0x5c0] ss:$16 sps:$4 sm:$0xff]   ;;  %v9447_v38 = vld [vmem:[#allocation8 + $0x5e4] ss:$16 sps:$4 sm:$0xff]  }
 0x1a6   : > { %3191 = vmatprep.subr.bf16.mxu0 %v9369_v39  ;;  %3232 = vmatprep.subr.bf16.mxu1 %v9372_v40  ;;  %v9442_v39 = vld [vmem:[#allocation8 + $0x7c0] ss:$16 sps:$4 sm:$0xff]   ;;  %v9450_v40 = vld [vmem:[#allocation8 + $0x7e4] ss:$16 sps:$4 sm:$0xff]  }
 0x1a9   : > { %3192 = vmatpush1.bf16.msra.mxu0 %v9367_v41  ;;  %3233 = vmatpush1.bf16.msra.mxu1 %v9370_v42  ;;  %v9445_v41 = vld [vmem:[#allocation8 + $0x5e0] ss:$16 sps:$4 sm:$0xff]  }
 0x1aa   : > { %3193 = vmatprep.subr.bf16.mxu0 %v9375_v43  ;;  %3234 = vmatprep.subr.bf16.mxu1 %v9378_v44  ;;  %v9448_v42 = vld [vmem:[#allocation8 + $0x7e0] ss:$16 sps:$4 sm:$0xff]   ;;  %v9453_v43 = vld [vmem:[#allocation8 + $0x40c] ss:$16 sps:$4 sm:$0xff]  }
 0x1ab   : > { %v9456_v44 = vld [vmem:[#allocation8 + $0x60c] ss:$16 sps:$4 sm:$0xff]  }
 0x1ad   : > { %3194 = vmatpush1.bf16.msra.mxu0 %v9373_v45  ;;  %3235 = vmatpush1.bf16.msra.mxu1 %v9376_v46  ;;  %v433_v45 = vlaneseq }
 0x1ae   : > { %3195 = vmatprep.subr.bf16.mxu0 %v9381_v47  ;;  %3236 = vmatprep.subr.bf16.mxu1 %v9384_v48  ;;  %v1553_v47 = vld [vmem:[#allocation7 + $0x4] sm:$0xf] }
 0x1af   : > { %v434_v46 = vshrl.u32 %v433_v45, 7 }
 0x1b1   : > { %3196 = vmatpush1.bf16.msra.mxu0 %v9379_v49  ;;  %3237 = vmatpush1.bf16.msra.mxu1 %v9382_v50  ;;  %v10681_v48 = vsub.s32 0, %v434_v46  ;;  %v10683_v49 = vsub.s32 2, %v434_v46  ;;  %v10685_v50 = vsub.s32 1, %v434_v46 }
 0x1b2   : > { %3197 = vmatprep.subr.bf16.mxu0 %v9387_v51  ;;  %3238 = vmatprep.subr.bf16.mxu1 %v9390_v52  ;;  %v10687_v51 = vsub.s32 3, %v434_v46 }
 0x1b3   : > { %v1558_v52 = vrot.slane %v1553_v47, %v10681_v48 }
 0x1b5   : > { %3198 = vmatpush1.bf16.msra.mxu0 %v9385_v53  ;;  %3239 = vmatpush1.bf16.msra.mxu1 %v9388_v54  ;;  %v1566_v53 = vrot.slane %v1553_v47, %v10683_v49  ;;  %v1562_v54 = vrot.slane %v1553_v47, %v10685_v50 }
 0x1b6   : > { %3199 = vmatprep.subr.bf16.mxu0 %v9393_v55  ;;  %3240 = vmatprep.subr.bf16.mxu1 %v9396_v56  ;;  %v1570_v55 = vrot.slane %v1553_v47, %v10687_v51 }
 0x1b9   : > { %3200 = vmatpush1.bf16.msra.mxu0 %v9391_v58  ;;  %3241 = vmatpush1.bf16.msra.mxu1 %v9394_v59 }
 0x1ba   : > { %3201 = vmatprep.subr.bf16.mxu0 %v9399_v60  ;;  %3242 = vmatprep.subr.bf16.mxu1 %v9402_v61 }
 0x1bd   : > { %3202 = vmatpush1.bf16.msra.mxu0 %v9397_v62  ;;  %3243 = vmatpush1.bf16.msra.mxu1 %v9400_v63 }
 0x1be   : > { %3203 = vmatprep.subr.bf16.mxu0 %v9405_v0  ;;  %3244 = vmatprep.subr.bf16.mxu1 %v9408_v1 }
 0x1c1   : > { %3204 = vmatpush1.bf16.msra.mxu0 %v9403_v2  ;;  %3245 = vmatpush1.bf16.msra.mxu1 %v9406_v3 }
 0x1c2   : > { %3205 = vmatprep.subr.bf16.mxu0 %v9411_v9  ;;  %3246 = vmatprep.subr.bf16.mxu1 %v9414_v10 }
 0x1c5   : > { %3206 = vmatpush1.bf16.msra.mxu0 %v9409_v14  ;;  %3247 = vmatpush1.bf16.msra.mxu1 %v9412_v16 }
 0x1c6   : > { %3207 = vmatprep.subr.bf16.mxu0 %v9417_v17  ;;  %3248 = vmatprep.subr.bf16.mxu1 %v9420_v18 }
 0x1c9   : > { %3208 = vmatpush1.bf16.msra.mxu0 %v9415_v19  ;;  %3249 = vmatpush1.bf16.msra.mxu1 %v9418_v20 }
 0x1ca   : > { %3209 = vmatprep.subr.bf16.mxu0 %v9423_v22  ;;  %3250 = vmatprep.subr.bf16.mxu1 %v9426_v26 }
 0x1cd   : > { %3210 = vmatpush1.bf16.msra.mxu0 %v9421_v21  ;;  %3251 = vmatpush1.bf16.msra.mxu1 %v9424_v25 }
 0x1ce   : > { %3211 = vmatprep.subr.bf16.mxu0 %v9429_v27  ;;  %3252 = vmatprep.subr.bf16.mxu1 %v9432_v28 }
 0x1d1   : > { %3212 = vmatpush1.bf16.msra.mxu0 %v9427_v29  ;;  %3253 = vmatpush1.bf16.msra.mxu1 %v9430_v31 }
 0x1d2   : > { %3213 = vmatprep.subr.bf16.mxu0 %v9435_v30  ;;  %3254 = vmatprep.subr.bf16.mxu1 %v9438_v32 }
 0x1d5   : > { %3214 = vmatpush1.bf16.msra.mxu0 %v9433_v33  ;;  %3255 = vmatpush1.bf16.msra.mxu1 %v9436_v35 }
 0x1d6   : > { %3215 = vmatprep.subr.bf16.mxu0 %v9441_v34  ;;  %3256 = vmatprep.subr.bf16.mxu1 %v9444_v36 }
 0x1d9   : > { %3216 = vmatpush1.bf16.msra.mxu0 %v9439_v37  ;;  %3257 = vmatpush1.bf16.msra.mxu1 %v9442_v39 }
 0x1da   : > { %3217 = vmatprep.subr.bf16.mxu0 %v9447_v38  ;;  %3258 = vmatprep.subr.bf16.mxu1 %v9450_v40 }
 0x1dd   : > { %3218 = vmatpush1.bf16.msra.mxu0 %v9445_v41  ;;  %3259 = vmatpush1.bf16.msra.mxu1 %v9448_v42 }
 0x1de   : > { %3269 = vmatprep.subr.bf16.mxu0 %v9453_v43  ;;  %3310 = vmatprep.subr.bf16.mxu1 %v9456_v44 }
 0x1f3   : > { %v10673_v4 = vpop.f32.mrb[0].mxu0  ;;  %v10675_v5 = vpop.f32.mrb[0].mxu1 }
 0x1f4   : > { %v10677_v6 = vpop.f32.mrb[1].mxu0  ;;  %v10679_v7 = vpop.f32.mrb[1].mxu1 }
 0x1f5   : > { %v1172_v8 = vpop.f32.mrb[2].mxu0  ;;  %v1254_v11 = vpop.f32.mrb[2].mxu1 }
 0x1f6   : > { %v1173_v13 = vpop.f32.mrb[3].mxu0  ;;  %v1255_v15 = vpop.f32.mrb[3].mxu1 }
 0x273   : > { %v2290_v56 = vpop.f32.mrb[4].mxu0  ;;  %v2372_v59 = vpop.f32.mrb[4].mxu1 }
 0x274   : > { %v9220_v58 = vadd.f32 %v2290_v56, %v1558_v52  ;;  %v2292_v60 = vpop.f32.mrb[5].mxu0  ;;  %v9222_v61 = vadd.f32 %v2372_v59, %v1566_v53  ;;  %v2374_v63 = vpop.f32.mrb[5].mxu1  ;;  %v9451_v52 = vld [vmem:[#allocation8 + $0x408] ss:$16 sps:$4 sm:$0xff]   ;;  %v9459_v59 = vld [vmem:[#allocation8 + $0x42c] ss:$16 sps:$4 sm:$0xff]  }
 0x275   : > { %v9221_v62 = vadd.f32 %v2292_v60, %v1562_v54  ;;  %v2294_v0 = vpop.f32.mrb[6].mxu0  ;;  %v9223_v2 = vadd.f32 %v2374_v63, %v1570_v55  ;;  %v2376_v3 = vpop.f32.mrb[6].mxu1  ;;  %v9454_v55 = vld [vmem:[#allocation8 + $0x608] ss:$16 sps:$4 sm:$0xff]   ;;  %v9462_v60 = vld [vmem:[#allocation8 + $0x62c] ss:$16 sps:$4 sm:$0xff]  }
 0x276   : > { %v2383_v1 = vmul.f32 0.044715, %v9220_v58  ;;  %v2295_v8 = vpop.f32.mrb[7].mxu0  ;;  %v2385_v9 = vmul.f32 0.044715, %v9222_v61  ;;  %v2377_v11 = vpop.f32.mrb[7].mxu1 }
 0x277   : > { %v2384_v10 = vmul.f32 0.044715, %v9221_v62  ;;  %v2386_v14 = vmul.f32 0.044715, %v9223_v2  ;;  %v2379_v34 = vmul.f32 0.5, %v9220_v58  ;;  %v2380_v37 = vmul.f32 0.5, %v9221_v62 }
 0x278   : > { %v2387_v13 = vmul.f32 %v9220_v58, %v2383_v1  ;;  %v2389_v15 = vmul.f32 %v9222_v61, %v2385_v9  ;;  %v2382_v40 = vmul.f32 0.5, %v9223_v2  ;;  %v2381_v44 = vmul.f32 0.5, %v9222_v61  ;;  %v9465_v63 = vld [vmem:[#allocation8 + $0x44c] ss:$16 sps:$4 sm:$0xff]   ;;  %v9463_v1 = vld [vmem:[#allocation8 + $0x448] ss:$16 sps:$4 sm:$0xff]  }
 0x279   : > { %v2388_v16 = vmul.f32 %v9221_v62, %v2384_v10  ;;  %v2390_v18 = vmul.f32 %v9223_v2, %v2386_v14  ;;  %v9468_v0 = vld [vmem:[#allocation8 + $0x64c] ss:$16 sps:$4 sm:$0xff]   ;;  %v9469_v9 = vld [vmem:[#allocation8 + $0x468] ss:$16 sps:$4 sm:$0xff]   ;;  %v10699_v14 = vld [vmem:[#allocation7] sm:$0xf] }
 0x27a   : > { %v2391_v17 = vmul.f32 %v9220_v58, %v2387_v13  ;;  %v2393_v19 = vmul.f32 %v9222_v61, %v2389_v15  ;;  %v9471_v3 = vld [vmem:[#allocation8 + $0x46c] ss:$16 sps:$4 sm:$0xff]   ;;  %v9472_v10 = vld [vmem:[#allocation8 + $0x668] ss:$16 sps:$4 sm:$0xff]  }
 0x27b   : > { %v2392_v20 = vmul.f32 %v9221_v62, %v2388_v16  ;;  %v2394_v22 = vmul.f32 %v9223_v2, %v2390_v18  ;;  %v9474_v8 = vld [vmem:[#allocation8 + $0x66c] ss:$16 sps:$4 sm:$0xff]   ;;  %v9475_v15 = vld [vmem:[#allocation8 + $0x488] ss:$16 sps:$4 sm:$0xff]   ;;  %v440_v18 = vrot.slane %v10699_v14, %v10685_v50 }
 0x27c   : > { %v2395_v21 = vadd.f32 %v9220_v58, %v2391_v17  ;;  %v2397_v25 = vadd.f32 %v9222_v61, %v2393_v19  ;;  %v9457_v61 = vld [vmem:[#allocation8 + $0x428] ss:$16 sps:$4 sm:$0xff]   ;;  %v9477_v11 = vld [vmem:[#allocation8 + $0x48c] ss:$16 sps:$4 sm:$0xff]  }
 0x27d   : > { %v2396_v26 = vadd.f32 %v9221_v62, %v2392_v20  ;;  %v2398_v27 = vadd.f32 %v9223_v2, %v2394_v22  ;;  %v9460_v62 = vld [vmem:[#allocation8 + $0x628] ss:$16 sps:$4 sm:$0xff]   ;;  %v9480_v13 = vld [vmem:[#allocation8 + $0x68c] ss:$16 sps:$4 sm:$0xff]   ;;  %v448_v20 = vrot.slane %v10699_v14, %v10687_v51 }
 0x27e   : > { %v2399_v28 = vmul.f32 0.7978846, %v2395_v21  ;;  %v2401_v30 = vmul.f32 0.7978846, %v2397_v25  ;;  %v9466_v2 = vld [vmem:[#allocation8 + $0x648] ss:$16 sps:$4 sm:$0xff]  }
 0x27f   : > { %v2400_v29 = vmul.f32 0.7978846, %v2396_v26  ;;  %v2402_v31 = vmul.f32 0.7978846, %v2398_v27  ;;  %v9478_v16 = vld [vmem:[#allocation8 + $0x688] ss:$16 sps:$4 sm:$0xff]   ;;  %v10706_v26 = vadd.f32 %v10677_v6, %v440_v18 }
 0x280   : > { %10123 = vtanh.f32 %v2399_v28  ;;  %v9483_v17 = vld [vmem:[#allocation8 + $0x4ac] ss:$16 sps:$4 sm:$0xff]   ;;  %v9481_v21 = vld [vmem:[#allocation8 + $0x4a8] ss:$16 sps:$4 sm:$0xff]   ;;  %v10709_v28 = vadd.f32 %v10679_v7, %v448_v20 }
 0x281   : > { %10125 = vtanh.f32 %v2400_v29  ;;  %v9486_v19 = vld [vmem:[#allocation8 + $0x6ac] ss:$16 sps:$4 sm:$0xff]   ;;  %v9484_v22 = vld [vmem:[#allocation8 + $0x6a8] ss:$16 sps:$4 sm:$0xff]  }
 0x282   : > { %10127 = vtanh.f32 %v2402_v31  ;;  %v9489_v25 = vld [vmem:[#allocation8 + $0x4cc] ss:$16 sps:$4 sm:$0xff]   ;;  %v9487_v29 = vld [vmem:[#allocation8 + $0x4c8] ss:$16 sps:$4 sm:$0xff]  }
 0x283   : > { %10129 = vtanh.f32 %v2401_v30  ;;  %v9492_v27 = vld [vmem:[#allocation8 + $0x6cc] ss:$16 sps:$4 sm:$0xff]   ;;  %v9490_v30 = vld [vmem:[#allocation8 + $0x6c8] ss:$16 sps:$4 sm:$0xff]  }
 0x284   : > { %v9495_v31 = vld [vmem:[#allocation8 + $0x4ec] ss:$16 sps:$4 sm:$0xff]   ;;  %v9493_v6 = vld [vmem:[#allocation8 + $0x4e8] ss:$16 sps:$4 sm:$0xff]  }
 0x28a   : > { %v10124_v32 = vpop.eup %10123 }
 0x28b   : > { %v10126_v33 = vpop.eup %10125  ;;  %v2407_v35 = vadd.f32 1.0, %v10124_v32  ;;  %v1262_v32 = vmul.f32 0.044715, %v10706_v26 }
 0x28c   : > { %v10128_v36 = vpop.eup %10127  ;;  %v2408_v38 = vadd.f32 1.0, %v10126_v33  ;;  %v9498_v33 = vld [vmem:[#allocation8 + $0x6ec] ss:$16 sps:$4 sm:$0xff]  }
 0x28d   : > { %v10130_v39 = vpop.eup %10129  ;;  %v2410_v41 = vadd.f32 1.0, %v10128_v36  ;;  %v2411_v42 = vmul.f32 %v2407_v35, %v2379_v34  ;;  %v1264_v34 = vmul.f32 0.044715, %v10709_v28  ;;  %v9496_v35 = vld [vmem:[#allocation8 + $0x6e8] ss:$16 sps:$4 sm:$0xff]   ;;  %v1266_v7 = vmul.f32 %v10706_v26, %v1262_v32 }
 0x28e   : > { %v2412_v43 = vmul.f32 %v2408_v38, %v2380_v37  ;;  %v2409_v45 = vadd.f32 1.0, %v10130_v39  ;;  %v9501_v36 = vld [vmem:[#allocation8 + $0x50c] ss:$16 sps:$4 sm:$0xff]   ;;  %v9499_v39 = vld [vmem:[#allocation8 + $0x508] ss:$16 sps:$4 sm:$0xff]  }
 0x28f   : > { %v2414_v46 = vmul.f32 %v2410_v41, %v2382_v40  ;;  %v10693_v56 = vpack.c.bf16 %v2411_v42, %v2411_v42  ;;  %v9504_v37 = vld [vmem:[#allocation8 + $0x70c] ss:$16 sps:$4 sm:$0xff]   ;;  %v1268_v38 = vmul.f32 %v10709_v28, %v1264_v34  ;;  %v9502_v40 = vld [vmem:[#allocation8 + $0x708] ss:$16 sps:$4 sm:$0xff]   ;;  %v9549_v32 = vld [vmem:[#allocation8 + $0x4] ss:$16 sps:$4 sm:$0xff]  }
 0x290   : > { %v2416_v47 = vpack.c.bf16 %v2412_v43, %v2412_v43  ;;  %v2413_v53 = vmul.f32 %v2409_v45, %v2381_v44  ;;  %v9507_v41 = vld [vmem:[#allocation8 + $0x52c] ss:$16 sps:$4 sm:$0xff]   ;;  %v1270_v43 = vmul.f32 %v10706_v26, %v1266_v7  ;;  %v9505_v45 = vld [vmem:[#allocation8 + $0x528] ss:$16 sps:$4 sm:$0xff]   ;;  %v9552_v34 = vld [vmem:[#allocation8 + $0x204] ss:$16 sps:$4 sm:$0xff]  }
 0x291   : > { %v2418_v54 = vpack.c.bf16 %v2414_v46, %v2414_v46  ;;  %v9510_v42 = vld [vmem:[#allocation8 + $0x72c] ss:$16 sps:$4 sm:$0xff]   ;;  %v1272_v44 = vmul.f32 %v10709_v28, %v1268_v38  ;;  %v9508_v46 = vld [vmem:[#allocation8 + $0x728] ss:$16 sps:$4 sm:$0xff]   ;;  %v9555_v38 = vld [vmem:[#allocation8 + $0x24] ss:$16 sps:$4 sm:$0xff]  }
 0x292   : > { %3219 = vmatprep.mubr.bf16.mxu0 %v2416_v47  ;;  %v10695_v58 = vpack.c.bf16 %v2413_v53, %v2413_v53  ;;  %v1274_v53 = vadd.f32 %v10706_v26, %v1270_v43  ;;  %v9564_v43 = vld [vmem:[#allocation8 + $0x244] ss:$16 sps:$4 sm:$0xff]  }
 0x293   : > { %3260 = vmatprep.mubr.bf16.mxu1 %v2418_v54  ;;  %3220 = vmatmul.mubr.bf16.vlgmr.msra.gmra.mrb[8].mxu0 %v10693_v56 }
 0x294   : > { %3261 = vmatmul.mubr.bf16.vlgmr.msra.gmra.mrb[8].mxu1 %v10695_v58  ;;  %3270 = vmatpush1.bf16.msra.mxu0 %v9451_v52  ;;  %v9516_v52 = vld [vmem:[#allocation8 + $0x74c] ss:$16 sps:$4 sm:$0xff]  }
 0x295   : > { %3311 = vmatpush1.bf16.msra.mxu1 %v9454_v55  ;;  %3301 = vmatprep.mubr.bf16.mxu0 %v2416_v47  ;;  %v9513_v47 = vld [vmem:[#allocation8 + $0x54c] ss:$16 sps:$4 sm:$0xff]   ;;  %v9511_v55 = vld [vmem:[#allocation8 + $0x548] ss:$16 sps:$4 sm:$0xff]  }
 0x296   : > { %3342 = vmatprep.mubr.bf16.mxu1 %v2418_v54  ;;  %3271 = vmatprep.subr.bf16.mxu0 %v9459_v59  ;;  %v1276_v54 = vadd.f32 %v10709_v28, %v1272_v44  ;;  %v9514_v59 = vld [vmem:[#allocation8 + $0x748] ss:$16 sps:$4 sm:$0xff]   ;;  %v9562_v44 = vld [vmem:[#allocation8 + $0x240] ss:$16 sps:$4 sm:$0xff]  }
 0x297   : > { %3312 = vmatprep.subr.bf16.mxu1 %v9462_v60  ;;  %v9519_v60 = vld [vmem:[#allocation8 + $0x56c] ss:$16 sps:$4 sm:$0xff]  }
 0x298   : > { %3272 = vmatpush1.bf16.msra.mxu0 %v9457_v61  ;;  %v9522_v61 = vld [vmem:[#allocation8 + $0x76c] ss:$16 sps:$4 sm:$0xff]  }
 0x299   : > { %3313 = vmatpush1.bf16.msra.mxu1 %v9460_v62  ;;  %3273 = vmatprep.subr.bf16.mxu0 %v9465_v63  ;;  %v1278_v62 = vmul.f32 0.7978846, %v1274_v53  ;;  %v1280_v63 = vmul.f32 0.7978846, %v1276_v54  ;;  %v9576_v53 = vld [vmem:[#allocation8 + $0x284] ss:$16 sps:$4 sm:$0xff]   ;;  %v436_v54 = vrot.slane %v10699_v14, %v10681_v48 }
 0x29a   : > { %3314 = vmatprep.subr.bf16.mxu1 %v9468_v0  ;;  %v9517_v0 = vld [vmem:[#allocation8 + $0x568] ss:$16 sps:$4 sm:$0xff]  }
 0x29b   : > { %10131 = vtanh.f32 %v1278_v62  ;;  %v9582_v62 = vld [vmem:[#allocation8 + $0x2a4] ss:$16 sps:$4 sm:$0xff]  }
 0x29c   : > { %3274 = vmatpush1.bf16.msra.mxu0 %v9463_v1  ;;  %v9520_v1 = vld [vmem:[#allocation8 + $0x768] ss:$16 sps:$4 sm:$0xff]   ;;  %10133 = vtanh.f32 %v1280_v63  ;;  %v10734_v63 = vadd.f32 %v10673_v4, %v436_v54  ;;  %v9586_v4 = vld [vmem:[#allocation8 + $0x2c0] ss:$16 sps:$4 sm:$0xff]   ;;  %v9636_v54 = vld [vmem:[#allocation8 + $0x3c4] ss:$16 sps:$4 sm:$0xff]  }
 0x29d   : > { %3315 = vmatpush1.bf16.msra.mxu1 %v9466_v2  ;;  %3275 = vmatprep.subr.bf16.mxu0 %v9471_v3  ;;  %v9525_v2 = vld [vmem:[#allocation8 + $0x58c] ss:$16 sps:$4 sm:$0xff]  }
 0x29e   : > { %3316 = vmatprep.subr.bf16.mxu1 %v9474_v8  ;;  %v9528_v3 = vld [vmem:[#allocation8 + $0x78c] ss:$16 sps:$4 sm:$0xff]   ;;  %v9523_v8 = vld [vmem:[#allocation8 + $0x588] ss:$16 sps:$4 sm:$0xff]  }
 0x2a0   : > { %3276 = vmatpush1.bf16.msra.mxu0 %v9469_v9  ;;  %v9526_v9 = vld [vmem:[#allocation8 + $0x788] ss:$16 sps:$4 sm:$0xff]  }
 0x2a1   : > { %3317 = vmatpush1.bf16.msra.mxu1 %v9472_v10  ;;  %3277 = vmatprep.subr.bf16.mxu0 %v9477_v11  ;;  %v9531_v10 = vld [vmem:[#allocation8 + $0x5ac] ss:$16 sps:$4 sm:$0xff]  }
 0x2a2   : > { %3318 = vmatprep.subr.bf16.mxu1 %v9480_v13  ;;  %v9534_v11 = vld [vmem:[#allocation8 + $0x7ac] ss:$16 sps:$4 sm:$0xff]   ;;  %v9529_v13 = vld [vmem:[#allocation8 + $0x5a8] ss:$16 sps:$4 sm:$0xff]  }
 0x2a4   : > { %3278 = vmatpush1.bf16.msra.mxu0 %v9475_v15  ;;  %v9532_v15 = vld [vmem:[#allocation8 + $0x7a8] ss:$16 sps:$4 sm:$0xff]  }
 0x2a5   : > { %3319 = vmatpush1.bf16.msra.mxu1 %v9478_v16  ;;  %3279 = vmatprep.subr.bf16.mxu0 %v9483_v17  ;;  %v9537_v16 = vld [vmem:[#allocation8 + $0x5cc] ss:$16 sps:$4 sm:$0xff]   ;;  %v10132_v18 = vpop.eup %10131 }
 0x2a6   : > { %3320 = vmatprep.subr.bf16.mxu1 %v9486_v19  ;;  %v9540_v17 = vld [vmem:[#allocation8 + $0x7cc] ss:$16 sps:$4 sm:$0xff]   ;;  %v9535_v19 = vld [vmem:[#allocation8 + $0x5c8] ss:$16 sps:$4 sm:$0xff]   ;;  %v10134_v20 = vpop.eup %10133 }
 0x2a8   : > { %3280 = vmatpush1.bf16.msra.mxu0 %v9481_v21  ;;  %v9538_v21 = vld [vmem:[#allocation8 + $0x7c8] ss:$16 sps:$4 sm:$0xff]  }
 0x2a9   : > { %3321 = vmatpush1.bf16.msra.mxu1 %v9484_v22  ;;  %3281 = vmatprep.subr.bf16.mxu0 %v9489_v25  ;;  %v9543_v22 = vld [vmem:[#allocation8 + $0x5ec] ss:$16 sps:$4 sm:$0xff]  }
 0x2aa   : > { %3322 = vmatprep.subr.bf16.mxu1 %v9492_v27  ;;  %v9546_v25 = vld [vmem:[#allocation8 + $0x7ec] ss:$16 sps:$4 sm:$0xff]   ;;  %v1286_v27 = vadd.f32 1.0, %v10132_v18  ;;  %v9597_v18 = vld [vmem:[#allocation8 + $0x104] ss:$16 sps:$4 sm:$0xff]  }
 0x2ac   : > { %3282 = vmatpush1.bf16.msra.mxu0 %v9487_v29  ;;  %v9541_v29 = vld [vmem:[#allocation8 + $0x5e8] ss:$16 sps:$4 sm:$0xff]  }
 0x2ad   : > { %3323 = vmatpush1.bf16.msra.mxu1 %v9490_v30  ;;  %3283 = vmatprep.subr.bf16.mxu0 %v9495_v31  ;;  %v1288_v30 = vadd.f32 1.0, %v10134_v20  ;;  %v9544_v31 = vld [vmem:[#allocation8 + $0x7e8] ss:$16 sps:$4 sm:$0xff]  }
 0x2ae   : > { %3324 = vmatprep.subr.bf16.mxu1 %v9498_v33  ;;  %v1258_v33 = vmul.f32 0.5, %v10706_v26 }
 0x2b0   : > { %3284 = vmatpush1.bf16.msra.mxu0 %v9493_v6  ;;  %v1260_v6 = vmul.f32 0.5, %v10709_v28  ;;  %v9553_v28 = vld [vmem:[#allocation8 + $0x20] ss:$16 sps:$4 sm:$0xff]  }
 0x2b1   : > { %3325 = vmatpush1.bf16.msra.mxu1 %v9496_v35  ;;  %3285 = vmatprep.subr.bf16.mxu0 %v9501_v36  ;;  %v1290_v35 = vmul.f32 %v1286_v27, %v1258_v33  ;;  %v9547_v36 = vld [vmem:[#allocation8] ss:$16 sps:$4 sm:$0xff]   ;;  %v9603_v27 = vld [vmem:[#allocation8 + $0x124] ss:$16 sps:$4 sm:$0xff]  }
 0x2b2   : > { %3326 = vmatprep.subr.bf16.mxu1 %v9504_v37  ;;  %v1292_v7 = vmul.f32 %v1288_v30, %v1260_v6  ;;  %v9550_v37 = vld [vmem:[#allocation8 + $0x200] ss:$16 sps:$4 sm:$0xff]   ;;  %v9612_v6 = vld [vmem:[#allocation8 + $0x344] ss:$16 sps:$4 sm:$0xff]  }
 0x2b3   : > { %v9604_v33 = vld [vmem:[#allocation8 + $0x320] ss:$16 sps:$4 sm:$0xff]  }
 0x2b4   : > { %3286 = vmatpush1.bf16.msra.mxu0 %v9499_v39  ;;  %v10722_v39 = vpack.c.bf16 %v1290_v35, %v1290_v35  ;;  %v10725_v26 = vpack.c.bf16 %v1292_v7, %v1292_v7  ;;  %v9607_v35 = vld [vmem:[#allocation8 + $0x140] ss:$16 sps:$4 sm:$0xff]  }
 0x2b5   : > { %3327 = vmatpush1.bf16.msra.mxu1 %v9502_v40  ;;  %3287 = vmatprep.subr.bf16.mxu0 %v9507_v41  ;;  %v9558_v40 = vld [vmem:[#allocation8 + $0x224] ss:$16 sps:$4 sm:$0xff]   ;;  %v9556_v41 = vld [vmem:[#allocation8 + $0x220] ss:$16 sps:$4 sm:$0xff]  }
 0x2b6   : > { %3328 = vmatprep.subr.bf16.mxu1 %v9510_v42  ;;  %v9561_v42 = vld [vmem:[#allocation8 + $0x44] ss:$16 sps:$4 sm:$0xff]   ;;  %v9610_v7 = vld [vmem:[#allocation8 + $0x340] ss:$16 sps:$4 sm:$0xff]  }
 0x2b8   : > { %3288 = vmatpush1.bf16.msra.mxu0 %v9505_v45  ;;  %v9570_v45 = vld [vmem:[#allocation8 + $0x264] ss:$16 sps:$4 sm:$0xff]  }
 0x2b9   : > { %3329 = vmatpush1.bf16.msra.mxu1 %v9508_v46  ;;  %3289 = vmatprep.subr.bf16.mxu0 %v9513_v47  ;;  %v9565_v46 = vld [vmem:[#allocation8 + $0x60] ss:$16 sps:$4 sm:$0xff]  }
 0x2ba   : > { %3330 = vmatprep.subr.bf16.mxu1 %v9516_v52  ;;  %v9568_v47 = vld [vmem:[#allocation8 + $0x260] ss:$16 sps:$4 sm:$0xff]   ;;  %v9573_v52 = vld [vmem:[#allocation8 + $0x84] ss:$16 sps:$4 sm:$0xff]  }
 0x2bc   : > { %3290 = vmatpush1.bf16.msra.mxu0 %v9511_v55  ;;  %v9571_v55 = vld [vmem:[#allocation8 + $0x80] ss:$16 sps:$4 sm:$0xff]  }
 0x2bd   : > { %3331 = vmatpush1.bf16.msra.mxu1 %v9514_v59  ;;  %3291 = vmatprep.subr.bf16.mxu0 %v9519_v60  ;;  %v444_v59 = vrot.slane %v10699_v14, %v10683_v49  ;;  %v9574_v60 = vld [vmem:[#allocation8 + $0x280] ss:$16 sps:$4 sm:$0xff]   ;;  %v9588_v14 = vld [vmem:[#allocation8 + $0x2c4] ss:$16 sps:$4 sm:$0xff]  }
 0x2be   : > { %3332 = vmatprep.subr.bf16.mxu1 %v9522_v61  ;;  %v9579_v61 = vld [vmem:[#allocation8 + $0xa4] ss:$16 sps:$4 sm:$0xff]  }
 0x2c0   : > { %3292 = vmatpush1.bf16.msra.mxu0 %v9517_v0  ;;  %v9577_v0 = vld [vmem:[#allocation8 + $0xa0] ss:$16 sps:$4 sm:$0xff]  }
 0x2c1   : > { %3333 = vmatpush1.bf16.msra.mxu1 %v9520_v1  ;;  %3293 = vmatprep.subr.bf16.mxu0 %v9525_v2  ;;  %v10737_v1 = vadd.f32 %v10675_v5, %v444_v59  ;;  %v9580_v2 = vld [vmem:[#allocation8 + $0x2a0] ss:$16 sps:$4 sm:$0xff]  }
 0x2c2   : > { %3334 = vmatprep.subr.bf16.mxu1 %v9528_v3  ;;  %v9585_v3 = vld [vmem:[#allocation8 + $0xc4] ss:$16 sps:$4 sm:$0xff]   ;;  %v9631_v59 = vld [vmem:[#allocation8 + $0x1c0] ss:$16 sps:$4 sm:$0xff]  }
 0x2c4   : > { %3294 = vmatpush1.bf16.msra.mxu0 %v9523_v8  ;;  %v1261_v8 = vmul.f32 0.044715, %v10734_v63 }
 0x2c5   : > { %3335 = vmatpush1.bf16.msra.mxu1 %v9526_v9  ;;  %3295 = vmatprep.subr.bf16.mxu0 %v9531_v10  ;;  %v9583_v9 = vld [vmem:[#allocation8 + $0xc0] ss:$16 sps:$4 sm:$0xff]   ;;  %v1263_v10 = vmul.f32 0.044715, %v10737_v1 }
 0x2c6   : > { %3336 = vmatprep.subr.bf16.mxu1 %v9534_v11  ;;  %v9591_v11 = vld [vmem:[#allocation8 + $0xe4] ss:$16 sps:$4 sm:$0xff]   ;;  %v1265_v5 = vmul.f32 %v10734_v63, %v1261_v8  ;;  %v1259_v8 = vmul.f32 0.5, %v10737_v1 }
 0x2c8   : > { %3296 = vmatpush1.bf16.msra.mxu0 %v9529_v13  ;;  %v9594_v13 = vld [vmem:[#allocation8 + $0x2e4] ss:$16 sps:$4 sm:$0xff]   ;;  %v1269_v20 = vmul.f32 %v10734_v63, %v1265_v5  ;;  %v9643_v5 = vld [vmem:[#allocation8 + $0x8] ss:$16 sps:$4 sm:$0xff]  }
 0x2c9   : > { %3337 = vmatpush1.bf16.msra.mxu1 %v9532_v15  ;;  %3297 = vmatprep.subr.bf16.mxu0 %v9537_v16  ;;  %v9589_v15 = vld [vmem:[#allocation8 + $0xe0] ss:$16 sps:$4 sm:$0xff]   ;;  %v1267_v16 = vmul.f32 %v10737_v1, %v1263_v10 }
 0x2ca   : > { %3338 = vmatprep.subr.bf16.mxu1 %v9540_v17  ;;  %v9592_v17 = vld [vmem:[#allocation8 + $0x2e0] ss:$16 sps:$4 sm:$0xff]   ;;  %v1273_v30 = vadd.f32 %v10734_v63, %v1269_v20  ;;  %v9657_v20 = vld [vmem:[#allocation8 + $0x4c] ss:$16 sps:$4 sm:$0xff]  }
 0x2cc   : > { %3298 = vmatpush1.bf16.msra.mxu0 %v9535_v19  ;;  %v9600_v19 = vld [vmem:[#allocation8 + $0x304] ss:$16 sps:$4 sm:$0xff]  }
 0x2cd   : > { %3339 = vmatpush1.bf16.msra.mxu1 %v9538_v21  ;;  %3299 = vmatprep.subr.bf16.mxu0 %v9543_v22  ;;  %v9595_v21 = vld [vmem:[#allocation8 + $0x100] ss:$16 sps:$4 sm:$0xff]   ;;  %v1271_v22 = vmul.f32 %v10737_v1, %v1267_v16  ;;  %v9646_v16 = vld [vmem:[#allocation8 + $0x208] ss:$16 sps:$4 sm:$0xff]  }
 0x2ce   : > { %3340 = vmatprep.subr.bf16.mxu1 %v9546_v25  ;;  %v9598_v25 = vld [vmem:[#allocation8 + $0x300] ss:$16 sps:$4 sm:$0xff]  }
 0x2d0   : > { %3300 = vmatpush1.bf16.msra.mxu0 %v9541_v29  ;;  %v9606_v29 = vld [vmem:[#allocation8 + $0x324] ss:$16 sps:$4 sm:$0xff]  }
 0x2d1   : > { %3341 = vmatpush1.bf16.msra.mxu1 %v9544_v31  ;;  %3991 = vmatprep.subr.bf16.mxu0 %v9549_v32  ;;  %v9601_v31 = vld [vmem:[#allocation8 + $0x120] ss:$16 sps:$4 sm:$0xff]   ;;  %v1275_v32 = vadd.f32 %v10737_v1, %v1271_v22  ;;  %v9654_v1 = vld [vmem:[#allocation8 + $0x22c] ss:$16 sps:$4 sm:$0xff]   ;;  %v9655_v22 = vld [vmem:[#allocation8 + $0x48] ss:$16 sps:$4 sm:$0xff]  }
 0x2d2   : > { %4032 = vmatprep.subr.bf16.mxu1 %v9552_v34  ;;  %v9609_v34 = vld [vmem:[#allocation8 + $0x144] ss:$16 sps:$4 sm:$0xff]  }
 0x2d3   : > { %3302 = vmatmul.mubr.bf16.vlgmr.msra.gmra.mrb[12].mxu0 %v10693_v56  ;;  %v9559_v56 = vld [vmem:[#allocation8 + $0x40] ss:$16 sps:$4 sm:$0xff]  }
 0x2d4   : > { %3343 = vmatmul.mubr.bf16.vlgmr.msra.gmra.mrb[12].mxu1 %v10695_v58  ;;  %3992 = vmatpush1.bf16.msra.mxu0 %v9547_v36  ;;  %v9567_v58 = vld [vmem:[#allocation8 + $0x64] ss:$16 sps:$4 sm:$0xff]   ;;  %v1277_v36 = vmul.f32 0.7978846, %v1273_v30  ;;  %v9661_v30 = vld [vmem:[#allocation8 + $0x68] ss:$16 sps:$4 sm:$0xff]  }
 0x2d5   : > { %4023 = vmatprep.mubr.bf16.mxu0 %v10722_v39  ;;  %4033 = vmatpush1.bf16.msra.mxu1 %v9550_v37  ;;  %v9615_v37 = vld [vmem:[#allocation8 + $0x164] ss:$16 sps:$4 sm:$0xff]  }
 0x2d6   : > { %4064 = vmatprep.mubr.bf16.mxu1 %v10725_v26  ;;  %3993 = vmatprep.subr.bf16.mxu0 %v9555_v38  ;;  %v1279_v38 = vmul.f32 0.7978846, %v1275_v32  ;;  %10135 = vtanh.f32 %v1277_v36  ;;  %v9672_v32 = vld [vmem:[#allocation8 + $0x28c] ss:$16 sps:$4 sm:$0xff]   ;;  %v9676_v36 = vld [vmem:[#allocation8 + $0x2a8] ss:$16 sps:$4 sm:$0xff]  }
 0x2d7   : > { %4034 = vmatprep.subr.bf16.mxu1 %v9558_v40  ;;  %v9618_v40 = vld [vmem:[#allocation8 + $0x364] ss:$16 sps:$4 sm:$0xff]  }
 0x2d8   : > { %3994 = vmatpush1.bf16.msra.mxu0 %v9553_v28  ;;  %v9613_v28 = vld [vmem:[#allocation8 + $0x160] ss:$16 sps:$4 sm:$0xff]   ;;  %10137 = vtanh.f32 %v1279_v38  ;;  %v9679_v38 = vld [vmem:[#allocation8 + $0xc8] ss:$16 sps:$4 sm:$0xff]  }
 0x2d9   : > { %4035 = vmatpush1.bf16.msra.mxu1 %v9556_v41  ;;  %3995 = vmatprep.subr.bf16.mxu0 %v9561_v42  ;;  %v9616_v41 = vld [vmem:[#allocation8 + $0x360] ss:$16 sps:$4 sm:$0xff]   ;;  %v9621_v42 = vld [vmem:[#allocation8 + $0x184] ss:$16 sps:$4 sm:$0xff]  }
 0x2da   : > { %4036 = vmatprep.subr.bf16.mxu1 %v9564_v43  ;;  %v9624_v43 = vld [vmem:[#allocation8 + $0x384] ss:$16 sps:$4 sm:$0xff]  }
 0x2dc   : > { %3996 = vmatpush1.bf16.msra.mxu0 %v9559_v56  ;;  %v9619_v56 = vld [vmem:[#allocation8 + $0x180] ss:$16 sps:$4 sm:$0xff]  }
 0x2dd   : > { %4037 = vmatpush1.bf16.msra.mxu1 %v9562_v44  ;;  %3997 = vmatprep.subr.bf16.mxu0 %v9567_v58  ;;  %v9622_v44 = vld [vmem:[#allocation8 + $0x380] ss:$16 sps:$4 sm:$0xff]   ;;  %v9627_v58 = vld [vmem:[#allocation8 + $0x1a4] ss:$16 sps:$4 sm:$0xff]  }
 0x2de   : > { %4038 = vmatprep.subr.bf16.mxu1 %v9570_v45  ;;  %v9630_v45 = vld [vmem:[#allocation8 + $0x3a4] ss:$16 sps:$4 sm:$0xff]  }
 0x2e0   : > { %3998 = vmatpush1.bf16.msra.mxu0 %v9565_v46  ;;  %v9625_v46 = vld [vmem:[#allocation8 + $0x1a0] ss:$16 sps:$4 sm:$0xff]  }
 0x2e1   : > { %4039 = vmatpush1.bf16.msra.mxu1 %v9568_v47  ;;  %3999 = vmatprep.subr.bf16.mxu0 %v9573_v52  ;;  %v9628_v47 = vld [vmem:[#allocation8 + $0x3a0] ss:$16 sps:$4 sm:$0xff]   ;;  %v9633_v52 = vld [vmem:[#allocation8 + $0x1c4] ss:$16 sps:$4 sm:$0xff]  }
 0x2e2   : > { %4040 = vmatprep.subr.bf16.mxu1 %v9576_v53  ;;  %v10136_v53 = vpop.eup %10135 }
 0x2e4   : > { %4000 = vmatpush1.bf16.msra.mxu0 %v9571_v55  ;;  %v10138_v55 = vpop.eup %10137 }
 0x2e5   : > { %4041 = vmatpush1.bf16.msra.mxu1 %v9574_v60  ;;  %4001 = vmatprep.subr.bf16.mxu0 %v9579_v61  ;;  %v9634_v60 = vld [vmem:[#allocation8 + $0x3c0] ss:$16 sps:$4 sm:$0xff]   ;;  %v9639_v61 = vld [vmem:[#allocation8 + $0x1e4] ss:$16 sps:$4 sm:$0xff]  }
 0x2e6   : > { %4042 = vmatprep.subr.bf16.mxu1 %v9582_v62  ;;  %v1285_v62 = vadd.f32 1.0, %v10136_v53  ;;  %v9700_v53 = vld [vmem:[#allocation8 + $0x328] ss:$16 sps:$4 sm:$0xff]  }
 0x2e8   : > { %4002 = vmatpush1.bf16.msra.mxu0 %v9577_v0  ;;  %v9642_v0 = vld [vmem:[#allocation8 + $0x3e4] ss:$16 sps:$4 sm:$0xff]  }
 0x2e9   : > { %4043 = vmatpush1.bf16.msra.mxu1 %v9580_v2  ;;  %4003 = vmatprep.subr.bf16.mxu0 %v9585_v3  ;;  %v1287_v2 = vadd.f32 1.0, %v10138_v55  ;;  %v1257_v3 = vmul.f32 0.5, %v10734_v63  ;;  %v9708_v55 = vld [vmem:[#allocation8 + $0x34c] ss:$16 sps:$4 sm:$0xff]  }
 0x2ea   : > { %4044 = vmatprep.subr.bf16.mxu1 %v9588_v14  ;;  %v9637_v14 = vld [vmem:[#allocation8 + $0x1e0] ss:$16 sps:$4 sm:$0xff]  }
 0x2eb   : > { %v1289_v10 = vmul.f32 %v1285_v62, %v1257_v3  ;;  %v9714_v62 = vld [vmem:[#allocation8 + $0x36c] ss:$16 sps:$4 sm:$0xff]  }
 0x2ec   : > { %4004 = vmatpush1.bf16.msra.mxu0 %v9583_v9  ;;  %v9640_v9 = vld [vmem:[#allocation8 + $0x3e0] ss:$16 sps:$4 sm:$0xff]   ;;  %v9717_v3 = vld [vmem:[#allocation8 + $0x18c] ss:$16 sps:$4 sm:$0xff]  }
 0x2ed   : > { %4045 = vmatpush1.bf16.msra.mxu1 %v9586_v4  ;;  %4005 = vmatprep.subr.bf16.mxu0 %v9591_v11  ;;  %v9645_v4 = vld [vmem:[#allocation8 + $0xc] ss:$16 sps:$4 sm:$0xff]   ;;  %v1291_v11 = vmul.f32 %v1287_v2, %v1259_v8  ;;  %v9712_v2 = vld [vmem:[#allocation8 + $0x368] ss:$16 sps:$4 sm:$0xff]  }
 0x2ee   : > { %4046 = vmatprep.subr.bf16.mxu1 %v9594_v13  ;;  %v9648_v13 = vld [vmem:[#allocation8 + $0x20c] ss:$16 sps:$4 sm:$0xff]   ;;  %v9715_v8 = vld [vmem:[#allocation8 + $0x188] ss:$16 sps:$4 sm:$0xff]  }
 0x2ef   : > { %v10751_v63 = vpack.c.bf16 %v1291_v11, %v1291_v11  ;;  %v9721_v11 = vld [vmem:[#allocation8 + $0x1a8] ss:$16 sps:$4 sm:$0xff]  }
 0x2f0   : > { %4006 = vmatpush1.bf16.msra.mxu0 %v9589_v15  ;;  %v10749_v15 = vpack.c.bf16 %v1289_v10, %v1289_v10  ;;  %v9723_v10 = vld [vmem:[#allocation8 + $0x1ac] ss:$16 sps:$4 sm:$0xff]  }
 0x2f1   : > { %4047 = vmatpush1.bf16.msra.mxu1 %v9592_v17  ;;  %4007 = vmatprep.subr.bf16.mxu0 %v9597_v18  ;;  %v9651_v17 = vld [vmem:[#allocation8 + $0x2c] ss:$16 sps:$4 sm:$0xff]   ;;  %v9649_v18 = vld [vmem:[#allocation8 + $0x28] ss:$16 sps:$4 sm:$0xff]  }
 0x2f2   : > { %4048 = vmatprep.subr.bf16.mxu1 %v9600_v19  ;;  %v9652_v19 = vld [vmem:[#allocation8 + $0x228] ss:$16 sps:$4 sm:$0xff]  }
 0x2f4   : > { %4008 = vmatpush1.bf16.msra.mxu0 %v9595_v21  ;;  %v9660_v21 = vld [vmem:[#allocation8 + $0x24c] ss:$16 sps:$4 sm:$0xff]  }
 0x2f5   : > { %4049 = vmatpush1.bf16.msra.mxu1 %v9598_v25  ;;  %4009 = vmatprep.subr.bf16.mxu0 %v9603_v27  ;;  %v9658_v25 = vld [vmem:[#allocation8 + $0x248] ss:$16 sps:$4 sm:$0xff]   ;;  %v9663_v27 = vld [vmem:[#allocation8 + $0x6c] ss:$16 sps:$4 sm:$0xff]  }
 0x2f6   : > { %4050 = vmatprep.subr.bf16.mxu1 %v9606_v29  ;;  %v9666_v29 = vld [vmem:[#allocation8 + $0x26c] ss:$16 sps:$4 sm:$0xff]  }
 0x2f8   : > { %4010 = vmatpush1.bf16.msra.mxu0 %v9601_v31  ;;  %v9669_v31 = vld [vmem:[#allocation8 + $0x8c] ss:$16 sps:$4 sm:$0xff]  }
 0x2f9   : > { %4051 = vmatpush1.bf16.msra.mxu1 %v9604_v33  ;;  %4011 = vmatprep.subr.bf16.mxu0 %v9609_v34  ;;  %v9670_v33 = vld [vmem:[#allocation8 + $0x288] ss:$16 sps:$4 sm:$0xff]   ;;  %v9675_v34 = vld [vmem:[#allocation8 + $0xac] ss:$16 sps:$4 sm:$0xff]  }
 0x2fa   : > { %4052 = vmatprep.subr.bf16.mxu1 %v9612_v6  ;;  %v9678_v6 = vld [vmem:[#allocation8 + $0x2ac] ss:$16 sps:$4 sm:$0xff]  }
 0x2fc   : > { %4012 = vmatpush1.bf16.msra.mxu0 %v9607_v35  ;;  %v9673_v35 = vld [vmem:[#allocation8 + $0xa8] ss:$16 sps:$4 sm:$0xff]  }
 0x2fd   : > { %4053 = vmatpush1.bf16.msra.mxu1 %v9610_v7  ;;  %4013 = vmatprep.subr.bf16.mxu0 %v9615_v37  ;;  %v9681_v7 = vld [vmem:[#allocation8 + $0xcc] ss:$16 sps:$4 sm:$0xff]  }
 0x2fe   : > { %4054 = vmatprep.subr.bf16.mxu1 %v9618_v40  ;;  %v9684_v37 = vld [vmem:[#allocation8 + $0x2cc] ss:$16 sps:$4 sm:$0xff]   ;;  %v9682_v40 = vld [vmem:[#allocation8 + $0x2c8] ss:$16 sps:$4 sm:$0xff]  }
 0x300   : > { %4014 = vmatpush1.bf16.msra.mxu0 %v9613_v28  ;;  %v9687_v28 = vld [vmem:[#allocation8 + $0xec] ss:$16 sps:$4 sm:$0xff]  }
 0x301   : > { %4055 = vmatpush1.bf16.msra.mxu1 %v9616_v41  ;;  %4015 = vmatprep.subr.bf16.mxu0 %v9621_v42  ;;  %v9690_v41 = vld [vmem:[#allocation8 + $0x2ec] ss:$16 sps:$4 sm:$0xff]   ;;  %v9685_v42 = vld [vmem:[#allocation8 + $0xe8] ss:$16 sps:$4 sm:$0xff]  }
 0x302   : > { %4056 = vmatprep.subr.bf16.mxu1 %v9624_v43  ;;  %v9688_v43 = vld [vmem:[#allocation8 + $0x2e8] ss:$16 sps:$4 sm:$0xff]  }
 0x304   : > { %4016 = vmatpush1.bf16.msra.mxu0 %v9619_v56  ;;  %v9693_v56 = vld [vmem:[#allocation8 + $0x10c] ss:$16 sps:$4 sm:$0xff]  }
 0x305   : > { %4057 = vmatpush1.bf16.msra.mxu1 %v9622_v44  ;;  %4017 = vmatprep.subr.bf16.mxu0 %v9627_v58  ;;  %v9696_v44 = vld [vmem:[#allocation8 + $0x30c] ss:$16 sps:$4 sm:$0xff]   ;;  %v9691_v58 = vld [vmem:[#allocation8 + $0x108] ss:$16 sps:$4 sm:$0xff]  }
 0x306   : > { %4058 = vmatprep.subr.bf16.mxu1 %v9630_v45  ;;  %v9694_v45 = vld [vmem:[#allocation8 + $0x308] ss:$16 sps:$4 sm:$0xff]  }
 0x308   : > { %4018 = vmatpush1.bf16.msra.mxu0 %v9625_v46  ;;  %v9699_v46 = vld [vmem:[#allocation8 + $0x12c] ss:$16 sps:$4 sm:$0xff]  }
 0x309   : > { %4059 = vmatpush1.bf16.msra.mxu1 %v9628_v47  ;;  %4019 = vmatprep.subr.bf16.mxu0 %v9633_v52  ;;  %v9702_v47 = vld [vmem:[#allocation8 + $0x32c] ss:$16 sps:$4 sm:$0xff]   ;;  %v9697_v52 = vld [vmem:[#allocation8 + $0x128] ss:$16 sps:$4 sm:$0xff]  }
 0x30a   : > { %4060 = vmatprep.subr.bf16.mxu1 %v9636_v54  ;;  %v9705_v54 = vld [vmem:[#allocation8 + $0x14c] ss:$16 sps:$4 sm:$0xff]  }
 0x30c   : > { %4020 = vmatpush1.bf16.msra.mxu0 %v9631_v59  ;;  %v9703_v59 = vld [vmem:[#allocation8 + $0x148] ss:$16 sps:$4 sm:$0xff]  }
 0x30d   : > { %4061 = vmatpush1.bf16.msra.mxu1 %v9634_v60  ;;  %4021 = vmatprep.subr.bf16.mxu0 %v9639_v61  ;;  %v9706_v60 = vld [vmem:[#allocation8 + $0x348] ss:$16 sps:$4 sm:$0xff]   ;;  %v9711_v61 = vld [vmem:[#allocation8 + $0x16c] ss:$16 sps:$4 sm:$0xff]  }
 0x30e   : > { %4062 = vmatprep.subr.bf16.mxu1 %v9642_v0  ;;  %v9709_v0 = vld [vmem:[#allocation8 + $0x168] ss:$16 sps:$4 sm:$0xff]  }
 0x310   : > { %4022 = vmatpush1.bf16.msra.mxu0 %v9637_v14  ;;  %v9720_v14 = vld [vmem:[#allocation8 + $0x38c] ss:$16 sps:$4 sm:$0xff]  }
 0x311   : > { %4063 = vmatpush1.bf16.msra.mxu1 %v9640_v9  ;;  %4073 = vmatprep.subr.bf16.mxu0 %v9645_v4  ;;  %v9718_v9 = vld [vmem:[#allocation8 + $0x388] ss:$16 sps:$4 sm:$0xff]   ;;  %v9726_v4 = vld [vmem:[#allocation8 + $0x3ac] ss:$16 sps:$4 sm:$0xff]  }
 0x312   : > { %4114 = vmatprep.subr.bf16.mxu1 %v9648_v13  ;;  %v9724_v13 = vld [vmem:[#allocation8 + $0x3a8] ss:$16 sps:$4 sm:$0xff]  }
 0x313   : > { %4024 = vmatmul.mubr.bf16.vlgmr.msra.gmra.mrb[16].mxu0 %v10749_v15 }
 0x314   : > { %4065 = vmatmul.mubr.bf16.vlgmr.msra.gmra.mrb[16].mxu1 %v10751_v63  ;;  %4074 = vmatpush1.bf16.msra.mxu0 %v9643_v5  ;;  %v9729_v5 = vld [vmem:[#allocation8 + $0x1cc] ss:$16 sps:$4 sm:$0xff]  }
 0x315   : > { %4105 = vmatprep.mubr.bf16.mxu0 %v10722_v39  ;;  %4115 = vmatpush1.bf16.msra.mxu1 %v9646_v16  ;;  %v9664_v39 = vld [vmem:[#allocation8 + $0x268] ss:$16 sps:$4 sm:$0xff]   ;;  %v9732_v16 = vld [vmem:[#allocation8 + $0x3cc] ss:$16 sps:$4 sm:$0xff]  }
 0x316   : > { %4146 = vmatprep.mubr.bf16.mxu1 %v10725_v26  ;;  %4075 = vmatprep.subr.bf16.mxu0 %v9651_v17  ;;  %v9667_v26 = vld [vmem:[#allocation8 + $0x88] ss:$16 sps:$4 sm:$0xff]  }
 0x317   : > { %4116 = vmatprep.subr.bf16.mxu1 %v9654_v1  ;;  %v9727_v17 = vld [vmem:[#allocation8 + $0x1c8] ss:$16 sps:$4 sm:$0xff]  }
 0x318   : > { %4076 = vmatpush1.bf16.msra.mxu0 %v9649_v18  ;;  %v9730_v1 = vld [vmem:[#allocation8 + $0x3c8] ss:$16 sps:$4 sm:$0xff]   ;;  %v9735_v18 = vld [vmem:[#allocation8 + $0x1ec] ss:$16 sps:$4 sm:$0xff]  }
 0x319   : > { %4117 = vmatpush1.bf16.msra.mxu1 %v9652_v19  ;;  %4077 = vmatprep.subr.bf16.mxu0 %v9657_v20  ;;  %v9738_v19 = vld [vmem:[#allocation8 + $0x3ec] ss:$16 sps:$4 sm:$0xff]   ;;  %v4155_v20 = vld [vmem:[#allocation5 + $0x20] sm:$0xff] }
 0x31a   : > { %4118 = vmatprep.subr.bf16.mxu1 %v9660_v21  ;;  %v4157_v21 = vld [vmem:[#allocation5 + $0x60] sm:$0xff] }
 0x31c   : > { %4078 = vmatpush1.bf16.msra.mxu0 %v9655_v22  ;;  %v4156_v22 = vld [vmem:[#allocation5 + $0x28] sm:$0xff] }
 0x31d   : > { %4119 = vmatpush1.bf16.msra.mxu1 %v9658_v25  ;;  %4079 = vmatprep.subr.bf16.mxu0 %v9663_v27  ;;  %v4158_v25 = vld [vmem:[#allocation5 + $0x68] sm:$0xff] }
 0x31e   : > { %4120 = vmatprep.subr.bf16.mxu1 %v9666_v29  ;;  %v9733_v27 = vld [vmem:[#allocation8 + $0x1e8] ss:$16 sps:$4 sm:$0xff]  }
 0x31f   : > { %v9736_v29 = vld [vmem:[#allocation8 + $0x3e8] ss:$16 sps:$4 sm:$0xff]  }
 0x320   : > { %4080 = vmatpush1.bf16.msra.mxu0 %v9661_v30  ;;  %v8698_v30 = vcombine.high %v4155_v20, %v4157_v21 }
 0x321   : > { %4121 = vmatpush1.bf16.msra.mxu1 %v9664_v39  ;;  %4081 = vmatprep.subr.bf16.mxu0 %v9669_v31  ;;  %v8700_v39 = vcombine.high %v4156_v22, %v4158_v25  ;;  %v4159_v31 = vld [vmem:[#allocation5 + $0xa0] sm:$0xff] }
 0x322   : > { %4122 = vmatprep.subr.bf16.mxu1 %v9672_v32  ;;  %v4161_v32 = vld [vmem:[#allocation5 + $0xe0] sm:$0xff] }
 0x324   : > { %4082 = vmatpush1.bf16.msra.mxu0 %v9667_v26  ;;  %v4160_v26 = vld [vmem:[#allocation5 + $0xa8] sm:$0xff] }
 0x325   : > { %4123 = vmatpush1.bf16.msra.mxu1 %v9670_v33  ;;  %4083 = vmatprep.subr.bf16.mxu0 %v9675_v34  ;;  %v4162_v33 = vld [vmem:[#allocation5 + $0xe8] sm:$0xff]  ;;  %v8697_v34 = vcombine.low %v4155_v20, %v4157_v21  ;;  %v4183_v21 = vld [vmem:[#allocation5 + $0x3a0] sm:$0xff] }
 0x326   : > { %4124 = vmatprep.subr.bf16.mxu1 %v9678_v6  ;;  %v8699_v6 = vcombine.low %v4156_v22, %v4158_v25  ;;  %v4185_v22 = vld [vmem:[#allocation5 + $0x3e0] sm:$0xff] }
 0x328   : > { %4084 = vmatpush1.bf16.msra.mxu0 %v9673_v35  ;;  %v8702_v35 = vcombine.high %v4159_v31, %v4161_v32 }
 0x329   : > { %4125 = vmatpush1.bf16.msra.mxu1 %v9676_v36  ;;  %4085 = vmatprep.subr.bf16.mxu0 %v9681_v7  ;;  %v8704_v36 = vcombine.high %v4160_v26, %v4162_v33  ;;  %v4163_v7 = vld [vmem:[#allocation5 + $0x120] sm:$0xff] }
 0x32a   : > { %4126 = vmatprep.subr.bf16.mxu1 %v9684_v37  ;;  %v4165_v37 = vld [vmem:[#allocation5 + $0x160] sm:$0xff] }
 0x32c   : > { %4086 = vmatpush1.bf16.msra.mxu0 %v9679_v38  ;;  %v4164_v38 = vld [vmem:[#allocation5 + $0x128] sm:$0xff] }
 0x32d   : > { %4127 = vmatpush1.bf16.msra.mxu1 %v9682_v40  ;;  %4087 = vmatprep.subr.bf16.mxu0 %v9687_v28  ;;  %v4166_v40 = vld [vmem:[#allocation5 + $0x168] sm:$0xff]  ;;  %v8701_v28 = vcombine.low %v4159_v31, %v4161_v32 }
 0x32e   : > { %4128 = vmatprep.subr.bf16.mxu1 %v9690_v41  ;;  %v8703_v41 = vcombine.low %v4160_v26, %v4162_v33 }
 0x330   : > { %4088 = vmatpush1.bf16.msra.mxu0 %v9685_v42  ;;  %v8706_v42 = vcombine.high %v4163_v7, %v4165_v37 }
 0x331   : > { %4129 = vmatpush1.bf16.msra.mxu1 %v9688_v43  ;;  %4089 = vmatprep.subr.bf16.mxu0 %v9693_v56  ;;  %v8708_v43 = vcombine.high %v4164_v38, %v4166_v40  ;;  %v4167_v56 = vld [vmem:[#allocation5 + $0x1a0] sm:$0xff] }
 0x332   : > { %4130 = vmatprep.subr.bf16.mxu1 %v9696_v44  ;;  %v4169_v44 = vld [vmem:[#allocation5 + $0x1e0] sm:$0xff] }
 0x334   : > { %4090 = vmatpush1.bf16.msra.mxu0 %v9691_v58  ;;  %v4168_v58 = vld [vmem:[#allocation5 + $0x1a8] sm:$0xff] }
 0x335   : > { %4131 = vmatpush1.bf16.msra.mxu1 %v9694_v45  ;;  %4091 = vmatprep.subr.bf16.mxu0 %v9699_v46  ;;  %v4170_v45 = vld [vmem:[#allocation5 + $0x1e8] sm:$0xff]  ;;  %v8710_v46 = vcombine.high %v4167_v56, %v4169_v44 }
 0x336   : > { %4132 = vmatprep.subr.bf16.mxu1 %v9702_v47  ;;  %v8712_v47 = vcombine.high %v4168_v58, %v4170_v45 }
 0x338   : > { %4092 = vmatpush1.bf16.msra.mxu0 %v9697_v52  ;;  %v4171_v52 = vld [vmem:[#allocation5 + $0x220] sm:$0xff] }
 0x339   : > { %4133 = vmatpush1.bf16.msra.mxu1 %v9700_v53  ;;  %4093 = vmatprep.subr.bf16.mxu0 %v9705_v54  ;;  %v4173_v53 = vld [vmem:[#allocation5 + $0x260] sm:$0xff]  ;;  %v4172_v54 = vld [vmem:[#allocation5 + $0x228] sm:$0xff] }
 0x33a   : > { %4134 = vmatprep.subr.bf16.mxu1 %v9708_v55  ;;  %v4174_v55 = vld [vmem:[#allocation5 + $0x268] sm:$0xff] }
 0x33c   : > { %4094 = vmatpush1.bf16.msra.mxu0 %v9703_v59  ;;  %v8709_v59 = vcombine.low %v4167_v56, %v4169_v44 }
 0x33d   : > { %4135 = vmatpush1.bf16.msra.mxu1 %v9706_v60  ;;  %4095 = vmatprep.subr.bf16.mxu0 %v9711_v61  ;;  %v8711_v60 = vcombine.low %v4168_v58, %v4170_v45  ;;  %v8714_v61 = vcombine.high %v4171_v52, %v4173_v53  ;;  %v4191_v58 = vld [vmem:[#allocation5 + $0x4a0] sm:$0xff] }
 0x33e   : > { %4136 = vmatprep.subr.bf16.mxu1 %v9714_v62  ;;  %v8716_v62 = vcombine.high %v4172_v54, %v4174_v55  ;;  %v4193_v45 = vld [vmem:[#allocation5 + $0x4e0] sm:$0xff] }
 0x340   : > { %4096 = vmatpush1.bf16.msra.mxu0 %v9709_v0  ;;  %v4175_v0 = vld [vmem:[#allocation5 + $0x2a0] sm:$0xff] }
 0x341   : > { %4137 = vmatpush1.bf16.msra.mxu1 %v9712_v2  ;;  %4097 = vmatprep.subr.bf16.mxu0 %v9717_v3  ;;  %v4177_v2 = vld [vmem:[#allocation5 + $0x2e0] sm:$0xff]  ;;  %v4176_v3 = vld [vmem:[#allocation5 + $0x2a8] sm:$0xff] }
 0x342   : > { %4138 = vmatprep.subr.bf16.mxu1 %v9720_v14  ;;  %v4178_v14 = vld [vmem:[#allocation5 + $0x2e8] sm:$0xff] }
 0x344   : > { %4098 = vmatpush1.bf16.msra.mxu0 %v9715_v8  ;;  %v8713_v8 = vcombine.low %v4171_v52, %v4173_v53  ;;  %v8734_v52 = vcombine.high %v4191_v58, %v4193_v45 }
 0x345   : > { %4139 = vmatpush1.bf16.msra.mxu1 %v9718_v9  ;;  %4099 = vmatprep.subr.bf16.mxu0 %v9723_v10  ;;  %v8715_v9 = vcombine.low %v4172_v54, %v4174_v55  ;;  %v8718_v10 = vcombine.high %v4175_v0, %v4177_v2  ;;  %v4195_v54 = vld [vmem:[#allocation5 + $0x520] sm:$0xff] }
 0x346   : > { %4140 = vmatprep.subr.bf16.mxu1 %v9726_v4  ;;  %v8720_v4 = vcombine.high %v4176_v3, %v4178_v14  ;;  %v4197_v55 = vld [vmem:[#allocation5 + $0x560] sm:$0xff] }
 0x348   : > { %4100 = vmatpush1.bf16.msra.mxu0 %v9721_v11  ;;  %v4179_v11 = vld [vmem:[#allocation5 + $0x320] sm:$0xff] }
 0x349   : > { %4141 = vmatpush1.bf16.msra.mxu1 %v9724_v13  ;;  %4101 = vmatprep.subr.bf16.mxu0 %v9729_v5  ;;  %v4181_v13 = vld [vmem:[#allocation5 + $0x360] sm:$0xff]  ;;  %v4180_v5 = vld [vmem:[#allocation5 + $0x328] sm:$0xff] }
 0x34a   : > { %4142 = vmatprep.subr.bf16.mxu1 %v9732_v16  ;;  %v4182_v16 = vld [vmem:[#allocation5 + $0x368] sm:$0xff]  ;;  %v8721_v26 = vcombine.low %v4179_v11, %v4181_v13 }
 0x34b   : > { %v8724_v20 = vcombine.high %v4180_v5, %v4182_v16 }
 0x34c   : > { %4102 = vmatpush1.bf16.msra.mxu0 %v9727_v17  ;;  %v8717_v17 = vcombine.low %v4175_v0, %v4177_v2  ;;  %v8738_v0 = vcombine.high %v4195_v54, %v4197_v55 }
 0x34d   : > { %4143 = vmatpush1.bf16.msra.mxu1 %v9730_v1  ;;  %4103 = vmatprep.subr.bf16.mxu0 %v9735_v18  ;;  %v8719_v1 = vcombine.low %v4176_v3, %v4178_v14  ;;  %v8722_v18 = vcombine.high %v4179_v11, %v4181_v13  ;;  %v4199_v3 = vld [vmem:[#allocation5 + $0x5a0] sm:$0xff] }
 0x34e   : > { %4144 = vmatprep.subr.bf16.mxu1 %v9738_v19  ;;  %v4201_v14 = vld [vmem:[#allocation5 + $0x5e0] sm:$0xff] }
 0x34f   : > { %v8742_v11 = vcombine.high %v4199_v3, %v4201_v14 }
 0x350   : > { %4104 = vmatpush1.bf16.msra.mxu0 %v9733_v27 }
 0x351   : > { %4145 = vmatpush1.bf16.msra.mxu1 %v9736_v29  ;;  %4945 = vmatprep.subr.bf16.mxu0 %v8698_v30  ;;  %v4184_v29 = vld [vmem:[#allocation5 + $0x3a8] sm:$0xff] }
 0x352   : > { %5027 = vmatprep.subr.bf16.mxu1 %v8700_v39  ;;  %v4186_v30 = vld [vmem:[#allocation5 + $0x3e8] sm:$0xff] }
 0x353   : > { %4106 = vmatmul.mubr.bf16.vlgmr.msra.gmra.mrb[20].mxu0 %v10749_v15  ;;  %v8705_v15 = vcombine.low %v4163_v7, %v4165_v37  ;;  %v8728_v37 = vcombine.high %v4184_v29, %v4186_v30 }
 0x354   : > { %4147 = vmatmul.mubr.bf16.vlgmr.msra.gmra.mrb[20].mxu1 %v10751_v63  ;;  %4946 = vmatpush1.bf16.msra.mxu0 %v8697_v34  ;;  %v8707_v63 = vcombine.low %v4164_v38, %v4166_v40  ;;  %v4187_v38 = vld [vmem:[#allocation5 + $0x420] sm:$0xff] }
 0x355   : > { %5028 = vmatpush1.bf16.msra.mxu1 %v8699_v6  ;;  %4947 = vmatprep.subr.bf16.mxu0 %v8702_v35  ;;  %v8723_v35 = vcombine.low %v4180_v5, %v4182_v16  ;;  %v4189_v40 = vld [vmem:[#allocation5 + $0x460] sm:$0xff] }
 0x356   : > { %5029 = vmatprep.subr.bf16.mxu1 %v8704_v36  ;;  %4977 = vmatprep.mubr.bf16.mxu0 %v10646_v57  ;;  %v8726_v36 = vcombine.high %v4183_v21, %v4185_v22  ;;  %v8730_v56 = vcombine.high %v4187_v38, %v4189_v40  ;;  %v4203_v5 = vld [vmem:[#allocation5 + $0x620] sm:$0xff] }
 0x357   : > { %5059 = vmatprep.mubr.bf16.mxu1 %v10646_v57  ;;  %v4205_v16 = vld [vmem:[#allocation5 + $0x660] sm:$0xff] }
 0x358   : > { %4948 = vmatpush1.bf16.msra.mxu0 %v8701_v28  ;;  %v4188_v28 = vld [vmem:[#allocation5 + $0x428] sm:$0xff] }
 0x359   : > { %5030 = vmatpush1.bf16.msra.mxu1 %v8703_v41  ;;  %4949 = vmatprep.subr.bf16.mxu0 %v8706_v42  ;;  %v4190_v41 = vld [vmem:[#allocation5 + $0x468] sm:$0xff]  ;;  %v8725_v42 = vcombine.low %v4183_v21, %v4185_v22  ;;  %v4207_v22 = vld [vmem:[#allocation5 + $0x6a0] sm:$0xff] }
 0x35a   : > { %5031 = vmatprep.subr.bf16.mxu1 %v8708_v43  ;;  %v8727_v43 = vcombine.low %v4184_v29, %v4186_v30  ;;  %v8732_v44 = vcombine.high %v4188_v28, %v4190_v41  ;;  %v4210_v29 = vld [vmem:[#allocation5 + $0x6e8] sm:$0xff]  ;;  %v8745_v30 = vcombine.low %v4203_v5, %v4205_v16 }
 0x35c   : > { %4950 = vmatpush1.bf16.msra.mxu0 %v8705_v15  ;;  %v4192_v15 = vld [vmem:[#allocation5 + $0x4a8] sm:$0xff] }
 0x35d   : > { %5032 = vmatpush1.bf16.msra.mxu1 %v8707_v63  ;;  %4951 = vmatprep.subr.bf16.mxu0 %v8710_v46  ;;  %v4194_v63 = vld [vmem:[#allocation5 + $0x4e8] sm:$0xff]  ;;  %v8729_v46 = vcombine.low %v4187_v38, %v4189_v40 }
 0x35e   : > { %5033 = vmatprep.subr.bf16.mxu1 %v8712_v47  ;;  %v8731_v47 = vcombine.low %v4188_v28, %v4190_v41  ;;  %v8736_v53 = vcombine.high %v4192_v15, %v4194_v63  ;;  %v4215_v28 = vld [vmem:[#allocation5 + $0x7a0] sm:$0xff] }
 0x35f   : > { %v4217_v41 = vld [vmem:[#allocation5 + $0x7e0] sm:$0xff] }
 0x360   : > { %4952 = vmatpush1.bf16.msra.mxu0 %v8709_v59  ;;  %v4196_v59 = vld [vmem:[#allocation5 + $0x528] sm:$0xff] }
 0x361   : > { %5034 = vmatpush1.bf16.msra.mxu1 %v8711_v60  ;;  %4953 = vmatprep.subr.bf16.mxu0 %v8714_v61  ;;  %v4198_v60 = vld [vmem:[#allocation5 + $0x568] sm:$0xff]  ;;  %v8733_v61 = vcombine.low %v4191_v58, %v4193_v45  ;;  %v8758_v58 = vcombine.high %v4215_v28, %v4217_v41 }
 0x362   : > { %5035 = vmatprep.subr.bf16.mxu1 %v8716_v62  ;;  %v8735_v62 = vcombine.low %v4192_v15, %v4194_v63  ;;  %v8740_v2 = vcombine.high %v4196_v59, %v4198_v60  ;;  %v4219_v15 = vld [vmem:[#allocation5 + $0x820] sm:$0xff] }
 0x363   : > { %v4221_v63 = vld [vmem:[#allocation5 + $0x860] sm:$0xff] }
 0x364   : > { %4954 = vmatpush1.bf16.msra.mxu0 %v8713_v8  ;;  %v4200_v8 = vld [vmem:[#allocation5 + $0x5a8] sm:$0xff] }
 0x365   : > { %5036 = vmatpush1.bf16.msra.mxu1 %v8715_v9  ;;  %4955 = vmatprep.subr.bf16.mxu0 %v8718_v10  ;;  %v4202_v9 = vld [vmem:[#allocation5 + $0x5e8] sm:$0xff]  ;;  %v8737_v10 = vcombine.low %v4195_v54, %v4197_v55  ;;  %v8762_v54 = vcombine.high %v4219_v15, %v4221_v63 }
 0x366   : > { %v3221_v19 = vpop.f32.mrb[8].mxu0  ;;  %5037 = vmatprep.subr.bf16.mxu1 %v8720_v4  ;;  %v8739_v4 = vcombine.low %v4196_v59, %v4198_v60  ;;  %v8744_v13 = vcombine.high %v4200_v8, %v4202_v9  ;;  %v4223_v59 = vld [vmem:[#allocation5 + $0x8a0] sm:$0xff] }
 0x367   : > { %v3262_v25 = vpop.f32.mrb[8].mxu1  ;;  %v3223_v27 = vpop.f32.mrb[9].mxu0  ;;  %v4225_v60 = vld [vmem:[#allocation5 + $0x8e0] sm:$0xff] }
 0x368   : > { %v10761_v39 = vadd.f32 %v3262_v25, %v3221_v19  ;;  %v3264_v31 = vpop.f32.mrb[9].mxu1  ;;  %4956 = vmatpush1.bf16.msra.mxu0 %v8717_v17  ;;  %v3225_v32 = vpop.f32.mrb[10].mxu0  ;;  %v4204_v17 = vld [vmem:[#allocation5 + $0x628] sm:$0xff]  ;;  %v8743_v19 = vcombine.low %v4200_v8, %v4202_v9  ;;  %v4209_v25 = vld [vmem:[#allocation5 + $0x6e0] sm:$0xff] }
 0x369   : > { %v10763_v33 = vadd.f32 %v3264_v31, %v3223_v27  ;;  %5038 = vmatpush1.bf16.msra.mxu1 %v8719_v1  ;;  %v3266_v34 = vpop.f32.mrb[10].mxu1  ;;  %v3226_v6 = vpop.f32.mrb[11].mxu0  ;;  %4957 = vmatprep.subr.bf16.mxu0 %v8722_v18  ;;  %v4206_v1 = vld [vmem:[#allocation5 + $0x668] sm:$0xff]  ;;  %v8741_v18 = vcombine.low %v4199_v3, %v4201_v14  ;;  %v8750_v32 = vcombine.high %v4207_v22, %v4209_v25  ;;  %v4227_v8 = vld [vmem:[#allocation5 + $0x920] sm:$0xff] }
 0x36a   : > { %v3267_v7 = vpop.f32.mrb[11].mxu1  ;;  %5039 = vmatprep.subr.bf16.mxu1 %v8724_v20  ;;  %v8746_v20 = vcombine.high %v4203_v5, %v4205_v16  ;;  %v8748_v21 = vcombine.high %v4204_v17, %v4206_v1  ;;  %v4208_v27 = vld [vmem:[#allocation5 + $0x6a8] sm:$0xff]  ;;  %v8747_v31 = vcombine.low %v4204_v17, %v4206_v1  ;;  %v4211_v34 = vld [vmem:[#allocation5 + $0x720] sm:$0xff]  ;;  %v8766_v3 = vcombine.high %v4223_v59, %v4225_v60 }
 0x36b   : > { %v4213_v6 = vld [vmem:[#allocation5 + $0x760] sm:$0xff]  ;;  %v8749_v7 = vcombine.low %v4207_v22, %v4209_v25 }
 0x36c   : > { %4958 = vmatpush1.bf16.msra.mxu0 %v8721_v26  ;;  %v8752_v26 = vcombine.high %v4208_v27, %v4210_v29  ;;  %v8754_v38 = vcombine.high %v4211_v34, %v4213_v6  ;;  %v4229_v9 = vld [vmem:[#allocation5 + $0x960] sm:$0xff] }
 0x36d   : > { %5040 = vmatpush1.bf16.msra.mxu1 %v8723_v35  ;;  %4959 = vmatprep.subr.bf16.mxu0 %v8726_v36  ;;  %v4212_v35 = vld [vmem:[#allocation5 + $0x728] sm:$0xff]  ;;  %v8770_v5 = vcombine.high %v4227_v8, %v4229_v9  ;;  %v4231_v17 = vld [vmem:[#allocation5 + $0x9a0] sm:$0xff] }
 0x36e   : > { %5041 = vmatprep.subr.bf16.mxu1 %v8728_v37  ;;  %v4214_v36 = vld [vmem:[#allocation5 + $0x768] sm:$0xff]  ;;  %v8751_v37 = vcombine.low %v4208_v27, %v4210_v29  ;;  %v4233_v1 = vld [vmem:[#allocation5 + $0x9e0] sm:$0xff] }
 0x36f   : > { %v8756_v40 = vcombine.high %v4212_v35, %v4214_v36  ;;  %v8774_v22 = vcombine.high %v4231_v17, %v4233_v1  ;;  %v4235_v27 = vld [vmem:[#allocation5 + $0xa20] sm:$0xff] }
 0x370   : > { %4960 = vmatpush1.bf16.msra.mxu0 %v8725_v42  ;;  %v4216_v42 = vld [vmem:[#allocation5 + $0x7a8] sm:$0xff]  ;;  %v4237_v29 = vld [vmem:[#allocation5 + $0xa60] sm:$0xff] }
 0x371   : > { %5042 = vmatpush1.bf16.msra.mxu1 %v8727_v43  ;;  %4961 = vmatprep.subr.bf16.mxu0 %v8730_v56  ;;  %v4218_v43 = vld [vmem:[#allocation5 + $0x7e8] sm:$0xff]  ;;  %v8753_v56 = vcombine.low %v4211_v34, %v4213_v6  ;;  %v8778_v34 = vcombine.high %v4235_v27, %v4237_v29 }
 0x372   : > { %5043 = vmatprep.subr.bf16.mxu1 %v8732_v44  ;;  %v8755_v44 = vcombine.low %v4212_v35, %v4214_v36  ;;  %v8760_v45 = vcombine.high %v4216_v42, %v4218_v43  ;;  %v4239_v35 = vld [vmem:[#allocation5 + $0xaa0] sm:$0xff] }
 0x373   : > { %v4241_v36 = vld [vmem:[#allocation5 + $0xae0] sm:$0xff] }
 0x374   : > { %4962 = vmatpush1.bf16.msra.mxu0 %v8729_v46  ;;  %v4220_v46 = vld [vmem:[#allocation5 + $0x828] sm:$0xff] }
 0x375   : > { %5044 = vmatpush1.bf16.msra.mxu1 %v8731_v47  ;;  %4963 = vmatprep.subr.bf16.mxu0 %v8734_v52  ;;  %v4222_v47 = vld [vmem:[#allocation5 + $0x868] sm:$0xff]  ;;  %v8757_v52 = vcombine.low %v4215_v28, %v4217_v41  ;;  %v8782_v28 = vcombine.high %v4239_v35, %v4241_v36 }
 0x376   : > { %5045 = vmatprep.subr.bf16.mxu1 %v8736_v53  ;;  %v8759_v53 = vcombine.low %v4216_v42, %v4218_v43  ;;  %v8764_v55 = vcombine.high %v4220_v46, %v4222_v47  ;;  %v4243_v42 = vld [vmem:[#allocation5 + $0xb20] sm:$0xff] }
 0x377   : > { %v4245_v43 = vld [vmem:[#allocation5 + $0xb60] sm:$0xff] }
 0x378   : > { %4964 = vmatpush1.bf16.msra.mxu0 %v8733_v61  ;;  %v4224_v61 = vld [vmem:[#allocation5 + $0x8a8] sm:$0xff] }
 0x379   : > { %5046 = vmatpush1.bf16.msra.mxu1 %v8735_v62  ;;  %4965 = vmatprep.subr.bf16.mxu0 %v8738_v0  ;;  %v4226_v62 = vld [vmem:[#allocation5 + $0x8e8] sm:$0xff]  ;;  %v8761_v0 = vcombine.low %v4219_v15, %v4221_v63  ;;  %v8786_v15 = vcombine.high %v4243_v42, %v4245_v43 }
 0x37a   : > { %5047 = vmatprep.subr.bf16.mxu1 %v8740_v2  ;;  %v8763_v2 = vcombine.low %v4220_v46, %v4222_v47  ;;  %v8768_v14 = vcombine.high %v4224_v61, %v4226_v62  ;;  %v4247_v47 = vld [vmem:[#allocation5 + $0xba0] sm:$0xff] }
 0x37c   : > { %4966 = vmatpush1.bf16.msra.mxu0 %v8737_v10  ;;  %v4228_v10 = vld [vmem:[#allocation5 + $0x928] sm:$0xff] }
 0x37d   : > { %5048 = vmatpush1.bf16.msra.mxu1 %v8739_v4  ;;  %4967 = vmatprep.subr.bf16.mxu0 %v8742_v11  ;;  %v4230_v4 = vld [vmem:[#allocation5 + $0x968] sm:$0xff]  ;;  %v8765_v11 = vcombine.low %v4223_v59, %v4225_v60 }
 0x37e   : > { %5049 = vmatprep.subr.bf16.mxu1 %v8744_v13  ;;  %v8767_v13 = vcombine.low %v4224_v61, %v4226_v62  ;;  %v8772_v16 = vcombine.high %v4228_v10, %v4230_v4  ;;  %v4250_v59 = vld [vmem:[#allocation5 + $0xbe8] sm:$0xff] }
 0x380   : > { %4968 = vmatpush1.bf16.msra.mxu0 %v8741_v18  ;;  %v4232_v18 = vld [vmem:[#allocation5 + $0x9a8] sm:$0xff] }
 0x381   : > { %5050 = vmatpush1.bf16.msra.mxu1 %v8743_v19  ;;  %4969 = vmatprep.subr.bf16.mxu0 %v8746_v20  ;;  %v4234_v19 = vld [vmem:[#allocation5 + $0x9e8] sm:$0xff]  ;;  %v8769_v20 = vcombine.low %v4227_v8, %v4229_v9 }
 0x382   : > { %5051 = vmatprep.subr.bf16.mxu1 %v8748_v21  ;;  %v8771_v21 = vcombine.low %v4228_v10, %v4230_v4  ;;  %v8776_v25 = vcombine.high %v4232_v18, %v4234_v19 }
 0x384   : > { %4970 = vmatpush1.bf16.msra.mxu0 %v8745_v30  ;;  %v4236_v30 = vld [vmem:[#allocation5 + $0xa28] sm:$0xff] }
 0x385   : > { %5052 = vmatpush1.bf16.msra.mxu1 %v8747_v31  ;;  %4971 = vmatprep.subr.bf16.mxu0 %v8750_v32  ;;  %v4238_v31 = vld [vmem:[#allocation5 + $0xa68] sm:$0xff]  ;;  %v8773_v32 = vcombine.low %v4231_v17, %v4233_v1 }
 0x386   : > { %5053 = vmatprep.subr.bf16.mxu1 %v8752_v26  ;;  %v8775_v26 = vcombine.low %v4232_v18, %v4234_v19  ;;  %v8780_v6 = vcombine.high %v4236_v30, %v4238_v31 }
 0x388   : > { %4972 = vmatpush1.bf16.msra.mxu0 %v8749_v7  ;;  %v4240_v7 = vld [vmem:[#allocation5 + $0xaa8] sm:$0xff] }
 0x389   : > { %5054 = vmatpush1.bf16.msra.mxu1 %v8751_v37  ;;  %4973 = vmatprep.subr.bf16.mxu0 %v8754_v38  ;;  %v4242_v37 = vld [vmem:[#allocation5 + $0xae8] sm:$0xff]  ;;  %v8777_v38 = vcombine.low %v4235_v27, %v4237_v29 }
 0x38a   : > { %5055 = vmatprep.subr.bf16.mxu1 %v8756_v40  ;;  %v8779_v40 = vcombine.low %v4236_v30, %v4238_v31  ;;  %v8784_v41 = vcombine.high %v4240_v7, %v4242_v37 }
 0x38c   : > { %4974 = vmatpush1.bf16.msra.mxu0 %v8753_v56  ;;  %v4244_v56 = vld [vmem:[#allocation5 + $0xb28] sm:$0xff] }
 0x38d   : > { %5056 = vmatpush1.bf16.msra.mxu1 %v8755_v44  ;;  %4975 = vmatprep.subr.bf16.mxu0 %v8758_v58  ;;  %v4246_v44 = vld [vmem:[#allocation5 + $0xb68] sm:$0xff]  ;;  %v8781_v58 = vcombine.low %v4239_v35, %v4241_v36 }
 0x38e   : > { %5057 = vmatprep.subr.bf16.mxu1 %v8760_v45  ;;  %v8783_v45 = vcombine.low %v4240_v7, %v4242_v37  ;;  %v8788_v46 = vcombine.high %v4244_v56, %v4246_v44  ;;  %v8787_v8 = vcombine.low %v4244_v56, %v4246_v44 }
 0x390   : > { %4976 = vmatpush1.bf16.msra.mxu0 %v8757_v52  ;;  %v4249_v52 = vld [vmem:[#allocation5 + $0xbe0] sm:$0xff] }
 0x391   : > { %5058 = vmatpush1.bf16.msra.mxu1 %v8759_v53  ;;  %4986 = vmatprep.subr.bf16.mxu0 %v8762_v54  ;;  %v8790_v9 = vcombine.high %v4247_v47, %v4249_v52  ;;  %v8789_v17 = vcombine.low %v4247_v47, %v4249_v52 }
 0x392   : > { %5068 = vmatprep.subr.bf16.mxu1 %v8764_v55  ;;  %v4248_v55 = vld [vmem:[#allocation5 + $0xba8] sm:$0xff] }
 0x393   : > { %4978 = vmatmul.mubr.bf16.vlgmr.msra.gmra.mrb[24].mxu0 %v10651_v12  ;;  %v8792_v4 = vcombine.high %v4248_v55, %v4250_v59  ;;  %v8791_v1 = vcombine.low %v4248_v55, %v4250_v59  ;;  %v4273_v55 = vld [vmem:[#allocation5 + $0xee0] sm:$0xff]  ;;  %v4272_v59 = vld [vmem:[#allocation5 + $0xea8] sm:$0xff] }
 0x394   : > { %4987 = vmatpush1.bf16.msra.mxu0 %v8761_v0  ;;  %5060 = vmatmul.mubr.bf16.vlgmr.msra.gmra.mrb[24].mxu1 %v10651_v12  ;;  %v8785_v0 = vcombine.low %v4243_v42, %v4245_v43 }
 0x395   : > { %5069 = vmatpush1.bf16.msra.mxu1 %v8763_v2  ;;  %4988 = vmatprep.subr.bf16.mxu0 %v8766_v3 }
 0x396   : > { %5070 = vmatprep.subr.bf16.mxu1 %v8768_v14  ;;  %5018 = vmatprep.mubr.bf16.mxu0 %v10654_v24 }
 0x397   : > { %5100 = vmatprep.mubr.bf16.mxu1 %v10654_v24 }
 0x398   : > { %4989 = vmatpush1.bf16.msra.mxu0 %v8765_v11  ;;  %v4251_v11 = vld [vmem:[#allocation5 + $0xc20] sm:$0xff] }
 0x399   : > { %5071 = vmatpush1.bf16.msra.mxu1 %v8767_v13  ;;  %4990 = vmatprep.subr.bf16.mxu0 %v8770_v5  ;;  %v4253_v13 = vld [vmem:[#allocation5 + $0xc60] sm:$0xff]  ;;  %v4252_v5 = vld [vmem:[#allocation5 + $0xc28] sm:$0xff] }
 0x39a   : > { %5072 = vmatprep.subr.bf16.mxu1 %v8772_v16  ;;  %v4254_v16 = vld [vmem:[#allocation5 + $0xc68] sm:$0xff]  ;;  %v8794_v18 = vcombine.high %v4251_v11, %v4253_v13  ;;  %v8793_v27 = vcombine.low %v4251_v11, %v4253_v13 }
 0x39b   : > { %v8796_v19 = vcombine.high %v4252_v5, %v4254_v16  ;;  %v8795_v29 = vcombine.low %v4252_v5, %v4254_v16 }
 0x39c   : > { %4991 = vmatpush1.bf16.msra.mxu0 %v8769_v20  ;;  %v4255_v20 = vld [vmem:[#allocation5 + $0xca0] sm:$0xff] }
 0x39d   : > { %5073 = vmatpush1.bf16.msra.mxu1 %v8771_v21  ;;  %4992 = vmatprep.subr.bf16.mxu0 %v8774_v22  ;;  %v4257_v21 = vld [vmem:[#allocation5 + $0xce0] sm:$0xff]  ;;  %v4256_v22 = vld [vmem:[#allocation5 + $0xca8] sm:$0xff] }
 0x39e   : > { %5074 = vmatprep.subr.bf16.mxu1 %v8776_v25  ;;  %v4258_v25 = vld [vmem:[#allocation5 + $0xce8] sm:$0xff]  ;;  %v8798_v30 = vcombine.high %v4255_v20, %v4257_v21  ;;  %v8797_v35 = vcombine.low %v4255_v20, %v4257_v21 }
 0x39f   : > { %v8800_v31 = vcombine.high %v4256_v22, %v4258_v25  ;;  %v8799_v36 = vcombine.low %v4256_v22, %v4258_v25 }
 0x3a0   : > { %4993 = vmatpush1.bf16.msra.mxu0 %v8773_v32  ;;  %v4259_v32 = vld [vmem:[#allocation5 + $0xd20] sm:$0xff] }
 0x3a1   : > { %5075 = vmatpush1.bf16.msra.mxu1 %v8775_v26  ;;  %4994 = vmatprep.subr.bf16.mxu0 %v8778_v34  ;;  %v4261_v26 = vld [vmem:[#allocation5 + $0xd60] sm:$0xff]  ;;  %v4260_v34 = vld [vmem:[#allocation5 + $0xd28] sm:$0xff] }
 0x3a2   : > { %5076 = vmatprep.subr.bf16.mxu1 %v8780_v6  ;;  %v4262_v6 = vld [vmem:[#allocation5 + $0xd68] sm:$0xff]  ;;  %v8802_v7 = vcombine.high %v4259_v32, %v4261_v26  ;;  %v8801_v42 = vcombine.low %v4259_v32, %v4261_v26  ;;  %v9739_v32 = vld [vmem:[#allocation8 + $0x800] ss:$16 sps:$4 sm:$0xff]  }
 0x3a3   : > { %v8804_v37 = vcombine.high %v4260_v34, %v4262_v6  ;;  %v8803_v43 = vcombine.low %v4260_v34, %v4262_v6  ;;  %v9742_v26 = vld [vmem:[#allocation8 + $0xa00] ss:$16 sps:$4 sm:$0xff]   ;;  %v9747_v34 = vld [vmem:[#allocation8 + $0x824] ss:$16 sps:$4 sm:$0xff]  }
 0x3a4   : > { %4995 = vmatpush1.bf16.msra.mxu0 %v8777_v38  ;;  %v4263_v38 = vld [vmem:[#allocation5 + $0xda0] sm:$0xff] }
 0x3a5   : > { %5077 = vmatpush1.bf16.msra.mxu1 %v8779_v40  ;;  %4996 = vmatprep.subr.bf16.mxu0 %v8782_v28  ;;  %v4265_v40 = vld [vmem:[#allocation5 + $0xde0] sm:$0xff]  ;;  %v4264_v28 = vld [vmem:[#allocation5 + $0xda8] sm:$0xff] }
 0x3a6   : > { %v3303_v63 = vpop.f32.mrb[12].mxu0  ;;  %5078 = vmatprep.subr.bf16.mxu1 %v8784_v41  ;;  %v4266_v41 = vld [vmem:[#allocation5 + $0xde8] sm:$0xff]  ;;  %v8806_v56 = vcombine.high %v4263_v38, %v4265_v40  ;;  %v9750_v6 = vld [vmem:[#allocation8 + $0xa24] ss:$16 sps:$4 sm:$0xff]  }
 0x3a7   : > { %v3344_v53 = vpop.f32.mrb[12].mxu1  ;;  %v3305_v54 = vpop.f32.mrb[13].mxu0  ;;  %v8808_v44 = vcombine.high %v4264_v28, %v4266_v41  ;;  %v8807_v47 = vcombine.low %v4264_v28, %v4266_v41  ;;  %v9759_v28 = vld [vmem:[#allocation8 + $0x864] ss:$16 sps:$4 sm:$0xff]  }
 0x3a8   : > { %v10769_v60 = vadd.f32 %v3344_v53, %v3303_v63  ;;  %v3346_v61 = vpop.f32.mrb[13].mxu1  ;;  %v3307_v62 = vpop.f32.mrb[14].mxu0  ;;  %4997 = vmatpush1.bf16.msra.mxu0 %v8781_v58  ;;  %v4267_v58 = vld [vmem:[#allocation5 + $0xe20] sm:$0xff]  ;;  %v4270_v63 = vld [vmem:[#allocation5 + $0xe68] sm:$0xff] }
 0x3a9   : > { %v10771_v2 = vadd.f32 %v3346_v61, %v3305_v54  ;;  %v3348_v3 = vpop.f32.mrb[14].mxu1  ;;  %5079 = vmatpush1.bf16.msra.mxu1 %v8783_v45  ;;  %v3308_v14 = vpop.f32.mrb[15].mxu0  ;;  %4998 = vmatprep.subr.bf16.mxu0 %v8786_v15  ;;  %v4269_v45 = vld [vmem:[#allocation5 + $0xe60] sm:$0xff]  ;;  %v4268_v15 = vld [vmem:[#allocation5 + $0xe28] sm:$0xff] }
 0x3aa   : > { %v3349_v10 = vpop.f32.mrb[15].mxu1  ;;  %5080 = vmatprep.subr.bf16.mxu1 %v8788_v46  ;;  %v8805_v46 = vcombine.low %v4263_v38, %v4265_v40  ;;  %v8810_v52 = vcombine.high %v4267_v58, %v4269_v45  ;;  %v8812_v53 = vcombine.high %v4268_v15, %v4270_v63  ;;  %v4271_v54 = vld [vmem:[#allocation5 + $0xea0] sm:$0xff]  ;;  %v4274_v61 = vld [vmem:[#allocation5 + $0xee8] sm:$0xff]  ;;  %v8809_v62 = vcombine.low %v4267_v58, %v4269_v45 }
 0x3ab   : > { %v8814_v3 = vcombine.high %v4271_v54, %v4273_v55  ;;  %v8816_v14 = vcombine.high %v4272_v59, %v4274_v61  ;;  %v4276_v10 = vld [vmem:[#allocation5 + $0xf28] sm:$0xff]  ;;  %v8813_v11 = vcombine.low %v4271_v54, %v4273_v55  ;;  %v8815_v13 = vcombine.low %v4272_v59, %v4274_v61  ;;  %v9751_v38 = vld [vmem:[#allocation8 + $0x840] ss:$16 sps:$4 sm:$0xff]   ;;  %v9762_v41 = vld [vmem:[#allocation8 + $0xa64] ss:$16 sps:$4 sm:$0xff]  }
 0x3ac   : > { %4999 = vmatpush1.bf16.msra.mxu0 %v8785_v0  ;;  %v8811_v0 = vcombine.low %v4268_v15, %v4270_v63  ;;  %v9754_v40 = vld [vmem:[#allocation8 + $0xa40] ss:$16 sps:$4 sm:$0xff]   ;;  %v9771_v15 = vld [vmem:[#allocation8 + $0x8a4] ss:$16 sps:$4 sm:$0xff]  }
 0x3ad   : > { %5081 = vmatpush1.bf16.msra.mxu1 %v8787_v8  ;;  %5000 = vmatprep.subr.bf16.mxu0 %v8790_v9  ;;  %v4275_v8 = vld [vmem:[#allocation5 + $0xf20] sm:$0xff] }
 0x3ae   : > { %5082 = vmatprep.subr.bf16.mxu1 %v8792_v4  ;;  %v4277_v9 = vld [vmem:[#allocation5 + $0xf60] sm:$0xff]  ;;  %v4278_v4 = vld [vmem:[#allocation5 + $0xf68] sm:$0xff] }
 0x3af   : > { %v8818_v5 = vcombine.high %v4275_v8, %v4277_v9  ;;  %v8820_v16 = vcombine.high %v4276_v10, %v4278_v4  ;;  %v8817_v20 = vcombine.low %v4275_v8, %v4277_v9  ;;  %v8819_v21 = vcombine.low %v4276_v10, %v4278_v4  ;;  %v9763_v58 = vld [vmem:[#allocation8 + $0x880] ss:$16 sps:$4 sm:$0xff]   ;;  %v9774_v63 = vld [vmem:[#allocation8 + $0xaa4] ss:$16 sps:$4 sm:$0xff]  }
 0x3b0   : > { %5001 = vmatpush1.bf16.msra.mxu0 %v8789_v17  ;;  %v4279_v17 = vld [vmem:[#allocation5 + $0xfa0] sm:$0xff] }
 0x3b1   : > { %5083 = vmatpush1.bf16.msra.mxu1 %v8791_v1  ;;  %5002 = vmatprep.subr.bf16.mxu0 %v8794_v18  ;;  %v4281_v1 = vld [vmem:[#allocation5 + $0xfe0] sm:$0xff]  ;;  %v4280_v18 = vld [vmem:[#allocation5 + $0xfa8] sm:$0xff] }
 0x3b2   : > { %5084 = vmatprep.subr.bf16.mxu1 %v8796_v19  ;;  %v4282_v19 = vld [vmem:[#allocation5 + $0xfe8] sm:$0xff]  ;;  %v8822_v22 = vcombine.high %v4279_v17, %v4281_v1  ;;  %v9766_v45 = vld [vmem:[#allocation8 + $0xa80] ss:$16 sps:$4 sm:$0xff]   ;;  %v9780_v54 = vld [vmem:[#allocation8 + $0xac4] ss:$16 sps:$4 sm:$0xff]  }
 0x3b3   : > { %v8824_v25 = vcombine.high %v4280_v18, %v4282_v19  ;;  %v9778_v4 = vld [vmem:[#allocation8 + $0xac0] ss:$16 sps:$4 sm:$0xff]  }
 0x3b4   : > { %5003 = vmatpush1.bf16.msra.mxu0 %v8793_v27  ;;  %v8821_v27 = vcombine.low %v4279_v17, %v4281_v1  ;;  %v9789_v17 = vld [vmem:[#allocation8 + $0x904] ss:$16 sps:$4 sm:$0xff]  }
 0x3b5   : > { %5085 = vmatpush1.bf16.msra.mxu1 %v8795_v29  ;;  %5004 = vmatprep.subr.bf16.mxu0 %v8798_v30  ;;  %v8823_v29 = vcombine.low %v4280_v18, %v4282_v19  ;;  %v9741_v30 = vld [vmem:[#allocation8 + $0x804] ss:$16 sps:$4 sm:$0xff]   ;;  %v9787_v18 = vld [vmem:[#allocation8 + $0x900] ss:$16 sps:$4 sm:$0xff]  }
 0x3b6   : > { %5086 = vmatprep.subr.bf16.mxu1 %v8800_v31  ;;  %v9744_v31 = vld [vmem:[#allocation8 + $0xa04] ss:$16 sps:$4 sm:$0xff]   ;;  %v9790_v19 = vld [vmem:[#allocation8 + $0xb00] ss:$16 sps:$4 sm:$0xff]  }
 0x3b7   : > { %v9792_v1 = vld [vmem:[#allocation8 + $0xb04] ss:$16 sps:$4 sm:$0xff]  }
 0x3b8   : > { %5005 = vmatpush1.bf16.msra.mxu0 %v8797_v35  ;;  %v9745_v35 = vld [vmem:[#allocation8 + $0x820] ss:$16 sps:$4 sm:$0xff]  }
 0x3b9   : > { %5087 = vmatpush1.bf16.msra.mxu1 %v8799_v36  ;;  %5006 = vmatprep.subr.bf16.mxu0 %v8802_v7  ;;  %v9748_v36 = vld [vmem:[#allocation8 + $0xa20] ss:$16 sps:$4 sm:$0xff]   ;;  %v9753_v7 = vld [vmem:[#allocation8 + $0x844] ss:$16 sps:$4 sm:$0xff]  }
 0x3ba   : > { %5088 = vmatprep.subr.bf16.mxu1 %v8804_v37  ;;  %v9756_v37 = vld [vmem:[#allocation8 + $0xa44] ss:$16 sps:$4 sm:$0xff]  }
 0x3bc   : > { %5007 = vmatpush1.bf16.msra.mxu0 %v8801_v42  ;;  %v9757_v42 = vld [vmem:[#allocation8 + $0x860] ss:$16 sps:$4 sm:$0xff]  }
 0x3bd   : > { %5089 = vmatpush1.bf16.msra.mxu1 %v8803_v43  ;;  %5008 = vmatprep.subr.bf16.mxu0 %v8806_v56  ;;  %v9760_v43 = vld [vmem:[#allocation8 + $0xa60] ss:$16 sps:$4 sm:$0xff]   ;;  %v9765_v56 = vld [vmem:[#allocation8 + $0x884] ss:$16 sps:$4 sm:$0xff]  }
 0x3be   : > { %5090 = vmatprep.subr.bf16.mxu1 %v8808_v44  ;;  %v9768_v44 = vld [vmem:[#allocation8 + $0xa84] ss:$16 sps:$4 sm:$0xff]  }
 0x3c0   : > { %5009 = vmatpush1.bf16.msra.mxu0 %v8805_v46  ;;  %v9769_v46 = vld [vmem:[#allocation8 + $0x8a0] ss:$16 sps:$4 sm:$0xff]  }
 0x3c1   : > { %5091 = vmatpush1.bf16.msra.mxu1 %v8807_v47  ;;  %5010 = vmatprep.subr.bf16.mxu0 %v8810_v52  ;;  %v9772_v47 = vld [vmem:[#allocation8 + $0xaa0] ss:$16 sps:$4 sm:$0xff]   ;;  %v9777_v52 = vld [vmem:[#allocation8 + $0x8c4] ss:$16 sps:$4 sm:$0xff]  }
 0x3c2   : > { %5092 = vmatprep.subr.bf16.mxu1 %v8812_v53 }
 0x3c4   : > { %5011 = vmatpush1.bf16.msra.mxu0 %v8809_v62 }
 0x3c5   : > { %5093 = vmatpush1.bf16.msra.mxu1 %v8811_v0  ;;  %5012 = vmatprep.subr.bf16.mxu0 %v8814_v3 }
 0x3c6   : > { %5094 = vmatprep.subr.bf16.mxu1 %v8816_v14  ;;  %v9775_v14 = vld [vmem:[#allocation8 + $0x8c0] ss:$16 sps:$4 sm:$0xff]  }
 0x3c8   : > { %5013 = vmatpush1.bf16.msra.mxu0 %v8813_v11  ;;  %v9783_v11 = vld [vmem:[#allocation8 + $0x8e4] ss:$16 sps:$4 sm:$0xff]  }
 0x3c9   : > { %5095 = vmatpush1.bf16.msra.mxu1 %v8815_v13  ;;  %5014 = vmatprep.subr.bf16.mxu0 %v8818_v5 }
 0x3ca   : > { %5096 = vmatprep.subr.bf16.mxu1 %v8820_v16  ;;  %v9781_v16 = vld [vmem:[#allocation8 + $0x8e0] ss:$16 sps:$4 sm:$0xff]  }
 0x3cc   : > { %5015 = vmatpush1.bf16.msra.mxu0 %v8817_v20 }
 0x3cd   : > { %5097 = vmatpush1.bf16.msra.mxu1 %v8819_v21  ;;  %5016 = vmatprep.subr.bf16.mxu0 %v8822_v22 }
 0x3ce   : > { %5098 = vmatprep.subr.bf16.mxu1 %v8824_v25 }
 0x3d0   : > { %5017 = vmatpush1.bf16.msra.mxu0 %v8821_v27 }
 0x3d1   : > { %5099 = vmatpush1.bf16.msra.mxu1 %v8823_v29  ;;  %5917 = vmatprep.subr.bf16.mxu0 %v9741_v30 }
 0x3d2   : > { %5958 = vmatprep.subr.bf16.mxu1 %v9744_v31 }
 0x3d3   : > { %5019 = vmatmul.mubr.bf16.vlgmr.msra.gmra.mrb[24].mxu0 %v10661_v23 }
 0x3d4   : > { %5101 = vmatmul.mubr.bf16.vlgmr.msra.gmra.mrb[24].mxu1 %v10661_v23  ;;  %5918 = vmatpush1.bf16.msra.mxu0 %v9739_v32 }
 0x3d5   : > { %5959 = vmatpush1.bf16.msra.mxu1 %v9742_v26  ;;  %5919 = vmatprep.subr.bf16.mxu0 %v9747_v34 }
 0x3d6   : > { %5960 = vmatprep.subr.bf16.mxu1 %v9750_v6 }
 0x3d8   : > { %5920 = vmatpush1.bf16.msra.mxu0 %v9745_v35  ;;  %v9795_v35 = vld [vmem:[#allocation8 + $0x924] ss:$16 sps:$4 sm:$0xff]  }
 0x3d9   : > { %5961 = vmatpush1.bf16.msra.mxu1 %v9748_v36  ;;  %5921 = vmatprep.subr.bf16.mxu0 %v9753_v7  ;;  %v9798_v36 = vld [vmem:[#allocation8 + $0xb24] ss:$16 sps:$4 sm:$0xff]   ;;  %v9793_v7 = vld [vmem:[#allocation8 + $0x920] ss:$16 sps:$4 sm:$0xff]  }
 0x3da   : > { %5962 = vmatprep.subr.bf16.mxu1 %v9756_v37  ;;  %v9796_v37 = vld [vmem:[#allocation8 + $0xb20] ss:$16 sps:$4 sm:$0xff]  }
 0x3dc   : > { %5922 = vmatpush1.bf16.msra.mxu0 %v9751_v38  ;;  %v9799_v38 = vld [vmem:[#allocation8 + $0x940] ss:$16 sps:$4 sm:$0xff]  }
 0x3dd   : > { %5963 = vmatpush1.bf16.msra.mxu1 %v9754_v40  ;;  %5923 = vmatprep.subr.bf16.mxu0 %v9759_v28  ;;  %v9804_v40 = vld [vmem:[#allocation8 + $0xb44] ss:$16 sps:$4 sm:$0xff]  }
 0x3de   : > { %5964 = vmatprep.subr.bf16.mxu1 %v9762_v41  ;;  %v9807_v28 = vld [vmem:[#allocation8 + $0x964] ss:$16 sps:$4 sm:$0xff]  }
 0x3df   : > { %v9810_v41 = vld [vmem:[#allocation8 + $0xb64] ss:$16 sps:$4 sm:$0xff]  }
 0x3e0   : > { %5924 = vmatpush1.bf16.msra.mxu0 %v9757_v42  ;;  %v9805_v42 = vld [vmem:[#allocation8 + $0x960] ss:$16 sps:$4 sm:$0xff]  }
 0x3e1   : > { %5965 = vmatpush1.bf16.msra.mxu1 %v9760_v43  ;;  %5925 = vmatprep.subr.bf16.mxu0 %v9765_v56  ;;  %v9808_v43 = vld [vmem:[#allocation8 + $0xb60] ss:$16 sps:$4 sm:$0xff]   ;;  %v9813_v56 = vld [vmem:[#allocation8 + $0x984] ss:$16 sps:$4 sm:$0xff]  }
 0x3e2   : > { %5966 = vmatprep.subr.bf16.mxu1 %v9768_v44  ;;  %v9816_v44 = vld [vmem:[#allocation8 + $0xb84] ss:$16 sps:$4 sm:$0xff]  }
 0x3e4   : > { %5926 = vmatpush1.bf16.msra.mxu0 %v9763_v58  ;;  %v9811_v58 = vld [vmem:[#allocation8 + $0x980] ss:$16 sps:$4 sm:$0xff]  }
 0x3e5   : > { %5967 = vmatpush1.bf16.msra.mxu1 %v9766_v45  ;;  %5927 = vmatprep.subr.bf16.mxu0 %v9771_v15  ;;  %v9814_v45 = vld [vmem:[#allocation8 + $0xb80] ss:$16 sps:$4 sm:$0xff]   ;;  %v9819_v15 = vld [vmem:[#allocation8 + $0x9a4] ss:$16 sps:$4 sm:$0xff]  }
 0x3e6   : > { %v4025_v53 = vpop.f32.mrb[16].mxu0  ;;  %5968 = vmatprep.subr.bf16.mxu1 %v9774_v63  ;;  %v9822_v63 = vld [vmem:[#allocation8 + $0xba4] ss:$16 sps:$4 sm:$0xff]  }
 0x3e7   : > { %v4026_v55 = vadd.f32 %v4025_v53, %v10761_v39  ;;  %v4066_v59 = vpop.f32.mrb[16].mxu1  ;;  %v4027_v61 = vpop.f32.mrb[17].mxu0  ;;  %v9786_v39 = vld [vmem:[#allocation8 + $0xae4] ss:$16 sps:$4 sm:$0xff]  }
 0x3e8   : > { %v4028_v62 = vadd.f32 %v4027_v61, %v10763_v33  ;;  %v4068_v0 = vpop.f32.mrb[17].mxu1  ;;  %v4029_v3 = vpop.f32.mrb[18].mxu0  ;;  %5928 = vmatpush1.bf16.msra.mxu0 %v9769_v46  ;;  %v9784_v33 = vld [vmem:[#allocation8 + $0xae0] ss:$16 sps:$4 sm:$0xff]   ;;  %v9828_v53 = vld [vmem:[#allocation8 + $0xbc4] ss:$16 sps:$4 sm:$0xff]  }
 0x3e9   : > { %v10777_v8 = vadd.f32 %v4066_v59, %v4026_v55  ;;  %v4070_v9 = vpop.f32.mrb[18].mxu1  ;;  %v4030_v10 = vpop.f32.mrb[19].mxu0  ;;  %5969 = vmatpush1.bf16.msra.mxu1 %v9772_v47  ;;  %5929 = vmatprep.subr.bf16.mxu0 %v9777_v52  ;;  %v9817_v46 = vld [vmem:[#allocation8 + $0x9a0] ss:$16 sps:$4 sm:$0xff]   ;;  %v9825_v52 = vld [vmem:[#allocation8 + $0x9c4] ss:$16 sps:$4 sm:$0xff]  }
 0x3ea   : > { %v10779_v13 = vadd.f32 %v4068_v0, %v4028_v62  ;;  %v4071_v5 = vpop.f32.mrb[19].mxu1  ;;  %5970 = vmatprep.subr.bf16.mxu1 %v9780_v54  ;;  %v9820_v47 = vld [vmem:[#allocation8 + $0xba0] ss:$16 sps:$4 sm:$0xff]   ;;  %v9831_v59 = vld [vmem:[#allocation8 + $0x9e4] ss:$16 sps:$4 sm:$0xff]  }
 0x3eb   : > { %v9823_v54 = vld [vmem:[#allocation8 + $0x9c0] ss:$16 sps:$4 sm:$0xff]   ;;  %v9834_v61 = vld [vmem:[#allocation8 + $0xbe4] ss:$16 sps:$4 sm:$0xff]   ;;  %v9837_v3 = vld [vmem:[#allocation8 + $0x80c] ss:$16 sps:$4 sm:$0xff]  }
 0x3ec   : > { %5930 = vmatpush1.bf16.msra.mxu0 %v9775_v14  ;;  %v9826_v55 = vld [vmem:[#allocation8 + $0xbc0] ss:$16 sps:$4 sm:$0xff]   ;;  %v9840_v14 = vld [vmem:[#allocation8 + $0xa0c] ss:$16 sps:$4 sm:$0xff]   ;;  %v4283_v9 = vld [vmem:[#allocation7 + $0x8] sm:$0xf] }
 0x3ed   : > { %5971 = vmatpush1.bf16.msra.mxu1 %v9778_v4  ;;  %5931 = vmatprep.subr.bf16.mxu0 %v9783_v11  ;;  %v9829_v62 = vld [vmem:[#allocation8 + $0x9e0] ss:$16 sps:$4 sm:$0xff]   ;;  %v4288_v10 = vrot.slane %v4283_v9, %v10681_v48  ;;  %v4296_v4 = vrot.slane %v4283_v9, %v10683_v49  ;;  %v4292_v11 = vrot.slane %v4283_v9, %v10685_v50 }
 0x3ee   : > { %5972 = vmatprep.subr.bf16.mxu1 %v9786_v39  ;;  %v9832_v0 = vld [vmem:[#allocation8 + $0xbe0] ss:$16 sps:$4 sm:$0xff]   ;;  %v4300_v5 = vrot.slane %v4283_v9, %v10687_v51 }
 0x3f0   : > { %5932 = vmatpush1.bf16.msra.mxu0 %v9781_v16 }
 0x3f1   : > { %5973 = vmatpush1.bf16.msra.mxu1 %v9784_v33  ;;  %5933 = vmatprep.subr.bf16.mxu0 %v9789_v17 }
 0x3f2   : > { %5974 = vmatprep.subr.bf16.mxu1 %v9792_v1 }
 0x3f4   : > { %5934 = vmatpush1.bf16.msra.mxu0 %v9787_v18 }
 0x3f5   : > { %5975 = vmatpush1.bf16.msra.mxu1 %v9790_v19  ;;  %5935 = vmatprep.subr.bf16.mxu0 %v9795_v35 }
 0x3f6   : > { %5976 = vmatprep.subr.bf16.mxu1 %v9798_v36 }
 0x3f8   : > { %5936 = vmatpush1.bf16.msra.mxu0 %v9793_v7 }
 0x3f9   : > { %5977 = vmatpush1.bf16.msra.mxu1 %v9796_v37 }
 0x3fa   : > { %5978 = vmatprep.subr.bf16.mxu1 %v9804_v40 }
 0x426   : > { %v4107_v20 = vpop.f32.mrb[20].mxu0 }
 0x427   : > { %v4108_v21 = vadd.f32 %v4107_v20, %v10769_v60  ;;  %v4148_v22 = vpop.f32.mrb[20].mxu1  ;;  %v4109_v25 = vpop.f32.mrb[21].mxu0  ;;  %v9801_v60 = vld [vmem:[#allocation8 + $0x944] ss:$16 sps:$4 sm:$0xff]  }
 0x428   : > { %v4110_v27 = vadd.f32 %v4109_v25, %v10771_v2  ;;  %v4150_v29 = vpop.f32.mrb[21].mxu1  ;;  %v4111_v30 = vpop.f32.mrb[22].mxu0  ;;  %v9802_v2 = vld [vmem:[#allocation8 + $0xb40] ss:$16 sps:$4 sm:$0xff]   ;;  %5937 = vmatprep.subr.bf16.mxu0 %v9801_v60 }
 0x429   : > { %v10783_v31 = vadd.f32 %v4148_v22, %v4108_v21  ;;  %v4152_v32 = vpop.f32.mrb[22].mxu1  ;;  %v4112_v26 = vpop.f32.mrb[23].mxu0  ;;  %5938 = vmatpush1.bf16.msra.mxu0 %v9799_v38  ;;  %5979 = vmatpush1.bf16.msra.mxu1 %v9802_v2 }
 0x42a   : > { %v10785_v34 = vadd.f32 %v4150_v29, %v4110_v27  ;;  %v4153_v6 = vpop.f32.mrb[23].mxu1  ;;  %5939 = vmatprep.subr.bf16.mxu0 %v9807_v28  ;;  %5980 = vmatprep.subr.bf16.mxu1 %v9810_v41 }
 0x42d   : > { %5940 = vmatpush1.bf16.msra.mxu0 %v9805_v42  ;;  %5981 = vmatpush1.bf16.msra.mxu1 %v9808_v43 }
 0x42e   : > { %5941 = vmatprep.subr.bf16.mxu0 %v9813_v56  ;;  %5982 = vmatprep.subr.bf16.mxu1 %v9816_v44 }
 0x431   : > { %5942 = vmatpush1.bf16.msra.mxu0 %v9811_v58  ;;  %5983 = vmatpush1.bf16.msra.mxu1 %v9814_v45 }
 0x432   : > { %5943 = vmatprep.subr.bf16.mxu0 %v9819_v15  ;;  %5984 = vmatprep.subr.bf16.mxu1 %v9822_v63 }
 0x435   : > { %5944 = vmatpush1.bf16.msra.mxu0 %v9817_v46  ;;  %5985 = vmatpush1.bf16.msra.mxu1 %v9820_v47 }
 0x436   : > { %5945 = vmatprep.subr.bf16.mxu0 %v9825_v52  ;;  %5986 = vmatprep.subr.bf16.mxu1 %v9828_v53 }
 0x439   : > { %5946 = vmatpush1.bf16.msra.mxu0 %v9823_v54  ;;  %5987 = vmatpush1.bf16.msra.mxu1 %v9826_v55 }
 0x43a   : > { %5947 = vmatprep.subr.bf16.mxu0 %v9831_v59  ;;  %5988 = vmatprep.subr.bf16.mxu1 %v9834_v61 }
 0x43d   : > { %5948 = vmatpush1.bf16.msra.mxu0 %v9829_v62  ;;  %5989 = vmatpush1.bf16.msra.mxu1 %v9832_v0 }
 0x43e   : > { %5999 = vmatprep.subr.bf16.mxu0 %v9837_v3  ;;  %6040 = vmatprep.subr.bf16.mxu1 %v9840_v14 }
 0x4a6   : > { %v5020_v39 = vpop.f32.mrb[24].mxu0 }
 0x4a7   : > { %v9224_v16 = vadd.f32 %v5020_v39, %v4288_v10  ;;  %v5102_v33 = vpop.f32.mrb[24].mxu1  ;;  %v5022_v17 = vpop.f32.mrb[25].mxu0  ;;  %v9835_v10 = vld [vmem:[#allocation8 + $0x808] ss:$16 sps:$4 sm:$0xff]  }
 0x4a8   : > { %v9226_v1 = vadd.f32 %v5102_v33, %v4296_v4  ;;  %v9225_v18 = vadd.f32 %v5022_v17, %v4292_v11  ;;  %v5104_v19 = vpop.f32.mrb[25].mxu1  ;;  %v5024_v20 = vpop.f32.mrb[26].mxu0  ;;  %v9843_v33 = vld [vmem:[#allocation8 + $0x82c] ss:$16 sps:$4 sm:$0xff]  }
 0x4a9   : > { %v5113_v21 = vmul.f32 0.044715, %v9224_v16  ;;  %v9227_v22 = vadd.f32 %v5104_v19, %v4300_v5  ;;  %v5106_v25 = vpop.f32.mrb[26].mxu1  ;;  %v5025_v27 = vpop.f32.mrb[27].mxu0  ;;  %v5109_v63 = vmul.f32 0.5, %v9224_v16 }
 0x4aa   : > { %v5115_v29 = vmul.f32 0.044715, %v9226_v1  ;;  %v5114_v30 = vmul.f32 0.044715, %v9225_v18  ;;  %v5107_v32 = vpop.f32.mrb[27].mxu1  ;;  %v5110_v52 = vmul.f32 0.5, %v9225_v18 }
 0x4ab   : > { %v5117_v26 = vmul.f32 %v9224_v16, %v5113_v21  ;;  %v5116_v6 = vmul.f32 0.044715, %v9227_v22  ;;  %v5112_v55 = vmul.f32 0.5, %v9227_v22  ;;  %v5111_v0 = vmul.f32 0.5, %v9226_v1  ;;  %v9838_v5 = vld [vmem:[#allocation8 + $0xa08] ss:$16 sps:$4 sm:$0xff]  }
 0x4ac   : > { %v5119_v35 = vmul.f32 %v9226_v1, %v5115_v29  ;;  %v5118_v36 = vmul.f32 %v9225_v18, %v5114_v30  ;;  %v9846_v17 = vld [vmem:[#allocation8 + $0xa2c] ss:$16 sps:$4 sm:$0xff]   ;;  %v9847_v21 = vld [vmem:[#allocation8 + $0x848] ss:$16 sps:$4 sm:$0xff]  }
 0x4ad   : > { %v5121_v7 = vmul.f32 %v9224_v16, %v5117_v26  ;;  %v5120_v37 = vmul.f32 %v9227_v22, %v5116_v6  ;;  %v9849_v19 = vld [vmem:[#allocation8 + $0x84c] ss:$16 sps:$4 sm:$0xff]   ;;  %v9853_v29 = vld [vmem:[#allocation8 + $0x868] ss:$16 sps:$4 sm:$0xff]  }
 0x4ae   : > { %v5123_v60 = vmul.f32 %v9226_v1, %v5119_v35  ;;  %v5122_v38 = vmul.f32 %v9225_v18, %v5118_v36  ;;  %v9852_v20 = vld [vmem:[#allocation8 + $0xa4c] ss:$16 sps:$4 sm:$0xff]   ;;  %v9856_v30 = vld [vmem:[#allocation8 + $0xa68] ss:$16 sps:$4 sm:$0xff]  }
 0x4af   : > { %v5125_v2 = vadd.f32 %v9224_v16, %v5121_v7  ;;  %v5124_v40 = vmul.f32 %v9227_v22, %v5120_v37  ;;  %v9855_v25 = vld [vmem:[#allocation8 + $0x86c] ss:$16 sps:$4 sm:$0xff]   ;;  %v9859_v6 = vld [vmem:[#allocation8 + $0x888] ss:$16 sps:$4 sm:$0xff]  }
 0x4b0   : > { %v5127_v28 = vadd.f32 %v9226_v1, %v5123_v60  ;;  %v5126_v41 = vadd.f32 %v9225_v18, %v5122_v38  ;;  %v9841_v1 = vld [vmem:[#allocation8 + $0x828] ss:$16 sps:$4 sm:$0xff]   ;;  %v9858_v27 = vld [vmem:[#allocation8 + $0xa6c] ss:$16 sps:$4 sm:$0xff]  }
 0x4b1   : > { %v5128_v42 = vadd.f32 %v9227_v22, %v5124_v40  ;;  %v5129_v43 = vmul.f32 0.7978846, %v5125_v2  ;;  %v9844_v18 = vld [vmem:[#allocation8 + $0xa28] ss:$16 sps:$4 sm:$0xff]   ;;  %v9861_v32 = vld [vmem:[#allocation8 + $0x88c] ss:$16 sps:$4 sm:$0xff]  }
 0x4b2   : > { %v5130_v56 = vmul.f32 0.7978846, %v5126_v41  ;;  %v5131_v44 = vmul.f32 0.7978846, %v5127_v28  ;;  %v9850_v22 = vld [vmem:[#allocation8 + $0xa48] ss:$16 sps:$4 sm:$0xff]  }
 0x4b3   : > { %v5132_v58 = vmul.f32 0.7978846, %v5128_v42  ;;  %10139 = vtanh.f32 %v5129_v43  ;;  %v9864_v26 = vld [vmem:[#allocation8 + $0xa8c] ss:$16 sps:$4 sm:$0xff]   ;;  %v9862_v35 = vld [vmem:[#allocation8 + $0xa88] ss:$16 sps:$4 sm:$0xff]  }
 0x4b4   : > { %10141 = vtanh.f32 %v5130_v56  ;;  %v9867_v36 = vld [vmem:[#allocation8 + $0x8ac] ss:$16 sps:$4 sm:$0xff]   ;;  %v9865_v37 = vld [vmem:[#allocation8 + $0x8a8] ss:$16 sps:$4 sm:$0xff]  }
 0x4b5   : > { %10143 = vtanh.f32 %v5132_v58  ;;  %v9870_v7 = vld [vmem:[#allocation8 + $0xaac] ss:$16 sps:$4 sm:$0xff]   ;;  %v9868_v60 = vld [vmem:[#allocation8 + $0xaa8] ss:$16 sps:$4 sm:$0xff]  }
 0x4b6   : > { %10145 = vtanh.f32 %v5131_v44  ;;  %v9873_v38 = vld [vmem:[#allocation8 + $0x8cc] ss:$16 sps:$4 sm:$0xff]   ;;  %v9871_v40 = vld [vmem:[#allocation8 + $0x8c8] ss:$16 sps:$4 sm:$0xff]  }
 0x4b7   : > { %v9876_v2 = vld [vmem:[#allocation8 + $0xacc] ss:$16 sps:$4 sm:$0xff]   ;;  %v9874_v28 = vld [vmem:[#allocation8 + $0xac8] ss:$16 sps:$4 sm:$0xff]  }
 0x4b8   : > { %v9879_v41 = vld [vmem:[#allocation8 + $0x8ec] ss:$16 sps:$4 sm:$0xff]   ;;  %v9877_v43 = vld [vmem:[#allocation8 + $0x8e8] ss:$16 sps:$4 sm:$0xff]  }
 0x4b9   : > { %v9882_v42 = vld [vmem:[#allocation8 + $0xaec] ss:$16 sps:$4 sm:$0xff]   ;;  %v9880_v56 = vld [vmem:[#allocation8 + $0xae8] ss:$16 sps:$4 sm:$0xff]  }
 0x4ba   : > { %v9885_v44 = vld [vmem:[#allocation8 + $0x90c] ss:$16 sps:$4 sm:$0xff]  }
 0x4bb   : > { %v9888_v58 = vld [vmem:[#allocation8 + $0xb0c] ss:$16 sps:$4 sm:$0xff]  }
 0x4bd   : > { %v10140_v45 = vpop.eup %10139 }
 0x4be   : > { %v10142_v15 = vpop.eup %10141  ;;  %v5137_v46 = vadd.f32 1.0, %v10140_v45  ;;  %v9883_v45 = vld [vmem:[#allocation8 + $0x908] ss:$16 sps:$4 sm:$0xff]  }
 0x4bf   : > { %v10144_v47 = vpop.eup %10143  ;;  %v5138_v53 = vadd.f32 1.0, %v10142_v15  ;;  %v9886_v15 = vld [vmem:[#allocation8 + $0xb08] ss:$16 sps:$4 sm:$0xff]  }
 0x4c0   : > { %v10146_v54 = vpop.eup %10145  ;;  %v5140_v59 = vadd.f32 1.0, %v10144_v47  ;;  %v5141_v61 = vmul.f32 %v5137_v46, %v5109_v63  ;;  %v9891_v63 = vld [vmem:[#allocation8 + $0x92c] ss:$16 sps:$4 sm:$0xff]   ;;  %v9889_v47 = vld [vmem:[#allocation8 + $0x928] ss:$16 sps:$4 sm:$0xff]  }
 0x4c1   : > { %v5142_v62 = vmul.f32 %v5138_v53, %v5110_v52  ;;  %v5139_v3 = vadd.f32 1.0, %v10146_v54  ;;  %v9894_v46 = vld [vmem:[#allocation8 + $0xb2c] ss:$16 sps:$4 sm:$0xff]   ;;  %v9892_v52 = vld [vmem:[#allocation8 + $0xb28] ss:$16 sps:$4 sm:$0xff]  }
 0x4c2   : > { %v5144_v14 = vmul.f32 %v5140_v59, %v5112_v55  ;;  %v10791_v39 = vpack.c.bf16 %v5141_v61, %v5141_v61  ;;  %v9897_v53 = vld [vmem:[#allocation8 + $0x94c] ss:$16 sps:$4 sm:$0xff]   ;;  %v9895_v55 = vld [vmem:[#allocation8 + $0x948] ss:$16 sps:$4 sm:$0xff]  }
 0x4c3   : > { %v5146_v9 = vpack.c.bf16 %v5142_v62, %v5142_v62  ;;  %v5143_v4 = vmul.f32 %v5139_v3, %v5111_v0  ;;  %v9900_v54 = vld [vmem:[#allocation8 + $0xb4c] ss:$16 sps:$4 sm:$0xff]   ;;  %v9898_v59 = vld [vmem:[#allocation8 + $0xb48] ss:$16 sps:$4 sm:$0xff]  }
 0x4c4   : > { %v5148_v11 = vpack.c.bf16 %v5144_v14, %v5144_v14  ;;  %v9903_v61 = vld [vmem:[#allocation8 + $0x96c] ss:$16 sps:$4 sm:$0xff]   ;;  %v9901_v0 = vld [vmem:[#allocation8 + $0x968] ss:$16 sps:$4 sm:$0xff]  }
 0x4c5   : > { %5949 = vmatprep.mubr.bf16.mxu0 %v5146_v9  ;;  %v10793_v16 = vpack.c.bf16 %v5143_v4, %v5143_v4  ;;  %v9906_v62 = vld [vmem:[#allocation8 + $0xb6c] ss:$16 sps:$4 sm:$0xff]   ;;  %v9904_v3 = vld [vmem:[#allocation8 + $0xb68] ss:$16 sps:$4 sm:$0xff]  }
 0x4c6   : > { %5990 = vmatprep.mubr.bf16.mxu1 %v5148_v11  ;;  %5950 = vmatmul.mubr.bf16.vlgmr.msra.gmra.mrb[28].mxu0 %v10791_v39  ;;  %v9909_v14 = vld [vmem:[#allocation8 + $0x98c] ss:$16 sps:$4 sm:$0xff]   ;;  %v9910_v4 = vld [vmem:[#allocation8 + $0xb88] ss:$16 sps:$4 sm:$0xff]  }
 0x4c7   : > { %5991 = vmatmul.mubr.bf16.vlgmr.msra.gmra.mrb[28].mxu1 %v10793_v16  ;;  %6000 = vmatpush1.bf16.msra.mxu0 %v9835_v10  ;;  %v9907_v10 = vld [vmem:[#allocation8 + $0x988] ss:$16 sps:$4 sm:$0xff]  }
 0x4c8   : > { %6041 = vmatpush1.bf16.msra.mxu1 %v9838_v5  ;;  %6031 = vmatprep.mubr.bf16.mxu0 %v5146_v9  ;;  %v9912_v9 = vld [vmem:[#allocation8 + $0xb8c] ss:$16 sps:$4 sm:$0xff]  }
 0x4c9   : > { %6072 = vmatprep.mubr.bf16.mxu1 %v5148_v11  ;;  %6001 = vmatprep.subr.bf16.mxu0 %v9843_v33  ;;  %v9915_v11 = vld [vmem:[#allocation8 + $0x9ac] ss:$16 sps:$4 sm:$0xff]   ;;  %v9913_v33 = vld [vmem:[#allocation8 + $0x9a8] ss:$16 sps:$4 sm:$0xff]  }
 0x4ca   : > { %6042 = vmatprep.subr.bf16.mxu1 %v9846_v17  ;;  %v9918_v5 = vld [vmem:[#allocation8 + $0xbac] ss:$16 sps:$4 sm:$0xff]   ;;  %v9916_v17 = vld [vmem:[#allocation8 + $0xba8] ss:$16 sps:$4 sm:$0xff]  }
 0x4cb   : > { %6002 = vmatpush1.bf16.msra.mxu0 %v9841_v1  ;;  %v9921_v1 = vld [vmem:[#allocation8 + $0x9cc] ss:$16 sps:$4 sm:$0xff]  }
 0x4cc   : > { %6043 = vmatpush1.bf16.msra.mxu1 %v9844_v18  ;;  %6003 = vmatprep.subr.bf16.mxu0 %v9849_v19  ;;  %v9924_v18 = vld [vmem:[#allocation8 + $0xbcc] ss:$16 sps:$4 sm:$0xff]   ;;  %v9919_v19 = vld [vmem:[#allocation8 + $0x9c8] ss:$16 sps:$4 sm:$0xff]  }
 0x4cd   : > { %6044 = vmatprep.subr.bf16.mxu1 %v9852_v20  ;;  %v9922_v20 = vld [vmem:[#allocation8 + $0xbc8] ss:$16 sps:$4 sm:$0xff]  }
 0x4cf   : > { %6004 = vmatpush1.bf16.msra.mxu0 %v9847_v21  ;;  %v9927_v21 = vld [vmem:[#allocation8 + $0x9ec] ss:$16 sps:$4 sm:$0xff]  }
 0x4d0   : > { %6045 = vmatpush1.bf16.msra.mxu1 %v9850_v22  ;;  %6005 = vmatprep.subr.bf16.mxu0 %v9855_v25  ;;  %v9930_v22 = vld [vmem:[#allocation8 + $0xbec] ss:$16 sps:$4 sm:$0xff]   ;;  %v6085_v25 = vld [vmem:[#allocation5 + $0x30] sm:$0xff] }
 0x4d1   : > { %6046 = vmatprep.subr.bf16.mxu1 %v9858_v27  ;;  %v6087_v27 = vld [vmem:[#allocation5 + $0x70] sm:$0xff] }
 0x4d3   : > { %6006 = vmatpush1.bf16.msra.mxu0 %v9853_v29  ;;  %v6086_v29 = vld [vmem:[#allocation5 + $0x38] sm:$0xff] }
 0x4d4   : > { %6047 = vmatpush1.bf16.msra.mxu1 %v9856_v30  ;;  %6007 = vmatprep.subr.bf16.mxu0 %v9861_v32  ;;  %v6088_v30 = vld [vmem:[#allocation5 + $0x78] sm:$0xff] }
 0x4d5   : > { %6048 = vmatprep.subr.bf16.mxu1 %v9864_v26  ;;  %v9925_v32 = vld [vmem:[#allocation8 + $0x9e8] ss:$16 sps:$4 sm:$0xff]  }
 0x4d6   : > { %v9928_v26 = vld [vmem:[#allocation8 + $0xbe8] ss:$16 sps:$4 sm:$0xff]  }
 0x4d7   : > { %6008 = vmatpush1.bf16.msra.mxu0 %v9859_v6  ;;  %v8954_v6 = vcombine.high %v6085_v25, %v6087_v27 }
 0x4d8   : > { %6049 = vmatpush1.bf16.msra.mxu1 %v9862_v35  ;;  %6009 = vmatprep.subr.bf16.mxu0 %v9867_v36  ;;  %v8956_v35 = vcombine.high %v6086_v29, %v6088_v30  ;;  %v6089_v36 = vld [vmem:[#allocation5 + $0xb0] sm:$0xff] }
 0x4d9   : > { %6050 = vmatprep.subr.bf16.mxu1 %v9870_v7  ;;  %v6091_v7 = vld [vmem:[#allocation5 + $0xf0] sm:$0xff] }
 0x4db   : > { %6010 = vmatpush1.bf16.msra.mxu0 %v9865_v37  ;;  %v6090_v37 = vld [vmem:[#allocation5 + $0xb8] sm:$0xff] }
 0x4dc   : > { %6051 = vmatpush1.bf16.msra.mxu1 %v9868_v60  ;;  %6011 = vmatprep.subr.bf16.mxu0 %v9873_v38  ;;  %v6092_v60 = vld [vmem:[#allocation5 + $0xf8] sm:$0xff]  ;;  %v8953_v38 = vcombine.low %v6085_v25, %v6087_v27 }
 0x4dd   : > { %6052 = vmatprep.subr.bf16.mxu1 %v9876_v2  ;;  %v8955_v2 = vcombine.low %v6086_v29, %v6088_v30  ;;  %v6113_v30 = vld [vmem:[#allocation5 + $0x3b0] sm:$0xff] }
 0x4df   : > { %6012 = vmatpush1.bf16.msra.mxu0 %v9871_v40  ;;  %v8958_v40 = vcombine.high %v6089_v36, %v6091_v7 }
 0x4e0   : > { %6053 = vmatpush1.bf16.msra.mxu1 %v9874_v28  ;;  %6013 = vmatprep.subr.bf16.mxu0 %v9879_v41  ;;  %v8960_v28 = vcombine.high %v6090_v37, %v6092_v60  ;;  %v6093_v41 = vld [vmem:[#allocation5 + $0x130] sm:$0xff] }
 0x4e1   : > { %6054 = vmatprep.subr.bf16.mxu1 %v9882_v42  ;;  %v6095_v42 = vld [vmem:[#allocation5 + $0x170] sm:$0xff] }
 0x4e3   : > { %6014 = vmatpush1.bf16.msra.mxu0 %v9877_v43  ;;  %v6094_v43 = vld [vmem:[#allocation5 + $0x138] sm:$0xff] }
 0x4e4   : > { %6055 = vmatpush1.bf16.msra.mxu1 %v9880_v56  ;;  %6015 = vmatprep.subr.bf16.mxu0 %v9885_v44  ;;  %v6096_v56 = vld [vmem:[#allocation5 + $0x178] sm:$0xff]  ;;  %v8957_v44 = vcombine.low %v6089_v36, %v6091_v7 }
 0x4e5   : > { %6056 = vmatprep.subr.bf16.mxu1 %v9888_v58  ;;  %v8959_v58 = vcombine.low %v6090_v37, %v6092_v60  ;;  %v6117_v60 = vld [vmem:[#allocation5 + $0x430] sm:$0xff] }
 0x4e7   : > { %6016 = vmatpush1.bf16.msra.mxu0 %v9883_v45  ;;  %v8962_v45 = vcombine.high %v6093_v41, %v6095_v42 }
 0x4e8   : > { %6057 = vmatpush1.bf16.msra.mxu1 %v9886_v15  ;;  %6017 = vmatprep.subr.bf16.mxu0 %v9891_v63  ;;  %v8964_v15 = vcombine.high %v6094_v43, %v6096_v56  ;;  %v6097_v63 = vld [vmem:[#allocation5 + $0x1b0] sm:$0xff] }
 0x4e9   : > { %6058 = vmatprep.subr.bf16.mxu1 %v9894_v46  ;;  %v6099_v46 = vld [vmem:[#allocation5 + $0x1f0] sm:$0xff] }
 0x4eb   : > { %6018 = vmatpush1.bf16.msra.mxu0 %v9889_v47  ;;  %v6098_v47 = vld [vmem:[#allocation5 + $0x1b8] sm:$0xff] }
 0x4ec   : > { %6059 = vmatpush1.bf16.msra.mxu1 %v9892_v52  ;;  %6019 = vmatprep.subr.bf16.mxu0 %v9897_v53  ;;  %v6100_v52 = vld [vmem:[#allocation5 + $0x1f8] sm:$0xff]  ;;  %v8966_v53 = vcombine.high %v6097_v63, %v6099_v46 }
 0x4ed   : > { %6060 = vmatprep.subr.bf16.mxu1 %v9900_v54  ;;  %v8968_v54 = vcombine.high %v6098_v47, %v6100_v52 }
 0x4ef   : > { %6020 = vmatpush1.bf16.msra.mxu0 %v9895_v55  ;;  %v6101_v55 = vld [vmem:[#allocation5 + $0x230] sm:$0xff] }
 0x4f0   : > { %6061 = vmatpush1.bf16.msra.mxu1 %v9898_v59  ;;  %6021 = vmatprep.subr.bf16.mxu0 %v9903_v61  ;;  %v6103_v59 = vld [vmem:[#allocation5 + $0x270] sm:$0xff]  ;;  %v6102_v61 = vld [vmem:[#allocation5 + $0x238] sm:$0xff] }
 0x4f1   : > { %6062 = vmatprep.subr.bf16.mxu1 %v9906_v62  ;;  %v6104_v62 = vld [vmem:[#allocation5 + $0x278] sm:$0xff] }
 0x4f3   : > { %6022 = vmatpush1.bf16.msra.mxu0 %v9901_v0  ;;  %v8965_v0 = vcombine.low %v6097_v63, %v6099_v46 }
 0x4f4   : > { %6063 = vmatpush1.bf16.msra.mxu1 %v9904_v3  ;;  %6023 = vmatprep.subr.bf16.mxu0 %v9909_v14  ;;  %v8967_v3 = vcombine.low %v6098_v47, %v6100_v52  ;;  %v8970_v14 = vcombine.high %v6101_v55, %v6103_v59  ;;  %v6125_v52 = vld [vmem:[#allocation5 + $0x530] sm:$0xff] }
 0x4f5   : > { %6064 = vmatprep.subr.bf16.mxu1 %v9912_v9  ;;  %v6105_v9 = vld [vmem:[#allocation5 + $0x2b0] sm:$0xff] }
 0x4f7   : > { %6024 = vmatpush1.bf16.msra.mxu0 %v9907_v10  ;;  %v6107_v10 = vld [vmem:[#allocation5 + $0x2f0] sm:$0xff] }
 0x4f8   : > { %6065 = vmatpush1.bf16.msra.mxu1 %v9910_v4  ;;  %6025 = vmatprep.subr.bf16.mxu0 %v9915_v11  ;;  %v6106_v4 = vld [vmem:[#allocation5 + $0x2b8] sm:$0xff] }
 0x4f9   : > { %6066 = vmatprep.subr.bf16.mxu1 %v9918_v5  ;;  %v6108_v11 = vld [vmem:[#allocation5 + $0x2f8] sm:$0xff]  ;;  %v8969_v5 = vcombine.low %v6101_v55, %v6103_v59 }
 0x4fa   : > { %v8975_v25 = vcombine.low %v6106_v4, %v6108_v11 }
 0x4fb   : > { %6026 = vmatpush1.bf16.msra.mxu0 %v9913_v33  ;;  %v8971_v33 = vcombine.low %v6102_v61, %v6104_v62 }
 0x4fc   : > { %6067 = vmatpush1.bf16.msra.mxu1 %v9916_v17  ;;  %6027 = vmatprep.subr.bf16.mxu0 %v9921_v1  ;;  %v8974_v17 = vcombine.high %v6105_v9, %v6107_v10  ;;  %v8976_v1 = vcombine.high %v6106_v4, %v6108_v11  ;;  %v6133_v11 = vld [vmem:[#allocation5 + $0x630] sm:$0xff] }
 0x4fd   : > { %6068 = vmatprep.subr.bf16.mxu1 %v9924_v18  ;;  %v6109_v18 = vld [vmem:[#allocation5 + $0x330] sm:$0xff] }
 0x4ff   : > { %6028 = vmatpush1.bf16.msra.mxu0 %v9919_v19  ;;  %v6111_v19 = vld [vmem:[#allocation5 + $0x370] sm:$0xff] }
 0x500   : > { %6069 = vmatpush1.bf16.msra.mxu1 %v9922_v20  ;;  %6029 = vmatprep.subr.bf16.mxu0 %v9927_v21  ;;  %v6110_v20 = vld [vmem:[#allocation5 + $0x338] sm:$0xff]  ;;  %v8978_v27 = vcombine.high %v6109_v18, %v6111_v19 }
 0x501   : > { %6070 = vmatprep.subr.bf16.mxu1 %v9930_v22  ;;  %v6112_v21 = vld [vmem:[#allocation5 + $0x378] sm:$0xff]  ;;  %v8973_v22 = vcombine.low %v6105_v9, %v6107_v10 }
 0x502   : > { %v8980_v29 = vcombine.high %v6110_v20, %v6112_v21  ;;  %v8979_v36 = vcombine.low %v6110_v20, %v6112_v21  ;;  %v6137_v21 = vld [vmem:[#allocation5 + $0x6b0] sm:$0xff] }
 0x503   : > { %6030 = vmatpush1.bf16.msra.mxu0 %v9925_v32  ;;  %v6115_v32 = vld [vmem:[#allocation5 + $0x3f0] sm:$0xff] }
 0x504   : > { %6071 = vmatpush1.bf16.msra.mxu1 %v9928_v26  ;;  %6875 = vmatprep.subr.bf16.mxu0 %v8954_v6  ;;  %v6114_v26 = vld [vmem:[#allocation5 + $0x3b8] sm:$0xff]  ;;  %v8982_v7 = vcombine.high %v6113_v30, %v6115_v32 }
 0x505   : > { %6957 = vmatprep.subr.bf16.mxu1 %v8956_v35  ;;  %v6116_v6 = vld [vmem:[#allocation5 + $0x3f8] sm:$0xff]  ;;  %v8977_v35 = vcombine.low %v6109_v18, %v6111_v19 }
 0x506   : > { %6032 = vmatmul.mubr.bf16.vlgmr.msra.gmra.mrb[32].mxu0 %v10791_v39  ;;  %v8961_v39 = vcombine.low %v6093_v41, %v6095_v42  ;;  %v8984_v37 = vcombine.high %v6114_v26, %v6116_v6  ;;  %v8983_v41 = vcombine.low %v6114_v26, %v6116_v6  ;;  %v6141_v6 = vld [vmem:[#allocation5 + $0x730] sm:$0xff] }
 0x507   : > { %6073 = vmatmul.mubr.bf16.vlgmr.msra.gmra.mrb[32].mxu1 %v10793_v16  ;;  %6876 = vmatpush1.bf16.msra.mxu0 %v8953_v38  ;;  %v8963_v16 = vcombine.low %v6094_v43, %v6096_v56  ;;  %v6119_v38 = vld [vmem:[#allocation5 + $0x470] sm:$0xff] }
 0x508   : > { %6958 = vmatpush1.bf16.msra.mxu1 %v8955_v2  ;;  %6877 = vmatprep.subr.bf16.mxu0 %v8958_v40  ;;  %v6118_v2 = vld [vmem:[#allocation5 + $0x438] sm:$0xff]  ;;  %v8986_v42 = vcombine.high %v6117_v60, %v6119_v38  ;;  %v6121_v56 = vld [vmem:[#allocation5 + $0x4b0] sm:$0xff] }
 0x509   : > { %6959 = vmatprep.subr.bf16.mxu1 %v8960_v28  ;;  %6907 = vmatprep.mubr.bf16.mxu0 %v10646_v57  ;;  %v6120_v40 = vld [vmem:[#allocation5 + $0x478] sm:$0xff]  ;;  %v8981_v28 = vcombine.low %v6113_v30, %v6115_v32 }
 0x50a   : > { %6989 = vmatprep.mubr.bf16.mxu1 %v10646_v57  ;;  %v8972_v57 = vcombine.high %v6102_v61, %v6104_v62  ;;  %v8988_v43 = vcombine.high %v6118_v2, %v6120_v40  ;;  %v8987_v63 = vcombine.low %v6118_v2, %v6120_v40  ;;  %v6129_v62 = vld [vmem:[#allocation5 + $0x5b0] sm:$0xff] }
 0x50b   : > { %6878 = vmatpush1.bf16.msra.mxu0 %v8957_v44  ;;  %v6123_v44 = vld [vmem:[#allocation5 + $0x4f0] sm:$0xff] }
 0x50c   : > { %6960 = vmatpush1.bf16.msra.mxu1 %v8959_v58  ;;  %6879 = vmatprep.subr.bf16.mxu0 %v8962_v45  ;;  %v6122_v58 = vld [vmem:[#allocation5 + $0x4b8] sm:$0xff]  ;;  %v8990_v46 = vcombine.high %v6121_v56, %v6123_v44  ;;  %v6145_v40 = vld [vmem:[#allocation5 + $0x7b0] sm:$0xff] }
 0x50d   : > { %6961 = vmatprep.subr.bf16.mxu1 %v8964_v15  ;;  %v6124_v45 = vld [vmem:[#allocation5 + $0x4f8] sm:$0xff]  ;;  %v8985_v15 = vcombine.low %v6117_v60, %v6119_v38 }
 0x50e   : > { %v8992_v47 = vcombine.high %v6122_v58, %v6124_v45  ;;  %v8991_v55 = vcombine.low %v6122_v58, %v6124_v45  ;;  %v6149_v45 = vld [vmem:[#allocation5 + $0x830] sm:$0xff] }
 0x50f   : > { %6880 = vmatpush1.bf16.msra.mxu0 %v8961_v39  ;;  %v6127_v39 = vld [vmem:[#allocation5 + $0x570] sm:$0xff] }
 0x510   : > { %6962 = vmatpush1.bf16.msra.mxu1 %v8963_v16  ;;  %6881 = vmatprep.subr.bf16.mxu0 %v8966_v53  ;;  %v6126_v16 = vld [vmem:[#allocation5 + $0x538] sm:$0xff]  ;;  %v8994_v59 = vcombine.high %v6125_v52, %v6127_v39 }
 0x511   : > { %6963 = vmatprep.subr.bf16.mxu1 %v8968_v54  ;;  %v6128_v53 = vld [vmem:[#allocation5 + $0x578] sm:$0xff]  ;;  %v8989_v54 = vcombine.low %v6121_v56, %v6123_v44 }
 0x512   : > { %v8996_v61 = vcombine.high %v6126_v16, %v6128_v53  ;;  %v8995_v9 = vcombine.low %v6126_v16, %v6128_v53  ;;  %v6153_v53 = vld [vmem:[#allocation5 + $0x8b0] sm:$0xff] }
 0x513   : > { %6882 = vmatpush1.bf16.msra.mxu0 %v8965_v0  ;;  %v6131_v0 = vld [vmem:[#allocation5 + $0x5f0] sm:$0xff] }
 0x514   : > { %6964 = vmatpush1.bf16.msra.mxu1 %v8967_v3  ;;  %6883 = vmatprep.subr.bf16.mxu0 %v8970_v14  ;;  %v6130_v3 = vld [vmem:[#allocation5 + $0x5b8] sm:$0xff]  ;;  %v8998_v10 = vcombine.high %v6129_v62, %v6131_v0 }
 0x515   : > { %6965 = vmatprep.subr.bf16.mxu1 %v8972_v57  ;;  %v6132_v14 = vld [vmem:[#allocation5 + $0x5f8] sm:$0xff]  ;;  %v8993_v57 = vcombine.low %v6125_v52, %v6127_v39 }
 0x516   : > { %v9000_v4 = vcombine.high %v6130_v3, %v6132_v14  ;;  %v8999_v18 = vcombine.low %v6130_v3, %v6132_v14  ;;  %v6157_v14 = vld [vmem:[#allocation5 + $0x930] sm:$0xff] }
 0x517   : > { %6884 = vmatpush1.bf16.msra.mxu0 %v8969_v5  ;;  %v6135_v5 = vld [vmem:[#allocation5 + $0x670] sm:$0xff] }
 0x518   : > { %6966 = vmatpush1.bf16.msra.mxu1 %v8971_v33  ;;  %6885 = vmatprep.subr.bf16.mxu0 %v8974_v17  ;;  %v6134_v33 = vld [vmem:[#allocation5 + $0x638] sm:$0xff]  ;;  %v9002_v19 = vcombine.high %v6133_v11, %v6135_v5 }
 0x519   : > { %6967 = vmatprep.subr.bf16.mxu1 %v8976_v1  ;;  %v6136_v17 = vld [vmem:[#allocation5 + $0x678] sm:$0xff]  ;;  %v8997_v1 = vcombine.low %v6129_v62, %v6131_v0 }
 0x51a   : > { %v9004_v20 = vcombine.high %v6134_v33, %v6136_v17  ;;  %v9003_v30 = vcombine.low %v6134_v33, %v6136_v17  ;;  %v6161_v17 = vld [vmem:[#allocation5 + $0x9b0] sm:$0xff] }
 0x51b   : > { %6886 = vmatpush1.bf16.msra.mxu0 %v8973_v22  ;;  %v6139_v22 = vld [vmem:[#allocation5 + $0x6f0] sm:$0xff] }
 0x51c   : > { %6968 = vmatpush1.bf16.msra.mxu1 %v8975_v25  ;;  %6887 = vmatprep.subr.bf16.mxu0 %v8978_v27  ;;  %v6138_v25 = vld [vmem:[#allocation5 + $0x6b8] sm:$0xff]  ;;  %v9006_v32 = vcombine.high %v6137_v21, %v6139_v22 }
 0x51d   : > { %6969 = vmatprep.subr.bf16.mxu1 %v8980_v29  ;;  %v6140_v27 = vld [vmem:[#allocation5 + $0x6f8] sm:$0xff]  ;;  %v9001_v29 = vcombine.low %v6133_v11, %v6135_v5 }
 0x51e   : > { %v9008_v26 = vcombine.high %v6138_v25, %v6140_v27  ;;  %v9007_v60 = vcombine.low %v6138_v25, %v6140_v27  ;;  %v6165_v25 = vld [vmem:[#allocation5 + $0xa30] sm:$0xff] }
 0x51f   : > { %6888 = vmatpush1.bf16.msra.mxu0 %v8977_v35  ;;  %v6143_v35 = vld [vmem:[#allocation5 + $0x770] sm:$0xff] }
 0x520   : > { %6970 = vmatpush1.bf16.msra.mxu1 %v8979_v36  ;;  %6889 = vmatprep.subr.bf16.mxu0 %v8982_v7  ;;  %v6142_v36 = vld [vmem:[#allocation5 + $0x738] sm:$0xff]  ;;  %v9010_v38 = vcombine.high %v6141_v6, %v6143_v35  ;;  %v6167_v27 = vld [vmem:[#allocation5 + $0xa70] sm:$0xff] }
 0x521   : > { %6971 = vmatprep.subr.bf16.mxu1 %v8984_v37  ;;  %v6144_v7 = vld [vmem:[#allocation5 + $0x778] sm:$0xff]  ;;  %v9005_v37 = vcombine.low %v6137_v21, %v6139_v22 }
 0x522   : > { %v9012_v2 = vcombine.high %v6142_v36, %v6144_v7  ;;  %v9011_v56 = vcombine.low %v6142_v36, %v6144_v7  ;;  %v6171_v36 = vld [vmem:[#allocation5 + $0xaf0] sm:$0xff]  ;;  %v6170_v7 = vld [vmem:[#allocation5 + $0xab8] sm:$0xff] }
 0x523   : > { %6890 = vmatpush1.bf16.msra.mxu0 %v8981_v28  ;;  %v6147_v28 = vld [vmem:[#allocation5 + $0x7f0] sm:$0xff] }
 0x524   : > { %6972 = vmatpush1.bf16.msra.mxu1 %v8983_v41  ;;  %6891 = vmatprep.subr.bf16.mxu0 %v8986_v42  ;;  %v6146_v41 = vld [vmem:[#allocation5 + $0x7b8] sm:$0xff]  ;;  %v9014_v44 = vcombine.high %v6145_v40, %v6147_v28 }
 0x525   : > { %6973 = vmatprep.subr.bf16.mxu1 %v8988_v43  ;;  %v6148_v42 = vld [vmem:[#allocation5 + $0x7f8] sm:$0xff]  ;;  %v9009_v43 = vcombine.low %v6141_v6, %v6143_v35  ;;  %v9034_v6 = vcombine.high %v6165_v25, %v6167_v27  ;;  %v6169_v35 = vld [vmem:[#allocation5 + $0xab0] sm:$0xff] }
 0x526   : > { %v9016_v58 = vcombine.high %v6146_v41, %v6148_v42  ;;  %v9015_v52 = vcombine.low %v6146_v41, %v6148_v42  ;;  %v6175_v41 = vld [vmem:[#allocation5 + $0xb70] sm:$0xff]  ;;  %v6174_v42 = vld [vmem:[#allocation5 + $0xb38] sm:$0xff] }
 0x527   : > { %6892 = vmatpush1.bf16.msra.mxu0 %v8985_v15  ;;  %v6151_v15 = vld [vmem:[#allocation5 + $0x870] sm:$0xff] }
 0x528   : > { %6974 = vmatpush1.bf16.msra.mxu1 %v8987_v63  ;;  %6893 = vmatprep.subr.bf16.mxu0 %v8990_v46  ;;  %v6150_v63 = vld [vmem:[#allocation5 + $0x838] sm:$0xff]  ;;  %v9018_v39 = vcombine.high %v6149_v45, %v6151_v15 }
 0x529   : > { %6975 = vmatprep.subr.bf16.mxu1 %v8992_v47  ;;  %v6152_v46 = vld [vmem:[#allocation5 + $0x878] sm:$0xff]  ;;  %v9013_v47 = vcombine.low %v6145_v40, %v6147_v28  ;;  %v6173_v28 = vld [vmem:[#allocation5 + $0xb30] sm:$0xff] }
 0x52a   : > { %v9020_v16 = vcombine.high %v6150_v63, %v6152_v46  ;;  %v9019_v62 = vcombine.low %v6150_v63, %v6152_v46  ;;  %v6179_v63 = vld [vmem:[#allocation5 + $0xbf0] sm:$0xff]  ;;  %v6178_v46 = vld [vmem:[#allocation5 + $0xbb8] sm:$0xff] }
 0x52b   : > { %6894 = vmatpush1.bf16.msra.mxu0 %v8989_v54  ;;  %v6155_v54 = vld [vmem:[#allocation5 + $0x8f0] sm:$0xff] }
 0x52c   : > { %6976 = vmatpush1.bf16.msra.mxu1 %v8991_v55  ;;  %6895 = vmatprep.subr.bf16.mxu0 %v8994_v59  ;;  %v6154_v55 = vld [vmem:[#allocation5 + $0x8b8] sm:$0xff]  ;;  %v9022_v0 = vcombine.high %v6153_v53, %v6155_v54 }
 0x52d   : > { %6977 = vmatprep.subr.bf16.mxu1 %v8996_v61  ;;  %v6156_v59 = vld [vmem:[#allocation5 + $0x8f8] sm:$0xff]  ;;  %v9017_v61 = vcombine.low %v6149_v45, %v6151_v15  ;;  %v6177_v15 = vld [vmem:[#allocation5 + $0xbb0] sm:$0xff] }
 0x52e   : > { %v9024_v3 = vcombine.high %v6154_v55, %v6156_v59  ;;  %v9023_v11 = vcombine.low %v6154_v55, %v6156_v59  ;;  %v6183_v55 = vld [vmem:[#allocation5 + $0xc70] sm:$0xff]  ;;  %v6182_v59 = vld [vmem:[#allocation5 + $0xc38] sm:$0xff] }
 0x52f   : > { %6896 = vmatpush1.bf16.msra.mxu0 %v8993_v57  ;;  %v6159_v57 = vld [vmem:[#allocation5 + $0x970] sm:$0xff] }
 0x530   : > { %6978 = vmatpush1.bf16.msra.mxu1 %v8995_v9  ;;  %6897 = vmatprep.subr.bf16.mxu0 %v8998_v10  ;;  %v6158_v9 = vld [vmem:[#allocation5 + $0x938] sm:$0xff]  ;;  %v9026_v5 = vcombine.high %v6157_v14, %v6159_v57 }
 0x531   : > { %6979 = vmatprep.subr.bf16.mxu1 %v9000_v4  ;;  %v6160_v10 = vld [vmem:[#allocation5 + $0x978] sm:$0xff]  ;;  %v9021_v4 = vcombine.low %v6153_v53, %v6155_v54  ;;  %v6181_v54 = vld [vmem:[#allocation5 + $0xc30] sm:$0xff] }
 0x532   : > { %v9028_v33 = vcombine.high %v6158_v9, %v6160_v10 }
 0x533   : > { %6898 = vmatpush1.bf16.msra.mxu0 %v8997_v1  ;;  %v6163_v1 = vld [vmem:[#allocation5 + $0x9f0] sm:$0xff] }
 0x534   : > { %6980 = vmatpush1.bf16.msra.mxu1 %v8999_v18  ;;  %6899 = vmatprep.subr.bf16.mxu0 %v9002_v19  ;;  %v6162_v18 = vld [vmem:[#allocation5 + $0x9b8] sm:$0xff]  ;;  %v9030_v21 = vcombine.high %v6161_v17, %v6163_v1 }
 0x535   : > { %6981 = vmatprep.subr.bf16.mxu1 %v9004_v20  ;;  %v6164_v19 = vld [vmem:[#allocation5 + $0x9f8] sm:$0xff]  ;;  %v9025_v20 = vcombine.low %v6157_v14, %v6159_v57  ;;  %v6185_v57 = vld [vmem:[#allocation5 + $0xcb0] sm:$0xff] }
 0x536   : > { %v9032_v22 = vcombine.high %v6162_v18, %v6164_v19 }
 0x537   : > { %6900 = vmatpush1.bf16.msra.mxu0 %v9001_v29  ;;  %v6166_v29 = vld [vmem:[#allocation5 + $0xa38] sm:$0xff] }
 0x538   : > { %6982 = vmatpush1.bf16.msra.mxu1 %v9003_v30  ;;  %6901 = vmatprep.subr.bf16.mxu0 %v9006_v32  ;;  %v6168_v30 = vld [vmem:[#allocation5 + $0xa78] sm:$0xff]  ;;  %v9029_v32 = vcombine.low %v6161_v17, %v6163_v1  ;;  %v6189_v1 = vld [vmem:[#allocation5 + $0xd30] sm:$0xff] }
 0x539   : > { %6983 = vmatprep.subr.bf16.mxu1 %v9008_v26  ;;  %v9031_v26 = vcombine.low %v6162_v18, %v6164_v19  ;;  %v6191_v18 = vld [vmem:[#allocation5 + $0xd70] sm:$0xff]  ;;  %v6190_v19 = vld [vmem:[#allocation5 + $0xd38] sm:$0xff] }
 0x53b   : > { %6902 = vmatpush1.bf16.msra.mxu0 %v9005_v37  ;;  %v6172_v37 = vld [vmem:[#allocation5 + $0xaf8] sm:$0xff] }
 0x53c   : > { %6984 = vmatpush1.bf16.msra.mxu1 %v9007_v60  ;;  %6903 = vmatprep.subr.bf16.mxu0 %v9010_v38  ;;  %v9033_v60 = vcombine.low %v6165_v25, %v6167_v27  ;;  %v9035_v38 = vcombine.low %v6166_v29, %v6168_v30  ;;  %v9040_v40 = vcombine.high %v6170_v7, %v6172_v37  ;;  %v6193_v27 = vld [vmem:[#allocation5 + $0xdb0] sm:$0xff] }
 0x53d   : > { %6985 = vmatprep.subr.bf16.mxu1 %v9012_v2  ;;  %v9038_v2 = vcombine.high %v6169_v35, %v6171_v36 }
 0x53f   : > { %6904 = vmatpush1.bf16.msra.mxu0 %v9009_v43  ;;  %v6176_v43 = vld [vmem:[#allocation5 + $0xb78] sm:$0xff] }
 0x540   : > { %6986 = vmatpush1.bf16.msra.mxu1 %v9011_v56  ;;  %6905 = vmatprep.subr.bf16.mxu0 %v9014_v44  ;;  %v9037_v56 = vcombine.low %v6169_v35, %v6171_v36  ;;  %v9039_v44 = vcombine.low %v6170_v7, %v6172_v37  ;;  %v9044_v45 = vcombine.high %v6174_v42, %v6176_v43  ;;  %v6197_v36 = vld [vmem:[#allocation5 + $0xe30] sm:$0xff]  ;;  %v6198_v37 = vld [vmem:[#allocation5 + $0xe38] sm:$0xff] }
 0x541   : > { %6987 = vmatprep.subr.bf16.mxu1 %v9016_v58  ;;  %v9042_v58 = vcombine.high %v6173_v28, %v6175_v41  ;;  %v6199_v7 = vld [vmem:[#allocation5 + $0xe70] sm:$0xff] }
 0x543   : > { %6906 = vmatpush1.bf16.msra.mxu0 %v9013_v47  ;;  %v6180_v47 = vld [vmem:[#allocation5 + $0xbf8] sm:$0xff] }
 0x544   : > { %6988 = vmatpush1.bf16.msra.mxu1 %v9015_v52  ;;  %6916 = vmatprep.subr.bf16.mxu0 %v9018_v39  ;;  %v9041_v52 = vcombine.low %v6173_v28, %v6175_v41  ;;  %v9043_v39 = vcombine.low %v6174_v42, %v6176_v43  ;;  %v9048_v53 = vcombine.high %v6178_v46, %v6180_v47  ;;  %v6201_v41 = vld [vmem:[#allocation5 + $0xeb0] sm:$0xff]  ;;  %v6202_v43 = vld [vmem:[#allocation5 + $0xeb8] sm:$0xff] }
 0x545   : > { %6998 = vmatprep.subr.bf16.mxu1 %v9020_v16  ;;  %v9046_v16 = vcombine.high %v6177_v15, %v6179_v63  ;;  %v6203_v42 = vld [vmem:[#allocation5 + $0xef0] sm:$0xff] }
 0x546   : > { %6908 = vmatmul.mubr.bf16.vlgmr.msra.gmra.mrb[36].mxu0 %v10651_v12 }
 0x547   : > { %6917 = vmatpush1.bf16.msra.mxu0 %v9017_v61  ;;  %6990 = vmatmul.mubr.bf16.vlgmr.msra.gmra.mrb[36].mxu1 %v10651_v12  ;;  %v9027_v12 = vcombine.low %v6158_v9, %v6160_v10  ;;  %v6184_v61 = vld [vmem:[#allocation5 + $0xc78] sm:$0xff]  ;;  %v6187_v9 = vld [vmem:[#allocation5 + $0xcf0] sm:$0xff] }
 0x548   : > { %6999 = vmatpush1.bf16.msra.mxu1 %v9019_v62  ;;  %6918 = vmatprep.subr.bf16.mxu0 %v9022_v0  ;;  %v9045_v62 = vcombine.low %v6177_v15, %v6179_v63  ;;  %v9047_v0 = vcombine.low %v6178_v46, %v6180_v47  ;;  %v9052_v14 = vcombine.high %v6182_v59, %v6184_v61  ;;  %v6186_v10 = vld [vmem:[#allocation5 + $0xcb8] sm:$0xff]  ;;  %v6205_v63 = vld [vmem:[#allocation5 + $0xf30] sm:$0xff] }
 0x549   : > { %7000 = vmatprep.subr.bf16.mxu1 %v9024_v3  ;;  %6948 = vmatprep.mubr.bf16.mxu0 %v10654_v24  ;;  %v9050_v3 = vcombine.high %v6181_v54, %v6183_v55  ;;  %v6207_v46 = vld [vmem:[#allocation5 + $0xf70] sm:$0xff]  ;;  %v6206_v47 = vld [vmem:[#allocation5 + $0xf38] sm:$0xff] }
 0x54a   : > { %7030 = vmatprep.mubr.bf16.mxu1 %v10654_v24  ;;  %v9036_v24 = vcombine.high %v6166_v29, %v6168_v30  ;;  %v6195_v29 = vld [vmem:[#allocation5 + $0xdf0] sm:$0xff]  ;;  %v6194_v30 = vld [vmem:[#allocation5 + $0xdb8] sm:$0xff] }
 0x54b   : > { %6919 = vmatpush1.bf16.msra.mxu0 %v9021_v4  ;;  %v6188_v4 = vld [vmem:[#allocation5 + $0xcf8] sm:$0xff] }
 0x54c   : > { %7001 = vmatpush1.bf16.msra.mxu1 %v9023_v11  ;;  %6920 = vmatprep.subr.bf16.mxu0 %v9026_v5  ;;  %v9049_v11 = vcombine.low %v6181_v54, %v6183_v55  ;;  %v9051_v5 = vcombine.low %v6182_v59, %v6184_v61  ;;  %v9056_v17 = vcombine.high %v6186_v10, %v6188_v4  ;;  %v6209_v55 = vld [vmem:[#allocation5 + $0xfb0] sm:$0xff]  ;;  %v6210_v61 = vld [vmem:[#allocation5 + $0xfb8] sm:$0xff] }
 0x54d   : > { %7002 = vmatprep.subr.bf16.mxu1 %v9028_v33  ;;  %v9054_v33 = vcombine.high %v6185_v57, %v6187_v9  ;;  %v6211_v59 = vld [vmem:[#allocation5 + $0xff0] sm:$0xff] }
 0x54f   : > { %6921 = vmatpush1.bf16.msra.mxu0 %v9025_v20  ;;  %v6192_v20 = vld [vmem:[#allocation5 + $0xd78] sm:$0xff] }
 0x550   : > { %7003 = vmatpush1.bf16.msra.mxu1 %v9027_v12  ;;  %6922 = vmatprep.subr.bf16.mxu0 %v9030_v21  ;;  %v9053_v12 = vcombine.low %v6185_v57, %v6187_v9  ;;  %v9055_v21 = vcombine.low %v6186_v10, %v6188_v4  ;;  %v9060_v25 = vcombine.high %v6190_v19, %v6192_v20  ;;  %v9933_v4 = vld [vmem:[#allocation8 + $0xc04] ss:$16 sps:$4 sm:$0xff]  }
 0x551   : > { %7004 = vmatprep.subr.bf16.mxu1 %v9032_v22  ;;  %v9058_v22 = vcombine.high %v6189_v1, %v6191_v18  ;;  %v9077_v9 = vcombine.low %v6209_v55, %v6211_v59 }
 0x553   : > { %6923 = vmatpush1.bf16.msra.mxu0 %v9029_v32  ;;  %v6196_v32 = vld [vmem:[#allocation5 + $0xdf8] sm:$0xff] }
 0x554   : > { %7005 = vmatpush1.bf16.msra.mxu1 %v9031_v26  ;;  %6924 = vmatprep.subr.bf16.mxu0 %v9034_v6  ;;  %v9057_v26 = vcombine.low %v6189_v1, %v6191_v18  ;;  %v9059_v6 = vcombine.low %v6190_v19, %v6192_v20  ;;  %v9064_v35 = vcombine.high %v6194_v30, %v6196_v32  ;;  %v9942_v1 = vld [vmem:[#allocation8 + $0xe24] ss:$16 sps:$4 sm:$0xff]   ;;  %v9937_v18 = vld [vmem:[#allocation8 + $0xc20] ss:$16 sps:$4 sm:$0xff]  }
 0x555   : > { %7006 = vmatprep.subr.bf16.mxu1 %v9036_v24  ;;  %v9062_v24 = vcombine.high %v6193_v27, %v6195_v29  ;;  %v9940_v19 = vld [vmem:[#allocation8 + $0xe20] ss:$16 sps:$4 sm:$0xff]   ;;  %v9945_v20 = vld [vmem:[#allocation8 + $0xc44] ss:$16 sps:$4 sm:$0xff]  }
 0x557   : > { %6925 = vmatpush1.bf16.msra.mxu0 %v9033_v60  ;;  %v6200_v60 = vld [vmem:[#allocation5 + $0xe78] sm:$0xff] }
 0x558   : > { %7007 = vmatpush1.bf16.msra.mxu1 %v9035_v38  ;;  %6926 = vmatprep.subr.bf16.mxu0 %v9038_v2  ;;  %v9061_v38 = vcombine.low %v6193_v27, %v6195_v29  ;;  %v9063_v2 = vcombine.low %v6194_v30, %v6196_v32  ;;  %v9068_v28 = vcombine.high %v6198_v37, %v6200_v60  ;;  %v9954_v27 = vld [vmem:[#allocation8 + $0xe64] ss:$16 sps:$4 sm:$0xff]   ;;  %v9949_v29 = vld [vmem:[#allocation8 + $0xc60] ss:$16 sps:$4 sm:$0xff]  }
 0x559   : > { %7008 = vmatprep.subr.bf16.mxu1 %v9040_v40  ;;  %v9066_v40 = vcombine.high %v6197_v36, %v6199_v7  ;;  %v9957_v30 = vld [vmem:[#allocation8 + $0xc84] ss:$16 sps:$4 sm:$0xff]  }
 0x55a   : > { %v9960_v32 = vld [vmem:[#allocation8 + $0xe84] ss:$16 sps:$4 sm:$0xff]  }
 0x55b   : > { %6927 = vmatpush1.bf16.msra.mxu0 %v9037_v56  ;;  %v6204_v56 = vld [vmem:[#allocation5 + $0xef8] sm:$0xff] }
 0x55c   : > { %7009 = vmatpush1.bf16.msra.mxu1 %v9039_v44  ;;  %6928 = vmatprep.subr.bf16.mxu0 %v9042_v58  ;;  %v9065_v44 = vcombine.low %v6197_v36, %v6199_v7  ;;  %v9067_v58 = vcombine.low %v6198_v37, %v6200_v60  ;;  %v9072_v15 = vcombine.high %v6202_v43, %v6204_v56  ;;  %v9961_v36 = vld [vmem:[#allocation8 + $0xca0] ss:$16 sps:$4 sm:$0xff]   ;;  %v9969_v37 = vld [vmem:[#allocation8 + $0xcc4] ss:$16 sps:$4 sm:$0xff]  }
 0x55d   : > { %7010 = vmatprep.subr.bf16.mxu1 %v9044_v45  ;;  %v9070_v45 = vcombine.high %v6201_v41, %v6203_v42  ;;  %v9964_v7 = vld [vmem:[#allocation8 + $0xea0] ss:$16 sps:$4 sm:$0xff]  }
 0x55f   : > { %6929 = vmatpush1.bf16.msra.mxu0 %v9041_v52  ;;  %v6208_v52 = vld [vmem:[#allocation5 + $0xf78] sm:$0xff] }
 0x560   : > { %7011 = vmatpush1.bf16.msra.mxu1 %v9043_v39  ;;  %6930 = vmatprep.subr.bf16.mxu0 %v9046_v16  ;;  %v9069_v39 = vcombine.low %v6201_v41, %v6203_v42  ;;  %v9071_v16 = vcombine.low %v6202_v43, %v6204_v56  ;;  %v9076_v54 = vcombine.high %v6206_v47, %v6208_v52  ;;  %v9967_v43 = vld [vmem:[#allocation8 + $0xcc0] ss:$16 sps:$4 sm:$0xff]  }
 0x561   : > { %7012 = vmatprep.subr.bf16.mxu1 %v9048_v53  ;;  %v9074_v53 = vcombine.high %v6205_v63, %v6207_v46 }
 0x563   : > { %6931 = vmatpush1.bf16.msra.mxu0 %v9045_v62  ;;  %v6212_v62 = vld [vmem:[#allocation5 + $0xff8] sm:$0xff] }
 0x564   : > { %7013 = vmatpush1.bf16.msra.mxu1 %v9047_v0  ;;  %6932 = vmatprep.subr.bf16.mxu0 %v9050_v3  ;;  %v9073_v0 = vcombine.low %v6205_v63, %v6207_v46  ;;  %v9075_v3 = vcombine.low %v6206_v47, %v6208_v52  ;;  %v9080_v57 = vcombine.high %v6210_v61, %v6212_v62  ;;  %v9978_v47 = vld [vmem:[#allocation8 + $0xee4] ss:$16 sps:$4 sm:$0xff]  }
 0x565   : > { %7014 = vmatprep.subr.bf16.mxu1 %v9052_v14  ;;  %v9078_v14 = vcombine.high %v6209_v55, %v6211_v59  ;;  %v9079_v10 = vcombine.low %v6210_v61, %v6212_v62  ;;  %v9979_v55 = vld [vmem:[#allocation8 + $0xd00] ss:$16 sps:$4 sm:$0xff]  }
 0x567   : > { %6933 = vmatpush1.bf16.msra.mxu0 %v9049_v11  ;;  %v9936_v11 = vld [vmem:[#allocation8 + $0xe04] ss:$16 sps:$4 sm:$0xff]  }
 0x568   : > { %7015 = vmatpush1.bf16.msra.mxu1 %v9051_v5  ;;  %6934 = vmatprep.subr.bf16.mxu0 %v9054_v33  ;;  %v9931_v5 = vld [vmem:[#allocation8 + $0xc00] ss:$16 sps:$4 sm:$0xff]  }
 0x569   : > { %7016 = vmatprep.subr.bf16.mxu1 %v9056_v17  ;;  %v9934_v33 = vld [vmem:[#allocation8 + $0xe00] ss:$16 sps:$4 sm:$0xff]   ;;  %v9939_v17 = vld [vmem:[#allocation8 + $0xc24] ss:$16 sps:$4 sm:$0xff]  }
 0x56b   : > { %6935 = vmatpush1.bf16.msra.mxu0 %v9053_v12  ;;  %v9948_v12 = vld [vmem:[#allocation8 + $0xe44] ss:$16 sps:$4 sm:$0xff]  }
 0x56c   : > { %7017 = vmatpush1.bf16.msra.mxu1 %v9055_v21  ;;  %6936 = vmatprep.subr.bf16.mxu0 %v9058_v22  ;;  %v9943_v21 = vld [vmem:[#allocation8 + $0xc40] ss:$16 sps:$4 sm:$0xff]  }
 0x56d   : > { %7018 = vmatprep.subr.bf16.mxu1 %v9060_v25  ;;  %v9946_v22 = vld [vmem:[#allocation8 + $0xe40] ss:$16 sps:$4 sm:$0xff]   ;;  %v9951_v25 = vld [vmem:[#allocation8 + $0xc64] ss:$16 sps:$4 sm:$0xff]  }
 0x56f   : > { %6937 = vmatpush1.bf16.msra.mxu0 %v9057_v26  ;;  %v9955_v26 = vld [vmem:[#allocation8 + $0xc80] ss:$16 sps:$4 sm:$0xff]  }
 0x570   : > { %7019 = vmatpush1.bf16.msra.mxu1 %v9059_v6  ;;  %6938 = vmatprep.subr.bf16.mxu0 %v9062_v24  ;;  %v9958_v6 = vld [vmem:[#allocation8 + $0xe80] ss:$16 sps:$4 sm:$0xff]   ;;  %v9963_v24 = vld [vmem:[#allocation8 + $0xca4] ss:$16 sps:$4 sm:$0xff]  }
 0x571   : > { %7020 = vmatprep.subr.bf16.mxu1 %v9064_v35  ;;  %v9966_v35 = vld [vmem:[#allocation8 + $0xea4] ss:$16 sps:$4 sm:$0xff]  }
 0x573   : > { %6939 = vmatpush1.bf16.msra.mxu0 %v9061_v38  ;;  %v9972_v38 = vld [vmem:[#allocation8 + $0xec4] ss:$16 sps:$4 sm:$0xff]  }
 0x574   : > { %7021 = vmatpush1.bf16.msra.mxu1 %v9063_v2  ;;  %6940 = vmatprep.subr.bf16.mxu0 %v9066_v40 }
 0x575   : > { %7022 = vmatprep.subr.bf16.mxu1 %v9068_v28 }
 0x577   : > { %6941 = vmatpush1.bf16.msra.mxu0 %v9065_v44 }
 0x578   : > { %7023 = vmatpush1.bf16.msra.mxu1 %v9067_v58  ;;  %6942 = vmatprep.subr.bf16.mxu0 %v9070_v45  ;;  %v9970_v45 = vld [vmem:[#allocation8 + $0xec0] ss:$16 sps:$4 sm:$0xff]  }
 0x579   : > { %7024 = vmatprep.subr.bf16.mxu1 %v9072_v15  ;;  %v9975_v15 = vld [vmem:[#allocation8 + $0xce4] ss:$16 sps:$4 sm:$0xff]  }
 0x57b   : > { %6943 = vmatpush1.bf16.msra.mxu0 %v9069_v39  ;;  %v9973_v39 = vld [vmem:[#allocation8 + $0xce0] ss:$16 sps:$4 sm:$0xff]  }
 0x57c   : > { %7025 = vmatpush1.bf16.msra.mxu1 %v9071_v16  ;;  %6944 = vmatprep.subr.bf16.mxu0 %v9074_v53  ;;  %v9976_v16 = vld [vmem:[#allocation8 + $0xee0] ss:$16 sps:$4 sm:$0xff]   ;;  %v9981_v53 = vld [vmem:[#allocation8 + $0xd04] ss:$16 sps:$4 sm:$0xff]  }
 0x57d   : > { %7026 = vmatprep.subr.bf16.mxu1 %v9076_v54  ;;  %v9984_v54 = vld [vmem:[#allocation8 + $0xf04] ss:$16 sps:$4 sm:$0xff]  }
 0x57f   : > { %6945 = vmatpush1.bf16.msra.mxu0 %v9073_v0 }
 0x580   : > { %7027 = vmatpush1.bf16.msra.mxu1 %v9075_v3  ;;  %6946 = vmatprep.subr.bf16.mxu0 %v9078_v14 }
 0x581   : > { %7028 = vmatprep.subr.bf16.mxu1 %v9080_v57 }
 0x583   : > { %6947 = vmatpush1.bf16.msra.mxu0 %v9077_v9 }
 0x584   : > { %7029 = vmatpush1.bf16.msra.mxu1 %v9079_v10  ;;  %7847 = vmatprep.subr.bf16.mxu0 %v9933_v4 }
 0x585   : > { %7888 = vmatprep.subr.bf16.mxu1 %v9936_v11 }
 0x586   : > { %6949 = vmatmul.mubr.bf16.vlgmr.msra.gmra.mrb[36].mxu0 %v10661_v23 }
 0x587   : > { %7031 = vmatmul.mubr.bf16.vlgmr.msra.gmra.mrb[36].mxu1 %v10661_v23  ;;  %7848 = vmatpush1.bf16.msra.mxu0 %v9931_v5  ;;  %v9952_v23 = vld [vmem:[#allocation8 + $0xe60] ss:$16 sps:$4 sm:$0xff]   ;;  %v9987_v5 = vld [vmem:[#allocation8 + $0xd24] ss:$16 sps:$4 sm:$0xff]  }
 0x588   : > { %7889 = vmatpush1.bf16.msra.mxu1 %v9934_v33  ;;  %7849 = vmatprep.subr.bf16.mxu0 %v9939_v17  ;;  %v9990_v33 = vld [vmem:[#allocation8 + $0xf24] ss:$16 sps:$4 sm:$0xff]   ;;  %v9985_v17 = vld [vmem:[#allocation8 + $0xd20] ss:$16 sps:$4 sm:$0xff]  }
 0x589   : > { %7890 = vmatprep.subr.bf16.mxu1 %v9942_v1  ;;  %v9988_v1 = vld [vmem:[#allocation8 + $0xf20] ss:$16 sps:$4 sm:$0xff]  }
 0x58b   : > { %7850 = vmatpush1.bf16.msra.mxu0 %v9937_v18  ;;  %v9991_v18 = vld [vmem:[#allocation8 + $0xd40] ss:$16 sps:$4 sm:$0xff]  }
 0x58c   : > { %7891 = vmatpush1.bf16.msra.mxu1 %v9940_v19  ;;  %7851 = vmatprep.subr.bf16.mxu0 %v9945_v20  ;;  %v9993_v19 = vld [vmem:[#allocation8 + $0xd44] ss:$16 sps:$4 sm:$0xff]   ;;  %v9994_v20 = vld [vmem:[#allocation8 + $0xf40] ss:$16 sps:$4 sm:$0xff]  }
 0x58d   : > { %7892 = vmatprep.subr.bf16.mxu1 %v9948_v12  ;;  %v9996_v12 = vld [vmem:[#allocation8 + $0xf44] ss:$16 sps:$4 sm:$0xff]  }
 0x58f   : > { %7852 = vmatpush1.bf16.msra.mxu0 %v9943_v21  ;;  %v9999_v21 = vld [vmem:[#allocation8 + $0xd64] ss:$16 sps:$4 sm:$0xff]  }
 0x590   : > { %7893 = vmatpush1.bf16.msra.mxu1 %v9946_v22  ;;  %7853 = vmatprep.subr.bf16.mxu0 %v9951_v25  ;;  %v10000_v22 = vld [vmem:[#allocation8 + $0xf60] ss:$16 sps:$4 sm:$0xff]   ;;  %v10005_v25 = vld [vmem:[#allocation8 + $0xd84] ss:$16 sps:$4 sm:$0xff]  }
 0x591   : > { %7894 = vmatprep.subr.bf16.mxu1 %v9954_v27  ;;  %v10008_v27 = vld [vmem:[#allocation8 + $0xf84] ss:$16 sps:$4 sm:$0xff]  }
 0x593   : > { %7854 = vmatpush1.bf16.msra.mxu0 %v9949_v29  ;;  %v10003_v29 = vld [vmem:[#allocation8 + $0xd80] ss:$16 sps:$4 sm:$0xff]  }
 0x594   : > { %7895 = vmatpush1.bf16.msra.mxu1 %v9952_v23  ;;  %7855 = vmatprep.subr.bf16.mxu0 %v9957_v30  ;;  %v10006_v23 = vld [vmem:[#allocation8 + $0xf80] ss:$16 sps:$4 sm:$0xff]   ;;  %v10011_v30 = vld [vmem:[#allocation8 + $0xda4] ss:$16 sps:$4 sm:$0xff]  }
 0x595   : > { %7896 = vmatprep.subr.bf16.mxu1 %v9960_v32  ;;  %v10014_v32 = vld [vmem:[#allocation8 + $0xfa4] ss:$16 sps:$4 sm:$0xff]  }
 0x597   : > { %7856 = vmatpush1.bf16.msra.mxu0 %v9955_v26  ;;  %v10009_v26 = vld [vmem:[#allocation8 + $0xda0] ss:$16 sps:$4 sm:$0xff]  }
 0x598   : > { %7897 = vmatpush1.bf16.msra.mxu1 %v9958_v6  ;;  %7857 = vmatprep.subr.bf16.mxu0 %v9963_v24  ;;  %v10012_v6 = vld [vmem:[#allocation8 + $0xfa0] ss:$16 sps:$4 sm:$0xff]   ;;  %v10017_v24 = vld [vmem:[#allocation8 + $0xdc4] ss:$16 sps:$4 sm:$0xff]  }
 0x599   : > { %v5951_v60 = vpop.f32.mrb[28].mxu0  ;;  %7898 = vmatprep.subr.bf16.mxu1 %v9966_v35  ;;  %v10020_v35 = vld [vmem:[#allocation8 + $0xfc4] ss:$16 sps:$4 sm:$0xff]  }
 0x59a   : > { %v5992_v2 = vpop.f32.mrb[28].mxu1  ;;  %v5953_v40 = vpop.f32.mrb[29].mxu0 }
 0x59b   : > { %v5993_v28 = vadd.f32 %v5992_v2, %v5951_v60  ;;  %v5994_v41 = vpop.f32.mrb[29].mxu1  ;;  %v5955_v42 = vpop.f32.mrb[30].mxu0  ;;  %7858 = vmatpush1.bf16.msra.mxu0 %v9961_v36  ;;  %v10015_v36 = vld [vmem:[#allocation8 + $0xdc0] ss:$16 sps:$4 sm:$0xff]   ;;  %v10026_v60 = vld [vmem:[#allocation8 + $0xfe4] ss:$16 sps:$4 sm:$0xff]  }
 0x59c   : > { %v5995_v56 = vadd.f32 %v5994_v41, %v5953_v40  ;;  %v5996_v44 = vpop.f32.mrb[30].mxu1  ;;  %v5956_v58 = vpop.f32.mrb[31].mxu0  ;;  %7899 = vmatpush1.bf16.msra.mxu1 %v9964_v7  ;;  %7859 = vmatprep.subr.bf16.mxu0 %v9969_v37  ;;  %v10018_v7 = vld [vmem:[#allocation8 + $0xfc0] ss:$16 sps:$4 sm:$0xff]   ;;  %v10023_v37 = vld [vmem:[#allocation8 + $0xde4] ss:$16 sps:$4 sm:$0xff]  }
 0x59d   : > { %v10808_v63 = vadd.f32 %v5993_v28, %v10777_v8  ;;  %v5997_v46 = vpop.f32.mrb[31].mxu1  ;;  %7900 = vmatprep.subr.bf16.mxu1 %v9972_v38  ;;  %v9982_v8 = vld [vmem:[#allocation8 + $0xf00] ss:$16 sps:$4 sm:$0xff]   ;;  %v10029_v40 = vld [vmem:[#allocation8 + $0xc0c] ss:$16 sps:$4 sm:$0xff]  }
 0x59e   : > { %v10811_v52 = vadd.f32 %v5995_v56, %v10779_v13  ;;  %v10021_v38 = vld [vmem:[#allocation8 + $0xde0] ss:$16 sps:$4 sm:$0xff]   ;;  %v10032_v28 = vld [vmem:[#allocation8 + $0xe0c] ss:$16 sps:$4 sm:$0xff]  }
 0x59f   : > { %7860 = vmatpush1.bf16.msra.mxu0 %v9967_v43  ;;  %v10024_v2 = vld [vmem:[#allocation8 + $0xfe0] ss:$16 sps:$4 sm:$0xff]   ;;  %v6213_v41 = vld [vmem:[#allocation7 + $0xc] sm:$0xf] }
 0x5a0   : > { %7901 = vmatpush1.bf16.msra.mxu1 %v9970_v45  ;;  %7861 = vmatprep.subr.bf16.mxu0 %v9975_v15  ;;  %v6218_v42 = vrot.slane %v6213_v41, %v10681_v48  ;;  %v6226_v43 = vrot.slane %v6213_v41, %v10683_v49  ;;  %v6222_v56 = vrot.slane %v6213_v41, %v10685_v50 }
 0x5a1   : > { %7902 = vmatprep.subr.bf16.mxu1 %v9978_v47  ;;  %v6230_v44 = vrot.slane %v6213_v41, %v10687_v51  ;;  %v10030_v41 = vld [vmem:[#allocation8 + $0xe08] ss:$16 sps:$4 sm:$0xff]  }
 0x5a3   : > { %7862 = vmatpush1.bf16.msra.mxu0 %v9973_v39 }
 0x5a4   : > { %7903 = vmatpush1.bf16.msra.mxu1 %v9976_v16  ;;  %7863 = vmatprep.subr.bf16.mxu0 %v9981_v53 }
 0x5a5   : > { %7904 = vmatprep.subr.bf16.mxu1 %v9984_v54 }
 0x5a7   : > { %7864 = vmatpush1.bf16.msra.mxu0 %v9979_v55 }
 0x5a8   : > { %7905 = vmatpush1.bf16.msra.mxu1 %v9982_v8  ;;  %7865 = vmatprep.subr.bf16.mxu0 %v9987_v5 }
 0x5a9   : > { %7906 = vmatprep.subr.bf16.mxu1 %v9990_v33 }
 0x5ab   : > { %7866 = vmatpush1.bf16.msra.mxu0 %v9985_v17 }
 0x5ac   : > { %7907 = vmatpush1.bf16.msra.mxu1 %v9988_v1  ;;  %7867 = vmatprep.subr.bf16.mxu0 %v9993_v19 }
 0x5ad   : > { %7908 = vmatprep.subr.bf16.mxu1 %v9996_v12 }
 0x5af   : > { %7868 = vmatpush1.bf16.msra.mxu0 %v9991_v18 }
 0x5b0   : > { %7909 = vmatpush1.bf16.msra.mxu1 %v9994_v20  ;;  %7869 = vmatprep.subr.bf16.mxu0 %v9999_v21 }
 0x5d9   : > { %v6033_v59 = vpop.f32.mrb[32].mxu0 }
 0x5da   : > { %v6074_v61 = vpop.f32.mrb[32].mxu1  ;;  %v6035_v13 = vpop.f32.mrb[33].mxu0 }
 0x5db   : > { %v6075_v62 = vadd.f32 %v6074_v61, %v6033_v59  ;;  %v6076_v0 = vpop.f32.mrb[33].mxu1  ;;  %v6037_v3 = vpop.f32.mrb[34].mxu0 }
 0x5dc   : > { %v6077_v14 = vadd.f32 %v6076_v0, %v6035_v13  ;;  %v6078_v57 = vpop.f32.mrb[34].mxu1  ;;  %v6038_v9 = vpop.f32.mrb[35].mxu0 }
 0x5dd   : > { %v10814_v10 = vadd.f32 %v6075_v62, %v10783_v31  ;;  %v6079_v4 = vpop.f32.mrb[35].mxu1  ;;  %v10002_v31 = vld [vmem:[#allocation8 + $0xf64] ss:$16 sps:$4 sm:$0xff]  }
 0x5de   : > { %v10817_v11 = vadd.f32 %v6077_v14, %v10785_v34  ;;  %v9997_v34 = vld [vmem:[#allocation8 + $0xd60] ss:$16 sps:$4 sm:$0xff]   ;;  %7910 = vmatprep.subr.bf16.mxu1 %v10002_v31 }
 0x5df   : > { %7870 = vmatpush1.bf16.msra.mxu0 %v9997_v34  ;;  %7911 = vmatpush1.bf16.msra.mxu1 %v10000_v22 }
 0x5e0   : > { %7871 = vmatprep.subr.bf16.mxu0 %v10005_v25  ;;  %7912 = vmatprep.subr.bf16.mxu1 %v10008_v27 }
 0x5e3   : > { %7872 = vmatpush1.bf16.msra.mxu0 %v10003_v29  ;;  %7913 = vmatpush1.bf16.msra.mxu1 %v10006_v23 }
 0x5e4   : > { %7873 = vmatprep.subr.bf16.mxu0 %v10011_v30  ;;  %7914 = vmatprep.subr.bf16.mxu1 %v10014_v32 }
 0x5e7   : > { %7874 = vmatpush1.bf16.msra.mxu0 %v10009_v26  ;;  %7915 = vmatpush1.bf16.msra.mxu1 %v10012_v6 }
 0x5e8   : > { %7875 = vmatprep.subr.bf16.mxu0 %v10017_v24  ;;  %7916 = vmatprep.subr.bf16.mxu1 %v10020_v35 }
 0x5eb   : > { %7876 = vmatpush1.bf16.msra.mxu0 %v10015_v36  ;;  %7917 = vmatpush1.bf16.msra.mxu1 %v10018_v7 }
 0x5ec   : > { %7877 = vmatprep.subr.bf16.mxu0 %v10023_v37  ;;  %7918 = vmatprep.subr.bf16.mxu1 %v10026_v60 }
 0x5ef   : > { %7878 = vmatpush1.bf16.msra.mxu0 %v10021_v38  ;;  %7919 = vmatpush1.bf16.msra.mxu1 %v10024_v2  ;;  %v10027_v2 = vld [vmem:[#allocation8 + $0xc08] ss:$16 sps:$4 sm:$0xff]  }
 0x5f0   : > { %7929 = vmatprep.subr.bf16.mxu0 %v10029_v40  ;;  %7970 = vmatprep.subr.bf16.mxu1 %v10032_v28 }
 0x659   : > { %v6950_v58 = vpop.f32.mrb[36].mxu0 }
 0x65a   : > { %v9228_v45 = vadd.f32 %v6950_v58, %v6218_v42  ;;  %v7032_v15 = vpop.f32.mrb[36].mxu1  ;;  %v6952_v46 = vpop.f32.mrb[37].mxu0  ;;  %v10033_v58 = vld [vmem:[#allocation8 + $0xc28] ss:$16 sps:$4 sm:$0xff]  }
 0x65b   : > { %v9230_v47 = vadd.f32 %v7032_v15, %v6226_v43  ;;  %v9229_v39 = vadd.f32 %v6952_v46, %v6222_v56  ;;  %v7034_v16 = vpop.f32.mrb[37].mxu1  ;;  %v6954_v53 = vpop.f32.mrb[38].mxu0  ;;  %v10035_v56 = vld [vmem:[#allocation8 + $0xc2c] ss:$16 sps:$4 sm:$0xff]  }
 0x65c   : > { %v7043_v54 = vmul.f32 0.044715, %v9228_v45  ;;  %v9231_v55 = vadd.f32 %v7034_v16, %v6230_v44  ;;  %v7036_v8 = vpop.f32.mrb[38].mxu1  ;;  %v6955_v59 = vpop.f32.mrb[39].mxu0  ;;  %v7039_v27 = vmul.f32 0.5, %v9228_v45 }
 0x65d   : > { %v7045_v61 = vmul.f32 0.044715, %v9230_v47  ;;  %v7044_v13 = vmul.f32 0.044715, %v9229_v39  ;;  %v7037_v62 = vpop.f32.mrb[39].mxu1  ;;  %v7040_v30 = vmul.f32 0.5, %v9229_v39 }
 0x65e   : > { %v7047_v0 = vmul.f32 %v9228_v45, %v7043_v54  ;;  %v7046_v3 = vmul.f32 0.044715, %v9231_v55  ;;  %v7042_v6 = vmul.f32 0.5, %v9231_v55  ;;  %v7041_v7 = vmul.f32 0.5, %v9230_v47  ;;  %v10038_v44 = vld [vmem:[#allocation8 + $0xe2c] ss:$16 sps:$4 sm:$0xff]  }
 0x65f   : > { %v7049_v14 = vmul.f32 %v9230_v47, %v7045_v61  ;;  %v7048_v57 = vmul.f32 %v9229_v39, %v7044_v13  ;;  %v10041_v15 = vld [vmem:[#allocation8 + $0xc4c] ss:$16 sps:$4 sm:$0xff]   ;;  %v10045_v54 = vld [vmem:[#allocation8 + $0xc68] ss:$16 sps:$4 sm:$0xff]  }
 0x660   : > { %v7051_v9 = vmul.f32 %v9228_v45, %v7047_v0  ;;  %v7050_v4 = vmul.f32 %v9231_v55, %v7046_v3  ;;  %v10044_v46 = vld [vmem:[#allocation8 + $0xe4c] ss:$16 sps:$4 sm:$0xff]   ;;  %v10051_v61 = vld [vmem:[#allocation8 + $0xc88] ss:$16 sps:$4 sm:$0xff]  }
 0x661   : > { %v7053_v5 = vmul.f32 %v9230_v47, %v7049_v14  ;;  %v7052_v33 = vmul.f32 %v9229_v39, %v7048_v57  ;;  %v10047_v16 = vld [vmem:[#allocation8 + $0xc6c] ss:$16 sps:$4 sm:$0xff]   ;;  %v10054_v13 = vld [vmem:[#allocation8 + $0xe88] ss:$16 sps:$4 sm:$0xff]  }
 0x662   : > { %v7055_v17 = vadd.f32 %v9228_v45, %v7051_v9  ;;  %v7054_v1 = vmul.f32 %v9231_v55, %v7050_v4  ;;  %v10036_v45 = vld [vmem:[#allocation8 + $0xe28] ss:$16 sps:$4 sm:$0xff]   ;;  %v10050_v53 = vld [vmem:[#allocation8 + $0xe6c] ss:$16 sps:$4 sm:$0xff]  }
 0x663   : > { %v7057_v18 = vadd.f32 %v9230_v47, %v7053_v5  ;;  %v7056_v19 = vadd.f32 %v9229_v39, %v7052_v33  ;;  %v10039_v47 = vld [vmem:[#allocation8 + $0xc48] ss:$16 sps:$4 sm:$0xff]   ;;  %v10053_v8 = vld [vmem:[#allocation8 + $0xc8c] ss:$16 sps:$4 sm:$0xff]  }
 0x664   : > { %v7058_v20 = vadd.f32 %v9231_v55, %v7054_v1  ;;  %v7059_v12 = vmul.f32 0.7978846, %v7055_v17  ;;  %v10042_v39 = vld [vmem:[#allocation8 + $0xe48] ss:$16 sps:$4 sm:$0xff]   ;;  %v10056_v59 = vld [vmem:[#allocation8 + $0xe8c] ss:$16 sps:$4 sm:$0xff]  }
 0x665   : > { %v7060_v21 = vmul.f32 0.7978846, %v7056_v19  ;;  %v7061_v31 = vmul.f32 0.7978846, %v7057_v18  ;;  %v10048_v55 = vld [vmem:[#allocation8 + $0xe68] ss:$16 sps:$4 sm:$0xff]  }
 0x666   : > { %v7062_v34 = vmul.f32 0.7978846, %v7058_v20  ;;  %10147 = vtanh.f32 %v7059_v12  ;;  %v10059_v62 = vld [vmem:[#allocation8 + $0xcac] ss:$16 sps:$4 sm:$0xff]   ;;  %v10057_v3 = vld [vmem:[#allocation8 + $0xca8] ss:$16 sps:$4 sm:$0xff]  }
 0x667   : > { %10149 = vtanh.f32 %v7060_v21  ;;  %v10062_v0 = vld [vmem:[#allocation8 + $0xeac] ss:$16 sps:$4 sm:$0xff]   ;;  %v10060_v14 = vld [vmem:[#allocation8 + $0xea8] ss:$16 sps:$4 sm:$0xff]  }
 0x668   : > { %10151 = vtanh.f32 %v7062_v34  ;;  %v10065_v57 = vld [vmem:[#allocation8 + $0xccc] ss:$16 sps:$4 sm:$0xff]   ;;  %v10063_v4 = vld [vmem:[#allocation8 + $0xcc8] ss:$16 sps:$4 sm:$0xff]  }
 0x669   : > { %10153 = vtanh.f32 %v7061_v31  ;;  %v10068_v9 = vld [vmem:[#allocation8 + $0xecc] ss:$16 sps:$4 sm:$0xff]   ;;  %v10066_v5 = vld [vmem:[#allocation8 + $0xec8] ss:$16 sps:$4 sm:$0xff]  }
 0x66a   : > { %v10071_v33 = vld [vmem:[#allocation8 + $0xcec] ss:$16 sps:$4 sm:$0xff]   ;;  %v10069_v1 = vld [vmem:[#allocation8 + $0xce8] ss:$16 sps:$4 sm:$0xff]  }
 0x66b   : > { %v10074_v17 = vld [vmem:[#allocation8 + $0xeec] ss:$16 sps:$4 sm:$0xff]   ;;  %v10072_v18 = vld [vmem:[#allocation8 + $0xee8] ss:$16 sps:$4 sm:$0xff]  }
 0x66c   : > { %v10077_v19 = vld [vmem:[#allocation8 + $0xd0c] ss:$16 sps:$4 sm:$0xff]   ;;  %v10075_v12 = vld [vmem:[#allocation8 + $0xd08] ss:$16 sps:$4 sm:$0xff]  }
 0x66d   : > { %v10080_v20 = vld [vmem:[#allocation8 + $0xf0c] ss:$16 sps:$4 sm:$0xff]   ;;  %v10078_v21 = vld [vmem:[#allocation8 + $0xf08] ss:$16 sps:$4 sm:$0xff]  }
 0x66e   : > { %v10083_v31 = vld [vmem:[#allocation8 + $0xd2c] ss:$16 sps:$4 sm:$0xff]  }
 0x66f   : > { %v10086_v34 = vld [vmem:[#allocation8 + $0xf2c] ss:$16 sps:$4 sm:$0xff]  }
 0x670   : > { %v10148_v22 = vpop.eup %10147 }
 0x671   : > { %v10150_v25 = vpop.eup %10149  ;;  %v7067_v29 = vadd.f32 1.0, %v10148_v22  ;;  %v10081_v22 = vld [vmem:[#allocation8 + $0xd28] ss:$16 sps:$4 sm:$0xff]  }
 0x672   : > { %v10152_v23 = vpop.eup %10151  ;;  %v7068_v32 = vadd.f32 1.0, %v10150_v25  ;;  %v10084_v25 = vld [vmem:[#allocation8 + $0xf28] ss:$16 sps:$4 sm:$0xff]  }
 0x673   : > { %v10154_v26 = vpop.eup %10153  ;;  %v7070_v24 = vadd.f32 1.0, %v10152_v23  ;;  %v7071_v35 = vmul.f32 %v7067_v29, %v7039_v27  ;;  %v10089_v27 = vld [vmem:[#allocation8 + $0xd4c] ss:$16 sps:$4 sm:$0xff]   ;;  %v10087_v23 = vld [vmem:[#allocation8 + $0xd48] ss:$16 sps:$4 sm:$0xff]  }
 0x674   : > { %v7072_v36 = vmul.f32 %v7068_v32, %v7040_v30  ;;  %v7069_v37 = vadd.f32 1.0, %v10154_v26  ;;  %v10092_v29 = vld [vmem:[#allocation8 + $0xf4c] ss:$16 sps:$4 sm:$0xff]   ;;  %v10090_v30 = vld [vmem:[#allocation8 + $0xf48] ss:$16 sps:$4 sm:$0xff]  }
 0x675   : > { %v7074_v60 = vmul.f32 %v7070_v24, %v7042_v6  ;;  %v10823_v42 = vpack.c.bf16 %v7071_v35, %v7071_v35  ;;  %v10095_v32 = vld [vmem:[#allocation8 + $0xd6c] ss:$16 sps:$4 sm:$0xff]   ;;  %v10093_v6 = vld [vmem:[#allocation8 + $0xd68] ss:$16 sps:$4 sm:$0xff]  }
 0x676   : > { %v7076_v38 = vpack.c.bf16 %v7072_v36, %v7072_v36  ;;  %v7073_v40 = vmul.f32 %v7069_v37, %v7041_v7  ;;  %v10098_v26 = vld [vmem:[#allocation8 + $0xf6c] ss:$16 sps:$4 sm:$0xff]   ;;  %v10096_v24 = vld [vmem:[#allocation8 + $0xf68] ss:$16 sps:$4 sm:$0xff]  }
 0x677   : > { %v7078_v28 = vpack.c.bf16 %v7074_v60, %v7074_v60  ;;  %v10101_v35 = vld [vmem:[#allocation8 + $0xd8c] ss:$16 sps:$4 sm:$0xff]   ;;  %v10099_v7 = vld [vmem:[#allocation8 + $0xd88] ss:$16 sps:$4 sm:$0xff]  }
 0x678   : > { %7879 = vmatprep.mubr.bf16.mxu0 %v7076_v38  ;;  %v10825_v43 = vpack.c.bf16 %v7073_v40, %v7073_v40  ;;  %v10104_v36 = vld [vmem:[#allocation8 + $0xf8c] ss:$16 sps:$4 sm:$0xff]   ;;  %v10102_v37 = vld [vmem:[#allocation8 + $0xf88] ss:$16 sps:$4 sm:$0xff]  }
 0x679   : > { %7920 = vmatprep.mubr.bf16.mxu1 %v7078_v28  ;;  %7880 = vmatmul.mubr.bf16.vlgmr.msra.gmra.mrb[40].mxu0 %v10823_v42  ;;  %v10107_v60 = vld [vmem:[#allocation8 + $0xdac] ss:$16 sps:$4 sm:$0xff]   ;;  %v10108_v40 = vld [vmem:[#allocation8 + $0xfa8] ss:$16 sps:$4 sm:$0xff]  }
 0x67a   : > { %7921 = vmatmul.mubr.bf16.vlgmr.msra.gmra.mrb[40].mxu1 %v10825_v43  ;;  %7930 = vmatpush1.bf16.msra.mxu0 %v10027_v2  ;;  %v10105_v2 = vld [vmem:[#allocation8 + $0xda8] ss:$16 sps:$4 sm:$0xff]  }
 0x67b   : > { %7971 = vmatpush1.bf16.msra.mxu1 %v10030_v41  ;;  %7961 = vmatprep.mubr.bf16.mxu0 %v7076_v38  ;;  %v10110_v38 = vld [vmem:[#allocation8 + $0xfac] ss:$16 sps:$4 sm:$0xff]  }
 0x67c   : > { %8002 = vmatprep.mubr.bf16.mxu1 %v7078_v28  ;;  %7931 = vmatprep.subr.bf16.mxu0 %v10035_v56  ;;  %v10113_v28 = vld [vmem:[#allocation8 + $0xdcc] ss:$16 sps:$4 sm:$0xff]   ;;  %v10111_v56 = vld [vmem:[#allocation8 + $0xdc8] ss:$16 sps:$4 sm:$0xff]  }
 0x67d   : > { %7972 = vmatprep.subr.bf16.mxu1 %v10038_v44  ;;  %v10116_v41 = vld [vmem:[#allocation8 + $0xfcc] ss:$16 sps:$4 sm:$0xff]   ;;  %v10114_v44 = vld [vmem:[#allocation8 + $0xfc8] ss:$16 sps:$4 sm:$0xff]  }
 0x67e   : > { %7932 = vmatpush1.bf16.msra.mxu0 %v10033_v58  ;;  %v10119_v58 = vld [vmem:[#allocation8 + $0xdec] ss:$16 sps:$4 sm:$0xff]  }
 0x67f   : > { %7973 = vmatpush1.bf16.msra.mxu1 %v10036_v45  ;;  %7933 = vmatprep.subr.bf16.mxu0 %v10041_v15  ;;  %v10122_v45 = vld [vmem:[#allocation8 + $0xfec] ss:$16 sps:$4 sm:$0xff]   ;;  %v10117_v15 = vld [vmem:[#allocation8 + $0xde8] ss:$16 sps:$4 sm:$0xff]  }
 0x680   : > { %7974 = vmatprep.subr.bf16.mxu1 %v10044_v46  ;;  %v10120_v46 = vld [vmem:[#allocation8 + $0xfe8] ss:$16 sps:$4 sm:$0xff]  }
 0x682   : > { %7934 = vmatpush1.bf16.msra.mxu0 %v10039_v47  ;;  %v8015_v47 = vld [vmem:[#allocation10] sm:$0xf] }
 0x683   : > { %7975 = vmatpush1.bf16.msra.mxu1 %v10042_v39  ;;  %7935 = vmatprep.subr.bf16.mxu0 %v10047_v16 }
 0x684   : > { %7976 = vmatprep.subr.bf16.mxu1 %v10050_v53 }
 0x686   : > { %7936 = vmatpush1.bf16.msra.mxu0 %v10045_v54 }
 0x687   : > { %7977 = vmatpush1.bf16.msra.mxu1 %v10048_v55  ;;  %7937 = vmatprep.subr.bf16.mxu0 %v10053_v8  ;;  %v8020_v55 = vrot.slane %v8015_v47, %v10681_v48 }
 0x688   : > { %7978 = vmatprep.subr.bf16.mxu1 %v10056_v59 }
 0x68a   : > { %7938 = vmatpush1.bf16.msra.mxu0 %v10051_v61 }
 0x68b   : > { %7979 = vmatpush1.bf16.msra.mxu1 %v10054_v13  ;;  %7939 = vmatprep.subr.bf16.mxu0 %v10059_v62  ;;  %v8024_v13 = vrot.slane %v8015_v47, %v10685_v50  ;;  %v8028_v50 = vrot.slane %v8015_v47, %v10683_v49 }
 0x68c   : > { %7980 = vmatprep.subr.bf16.mxu1 %v10062_v0 }
 0x68e   : > { %7940 = vmatpush1.bf16.msra.mxu0 %v10057_v3 }
 0x68f   : > { %7981 = vmatpush1.bf16.msra.mxu1 %v10060_v14  ;;  %7941 = vmatprep.subr.bf16.mxu0 %v10065_v57 }
 0x690   : > { %7982 = vmatprep.subr.bf16.mxu1 %v10068_v9 }
 0x692   : > { %7942 = vmatpush1.bf16.msra.mxu0 %v10063_v4 }
 0x693   : > { %7983 = vmatpush1.bf16.msra.mxu1 %v10066_v5  ;;  %7943 = vmatprep.subr.bf16.mxu0 %v10071_v33 }
 0x694   : > { %7984 = vmatprep.subr.bf16.mxu1 %v10074_v17 }
 0x696   : > { %7944 = vmatpush1.bf16.msra.mxu0 %v10069_v1  ;;  %v8032_v1 = vrot.slane %v8015_v47, %v10687_v51 }
 0x697   : > { %7985 = vmatpush1.bf16.msra.mxu1 %v10072_v18  ;;  %7945 = vmatprep.subr.bf16.mxu0 %v10077_v19 }
 0x698   : > { %7986 = vmatprep.subr.bf16.mxu1 %v10080_v20 }
 0x69a   : > { %7946 = vmatpush1.bf16.msra.mxu0 %v10075_v12 }
 0x69b   : > { %7987 = vmatpush1.bf16.msra.mxu1 %v10078_v21  ;;  %7947 = vmatprep.subr.bf16.mxu0 %v10083_v31 }
 0x69c   : > { %7988 = vmatprep.subr.bf16.mxu1 %v10086_v34 }
 0x69e   : > { %7948 = vmatpush1.bf16.msra.mxu0 %v10081_v22 }
 0x69f   : > { %7989 = vmatpush1.bf16.msra.mxu1 %v10084_v25  ;;  %7949 = vmatprep.subr.bf16.mxu0 %v10089_v27 }
 0x6a0   : > { %7990 = vmatprep.subr.bf16.mxu1 %v10092_v29 }
 0x6a2   : > { %7950 = vmatpush1.bf16.msra.mxu0 %v10087_v23 }
 0x6a3   : > { %7991 = vmatpush1.bf16.msra.mxu1 %v10090_v30  ;;  %7951 = vmatprep.subr.bf16.mxu0 %v10095_v32 }
 0x6a4   : > { %7992 = vmatprep.subr.bf16.mxu1 %v10098_v26 }
 0x6a6   : > { %7952 = vmatpush1.bf16.msra.mxu0 %v10093_v6 }
 0x6a7   : > { %7993 = vmatpush1.bf16.msra.mxu1 %v10096_v24  ;;  %7953 = vmatprep.subr.bf16.mxu0 %v10101_v35 }
 0x6a8   : > { %7994 = vmatprep.subr.bf16.mxu1 %v10104_v36 }
 0x6aa   : > { %7954 = vmatpush1.bf16.msra.mxu0 %v10099_v7 }
 0x6ab   : > { %7995 = vmatpush1.bf16.msra.mxu1 %v10102_v37  ;;  %7955 = vmatprep.subr.bf16.mxu0 %v10107_v60 }
 0x6ac   : > { %7996 = vmatprep.subr.bf16.mxu1 %v10110_v38 }
 0x6ae   : > { %7956 = vmatpush1.bf16.msra.mxu0 %v10105_v2 }
 0x6af   : > { %7997 = vmatpush1.bf16.msra.mxu1 %v10108_v40  ;;  %7957 = vmatprep.subr.bf16.mxu0 %v10113_v28 }
 0x6b0   : > { %7998 = vmatprep.subr.bf16.mxu1 %v10116_v41 }
 0x6b2   : > { %7958 = vmatpush1.bf16.msra.mxu0 %v10111_v56 }
 0x6b3   : > { %7999 = vmatpush1.bf16.msra.mxu1 %v10114_v44  ;;  %7959 = vmatprep.subr.bf16.mxu0 %v10119_v58 }
 0x6b4   : > { %8000 = vmatprep.subr.bf16.mxu1 %v10122_v45 }
 0x6b6   : > { %7960 = vmatpush1.bf16.msra.mxu0 %v10117_v15 }
 0x6b7   : > { %8001 = vmatpush1.bf16.msra.mxu1 %v10120_v46 }
 0x6b9   : > { %7962 = vmatmul.mubr.bf16.vlgmr.msra.gmra.mrb[44].mxu0 %v10823_v42 }
 0x6ba   : > { %8003 = vmatmul.mubr.bf16.vlgmr.msra.gmra.mrb[44].mxu1 %v10825_v43 }
 0x74c   : > { %v7881_v39 = vpop.f32.mrb[40].mxu0 }
 0x74d   : > { %v7922_v16 = vpop.f32.mrb[40].mxu1  ;;  %v7883_v53 = vpop.f32.mrb[41].mxu0 }
 0x74e   : > { %v7923_v54 = vadd.f32 %v7922_v16, %v7881_v39  ;;  %v7924_v8 = vpop.f32.mrb[41].mxu1  ;;  %v7885_v59 = vpop.f32.mrb[42].mxu0 }
 0x74f   : > { %v7925_v61 = vadd.f32 %v7924_v8, %v7883_v53  ;;  %v7926_v62 = vpop.f32.mrb[42].mxu1  ;;  %v7886_v0 = vpop.f32.mrb[43].mxu0 }
 0x750   : > { %v8011_v3 = vadd.f32 %v7923_v54, %v10808_v63  ;;  %v7927_v42 = vpop.f32.mrb[43].mxu1 }
 0x751   : > { %v8012_v43 = vadd.f32 %v7925_v61, %v10811_v52 }
 0x752   : > { %v8037_v14 = vadd.f32 %v8020_v55, %v8011_v3 }
 0x753   : > { %v8038_v57 = vadd.f32 %v8024_v13, %v8012_v43 }
 0x754   : > { %8041 = vst [vmem:[%s294_s25] sm:$0xff] %v8037_v14 }
 0x755   : > { %8042 = vst [vmem:[%s294_s25 + $0x8] sm:$0xff] %v8038_v57 }
 0x78c   : > { %v7963_v48 = vpop.f32.mrb[44].mxu0 }
 0x78d   : > { %v8004_v9 = vpop.f32.mrb[44].mxu1  ;;  %v7965_v4 = vpop.f32.mrb[45].mxu0 }
 0x78e   : > { %v8005_v5 = vadd.f32 %v8004_v9, %v7963_v48  ;;  %v8006_v33 = vpop.f32.mrb[45].mxu1  ;;  %v7967_v17 = vpop.f32.mrb[46].mxu0 }
 0x78f   : > { %v8007_v63 = vadd.f32 %v8006_v33, %v7965_v4  ;;  %v8008_v52 = vpop.f32.mrb[46].mxu1  ;;  %v7968_v18 = vpop.f32.mrb[47].mxu0 }
 0x790   : > { %v8013_v19 = vadd.f32 %v8005_v5, %v10814_v10  ;;  %v8009_v20 = vpop.f32.mrb[47].mxu1 }
 0x791   : > { %v8014_v12 = vadd.f32 %v8007_v63, %v10817_v11 }
 0x792   : > { %v8039_v21 = vadd.f32 %v8028_v50, %v8013_v19 }
 0x793   : > { %v8040_v31 = vadd.f32 %v8032_v1, %v8014_v12 }
 0x794   : > { %8043 = vst [vmem:[%s294_s25 + $0x10] sm:$0xff] %v8039_v21 }
 0x795   : > { %8044 = vst [vmem:[%s294_s25 + $0x18] sm:$0xff] %v8040_v31 }
 0x796   : > { %10310 = shalt.err (!%p10307_p12)
}
 0x797   : > { %s10311_s16 = scalar_lea.hbm %s10845_s29, 512  ;;  %s10315_s6 = scalar_lea.hbm %s10894_s5, 1024 }
 0x798   : > { %p10312_p13 = scmp.ne.s32.totalorder %s10845_s29, %s10311_s16  ;;  %p10316_p9 = scmp.lt.u32.totalorder %s10845_s29, %s10894_s5 }
 0x799   : > { %p10317_p4 = scmp.lt.u32.totalorder %s10315_s6, %s10311_s16  ;;  %p10319_p6 = scmp.lt.u32.totalorder %s10311_s16, %s10845_s29 }
 0x79a   : > { %p10313_p1 = pnand %p10312_p13, %p10912_p0 }
 0x79b   : > { %p10318_p8 = por %p10317_p4, %p10316_p9 }
 0x79c   : > { %p10314_p7 = pneg %p10313_p1 }
 0x79d   : > { %p10320_p2 = por %p10319_p6, %p10318_p8 }
 0x79f   : > { %p10321_p5 = pnand %p10320_p2, %p10314_p7 }
 0x7a1   : > { %10324 = shalt.err (!%p10321_p5)
}
 0x7a2   : > { %9282 = dma.vmem_to_hbm [thread:$0]  (%p10912_p0), %s10847_s17, 512, %s10845_s29, %s8046_s27  }
 0x7a3 PF: > { %s8072_s25 = sand.u32 1, %s10359_s18   ;;  %p10913_p10 = scmp.ne.s32.totalorder %s10905_s12, 0 }
 0x7a4   : > { %p10914_p11 = scmp.ge.s32.totalorder %s10371_s21, 2  ;;  %s8073_s9 = scalar_lea.sflag [#allocation4], %s8072_s25 }
 0x7a6   : > { %p9302_p3 = pnand %p10914_p11, %p10913_p10 }
 0x7a8   : > { %10354 = dma.done.wait (!%p9302_p3), %s8073_s9, 512  }
 0x7a9   : > { %10356 = vsyncadd (!%p9302_p3), %s8073_s9, 4294966784  ;;  %p20_p12 = scmp.ge.s32.totalorder %s10549_s28, 4   ;;  %s10915_s18 = smov %s10363_s19 }
 0x7aa   : > { %s10916_s19 = smov %s10367_s20  ;;  %s10917_s20 = smov %s10560_s8 }
 0x7ab   : > { %s10918_s21 = smov %s10549_s28  ;;  %22 = sbr.rel (!%p20_p12) target bundleno = 7 (0x7), region = 101 }
 0x7b2   :  { %8078 = vsyncpa [#allocation3], 1 }
 0x7b3   :  { %8080 = vsyncpa [#allocation3 + $0x1], 1 }
 0x7b4   :  { %8081 = vsyncpa [#allocation6], 1 }
 0x7b5   :  { %8082 = vsyncpa [#allocation9], 1 }
 0x7b6   :  { %8083 = vsyncpa [#allocation4], 1 }
 0x7b7   :  { %8085 = vsyncpa [#allocation4 + $0x1], 1 }

</bundles_post_ra>
